<compile_context>
chip_gen: v7x
topology: tpu7x:2x2x1
jax: 0.10.0
libtpu: 0.0.40
codegen_flags: <defaults>
</compile_context>

<pallas_src>
import functools
import math

import jax
import jax.numpy as jnp
from jax.experimental import pallas as pl
from jax.experimental.pallas import tpu as pltpu


# bf16 matmul inputs (MXU-native on all TPU generations); accum & elementwise f32.
MATMUL_DTYPE = jnp.bfloat16
# TODO(synk): on v7x, weights could additionally be stored in fp8 (MXU fp8 path)
# to halve weight DMA/VMEM; skipped pending accuracy validation.


# ----------------------------- setup helpers ------------------------------ #

def _round_up(x, m):
    return ((x + m - 1) // m) * m


@functools.lru_cache(maxsize=None)
def _vmem_limit_bytes():
    """Generation-aware scoped-VMEM request (~7/8 of physical capacity)."""
    cap = 64 * 1024 * 1024
    try:
        info = pltpu.get_tpu_info()
        cap = int(getattr(info, "vmem_capacity_bytes", cap)) or cap
    except Exception:
        pass
    return max(16 * 1024 * 1024, (cap // 8) * 7)


@functools.lru_cache(maxsize=None)
def _big_vmem():
    # True on 128-MiB-VMEM parts (v5e/v6e), False on v7x-class 64 MiB parts.
    return _vmem_limit_bytes() >= 80 * 1024 * 1024


@functools.lru_cache(maxsize=None)
def _buffered_supported():
    """Probe whether BlockSpec(pipeline_mode=pl.Buffered(1)) is accepted."""
    try:
        def k(x_ref, o_ref):
            o_ref[...] = x_ref[...]
        x = jnp.zeros((8, 128), jnp.float32)
        pl.pallas_call(
            k,
            grid=(1,),
            in_specs=[pl.BlockSpec((8, 128), lambda i: (0, 0),
                                   pipeline_mode=pl.Buffered(1))],
            out_specs=pl.BlockSpec((8, 128), lambda i: (0, 0)),
            out_shape=jax.ShapeDtypeStruct((8, 128), jnp.float32),
        )(x)
        return True
    except Exception:
        return False


def _const_spec(shape):
    """BlockSpec for grid-invariant (weight / bias / LN) operands.

    Single-buffered when supported: these blocks never change across grid
    steps, so the default double buffer only wastes VMEM (make-or-break for
    weight residency on v7x)."""
    idx = lambda *_: (0,) * len(shape)
    if _buffered_supported():
        return pl.BlockSpec(shape, idx, pipeline_mode=pl.Buffered(1))
    return pl.BlockSpec(shape, idx)


def _row_tile(m, target):
    """Row tile for arbitrary m: fixed target, caller pads m up to a multiple."""
    if m <= target:
        return _round_up(m, 16)
    return target


def _seq_tile(m, target):
    """Largest multiple-of-128 tile <= target that divides m (m % 128 == 0)."""
    t = min(target, m)
    t -= t % 128
    while t > 128 and m % t:
        t -= 128
    return max(t, 128)


def _pad_rows(x, mult):
    m = x.shape[0]
    mp = _round_up(m, mult)
    if mp != m:
        x = jnp.pad(x, ((0, mp - m),) + ((0, 0),) * (x.ndim - 1))
    return x, mp


# ----------------------------- math helpers -------------------------------- #

def _gelu(x):
    # exact (erf-based) GELU, matching torch.nn.functional.gelu default
    return 0.5 * x * (1.0 + jax.lax.erf(x * (1.0 / math.sqrt(2.0))))


def _complex_ln(x, w, b):
    # x is packed [real_D | imag_D]; LN stats over 2D features are permutation
    # invariant, so this matches nn.LayerNorm(2D) on the interleaved features
    # given w/b were permuted to packed order at pack time.
    mean = jnp.mean(x, axis=-1, keepdims=True)
    var = jnp.mean(jnp.square(x - mean), axis=-1, keepdims=True)
    return (x - mean) * jax.lax.rsqrt(var + 1e-5) * w + b


# ----------------------------- kernels ------------------------------------ #

def _patch_embed_kernel(x_ref, w_ref, b_ref, o_ref):
    o_ref[...] = (jnp.dot(x_ref[...], w_ref[...],
                          preferred_element_type=jnp.float32) + b_ref[...])


def patch_embed_matmul(x, w, b):
    """Patchify Conv2d (kernel=stride=patch) lowered to a row matmul.
    `x` arrives in bf16 (cast in the wrapper -> half the HBM->VMEM bytes)."""
    M0, K = x.shape
    N = w.shape[1]
    tm = _row_tile(M0, 512 if _big_vmem() else 256)
    x, M = _pad_rows(x, tm)
    out = pl.pallas_call(
        _patch_embed_kernel,
        grid=(M // tm,),
        in_specs=[pl.BlockSpec((tm, K), lambda i: (i, 0)),
                  _const_spec((K, N)),
                  _const_spec((1, N))],
        out_specs=pl.BlockSpec((tm, N), lambda i: (i, 0)),
        out_shape=jax.ShapeDtypeStruct((M, N), jnp.float32),
        compiler_params=pltpu.CompilerParams(
            dimension_semantics=("parallel",),
            vmem_limit_bytes=_vmem_limit_bytes()),
    )(x, w, b.reshape(1, N))
    return out[:M0]


def _ln_gelu_kernel(x_ref, w_ref, b_ref, o_ref):
    x = x_ref[...]
    mean = jnp.mean(x, axis=-1, keepdims=True)
    var = jnp.mean(jnp.square(x - mean), axis=-1, keepdims=True)
    y = (x - mean) * jax.lax.rsqrt(var + 1e-5) * w_ref[...] + b_ref[...]
    o_ref[...] = _gelu(y)


def ln_gelu(x, w, b):
    # LayerNorm + GELU over the W' axis of the NCHW conv output (runs once).
    # TODO(synk): last dim = Hp (= 2*outer_dim) is lane-dense only for
    # outer_dim >= 64; one-shot prologue, left as is.
    M0, F = x.shape
    tm = _row_tile(M0, 512 if _big_vmem() else 256)
    x, M = _pad_rows(x, tm)
    out = pl.pallas_call(
        _ln_gelu_kernel,
        grid=(M // tm,),
        in_specs=[pl.BlockSpec((tm, F), lambda i: (i, 0)),
                  _const_spec((1, F)),
                  _const_spec((1, F))],
        out_specs=pl.BlockSpec((tm, F), lambda i: (i, 0)),
        out_shape=jax.ShapeDtypeStruct((M, F), jnp.float32),
        compiler_params=pltpu.CompilerParams(
            dimension_semantics=("parallel",),
            vmem_limit_bytes=_vmem_limit_bytes()),
    )(x, w.reshape(1, F), b.reshape(1, F))
    return out[:M0]


def _ln_qkv_kernel(x_ref, lnw_ref, lnb_ref, w_ref, b_ref,
                   q_ref, k_ref, v_ref, *, d2):
    # LN1 -> single packed (2D x 6D) QKV matmul; emit bf16 Q/K/V.
    xn = _complex_ln(x_ref[...], lnw_ref[...], lnb_ref[...])
    qkv = (jnp.dot(xn.astype(MATMUL_DTYPE), w_ref[...],
                   preferred_element_type=jnp.float32) + b_ref[...])
    qkv = qkv.astype(MATMUL_DTYPE)     # bf16 intermediate: half HBM/VMEM bytes
    q_ref[...] = qkv[:, :d2]
    k_ref[...] = qkv[:, d2:2 * d2]
    v_ref[...] = qkv[:, 2 * d2:]


def ln_qkv(x2d, lnw, lnb, wqkv, bqkv):
    M, d2 = x2d.shape            # M = B * S_pad  (multiple of 128)
    d6 = wqkv.shape[1]
    tm = _seq_tile(M, 1024 if _big_vmem() else 512)
    kern = functools.partial(_ln_qkv_kernel, d2=d2)
    qkv_shape = jax.ShapeDtypeStruct((M, d2), MATMUL_DTYPE)
    return pl.pallas_call(
        kern,
        grid=(M // tm,),
        in_specs=[pl.BlockSpec((tm, d2), lambda i: (i, 0)),
                  _const_spec((1, d2)), _const_spec((1, d2)),
                  _const_spec((d2, d6)), _const_spec((1, d6))],
        out_specs=[pl.BlockSpec((tm, d2), lambda i: (i, 0))] * 3,
        out_shape=(qkv_shape, qkv_shape, qkv_shape),
        compiler_params=pltpu.CompilerParams(
            dimension_semantics=("parallel",),
            vmem_limit_bytes=_vmem_limit_bytes()),
    )(x2d, lnw, lnb, wqkv, bqkv)


def _flash_attn_kernel(x_ref, q_ref, k_ref, v_ref, wp_ref, bp_ref, o_ref,
                       m_sc, l_sc, acc_sc, *, seq_len, seq_pad, tk):
    # Flash-style complex attention + output proj + residual.
    ki = pl.program_id(2)

    @pl.when(ki == 0)
    def _():
        m_sc[...] = jnp.full_like(m_sc, -1e30)
        l_sc[...] = jnp.zeros_like(l_sc)
        acc_sc[...] = jnp.zeros_like(acc_sc)

    q = q_ref[0]                 # (TQ, 2D) bf16; 1/sqrt(D) folded into Q weights
    k = k_ref[0]                 # (TK, 2D) bf16
    # scores = Re(q . conj(k)) = qr.kr + qi.ki -> one packed-feature contraction.
    # TODO(synk): verify with pl.lower_as_mlir that this dot_general does not
    # emit an XLU transpose of K; if it does, emit K pre-transposed from ln_qkv.
    dn = (((1,), (1,)), ((), ()))
    s = jax.lax.dot_general(q, k, dn, preferred_element_type=jnp.float32)  # (TQ,TK)
    if seq_pad != seq_len:
        col = ki * tk + jax.lax.broadcasted_iota(jnp.int32, s.shape, 1)
        s = jnp.where(col < seq_len, s, -1e30)        # mask padded keys
    m_new = jnp.maximum(m_sc[...], jnp.max(s, axis=-1, keepdims=True))
    alpha = jnp.exp(m_sc[...] - m_new)
    p = jnp.exp(s - m_new)
    l_sc[...] = alpha * l_sc[...] + jnp.sum(p, axis=-1, keepdims=True)
    # p @ [vr | vi] = [p@vr | p@vi] : one matmul aggregates the complex values.
    acc_sc[...] = alpha * acc_sc[...] + jnp.dot(
        p.astype(MATMUL_DTYPE), v_ref[0], preferred_element_type=jnp.float32)
    m_sc[...] = m_new

    @pl.when(ki == pl.num_programs(2) - 1)
    def _():
        attn = acc_sc[...] * pl.reciprocal(l_sc[...], approx=True)
        out = (jnp.dot(attn.astype(MATMUL_DTYPE), wp_ref[...],
                       preferred_element_type=jnp.float32) + bp_ref[...])
        o_ref[0] = x_ref[0] + out


def attention_block(x, q, k, v, wproj, bproj, *, seq_len):
    B, s_pad, d2 = x.shape
    tk = 128
    tq = 256 if (_big_vmem() and s_pad % 256 == 0) else 128
    tq = min(tq, s_pad)
    kern = functools.partial(_flash_attn_kernel, seq_len=seq_len,
                             seq_pad=s_pad, tk=tk)
    return pl.pallas_call(
        kern,
        grid=(B, s_pad // tq, s_pad // tk),
        in_specs=[pl.BlockSpec((1, tq, d2), lambda b, qi, ki: (b, qi, 0)),
                  pl.BlockSpec((1, tq, d2), lambda b, qi, ki: (b, qi, 0)),
                  pl.BlockSpec((1, tk, d2), lambda b, qi, ki: (b, ki, 0)),
                  pl.BlockSpec((1, tk, d2), lambda b, qi, ki: (b, ki, 0)),
                  _const_spec((d2, d2)),
                  _const_spec((1, d2))],
        out_specs=pl.BlockSpec((1, tq, d2), lambda b, qi, ki: (b, qi, 0)),
        out_shape=jax.ShapeDtypeStruct((B, s_pad, d2), jnp.float32),
        scratch_shapes=[pltpu.VMEM((tq, 1), jnp.float32),
                        pltpu.VMEM((tq, 1), jnp.float32),
                        pltpu.VMEM((tq, d2), jnp.float32)],
        input_output_aliases={0: 0},
        compiler_params=pltpu.CompilerParams(
            dimension_semantics=("parallel", "parallel", "arbitrary"),
            vmem_limit_bytes=_vmem_limit_bytes()),
    )(x, q, k, v, wproj, bproj)


def _mlp_block_kernel(x_ref, lnw_ref, lnb_ref, w1_ref, b1_ref, w2_ref, b2_ref,
                      o_ref):
    # Fused: LN2 -> FC1 -> GELU -> FC2 -> +residual (row-wise, M-tiled)
    x = x_ref[...]                                                # (TM, 2D) f32
    xn = _complex_ln(x, lnw_ref[...], lnb_ref[...])
    h = (jnp.dot(xn.astype(MATMUL_DTYPE), w1_ref[...],
                 preferred_element_type=jnp.float32) + b1_ref[...])   # (TM, 8D)
    h = _gelu(h).astype(MATMUL_DTYPE)   # bf16 hidden halves VMEM/vreg pressure
    y = (jnp.dot(h, w2_ref[...], preferred_element_type=jnp.float32)
         + b2_ref[...])                                               # (TM, 2D)
    o_ref[...] = x + y


def mlp_block(x2d, lnw, lnb, w1, b1, w2, b2):
    M, d2 = x2d.shape            # M = B * S_pad  (multiple of 128)
    d8 = w1.shape[1]
    tm = _seq_tile(M, 1024 if _big_vmem() else 512)
    return pl.pallas_call(
        _mlp_block_kernel,
        grid=(M // tm,),
        in_specs=[pl.BlockSpec((tm, d2), lambda i: (i, 0)),
                  _const_spec((1, d2)), _const_spec((1, d2)),
                  _const_spec((d2, d8)), _const_spec((1, d8)),
                  _const_spec((d8, d2)), _const_spec((1, d2))],
        out_specs=pl.BlockSpec((tm, d2), lambda i: (i, 0)),
        out_shape=jax.ShapeDtypeStruct((M, d2), jnp.float32),
        input_output_aliases={0: 0},
        compiler_params=pltpu.CompilerParams(
            dimension_semantics=("parallel",),
            vmem_limit_bytes=_vmem_limit_bytes()),
    )(x2d, lnw, lnb, w1, b1, w2, b2)


def _head_kernel(x_ref, lnw_ref, lnb_ref, w_ref, b_ref, o_ref):
    xn = _complex_ln(x_ref[...], lnw_ref[...], lnb_ref[...])
    o_ref[...] = (jnp.dot(xn.astype(MATMUL_DTYPE), w_ref[...],
                          preferred_element_type=jnp.float32) + b_ref[...])


def norm_head(x_cls, lnw, lnb, w, b):
    # Final LayerNorm is per-token, so norming only the cls rows is identical
    # to norming the full sequence and slicing token 0.
    B, _ = x_cls.shape
    n2 = w.shape[1]
    return pl.pallas_call(
        _head_kernel,
        out_shape=jax.ShapeDtypeStruct((B, n2), jnp.float32),
        compiler_params=pltpu.CompilerParams(vmem_limit_bytes=_vmem_limit_bytes()),
    )(x_cls, lnw, lnb, w, b)


# ----------------------------- parameters --------------------------------- #

def init_params(key, cfg):
    """Raw parameters, mirroring the PyTorch module's layers."""
    D = cfg['outer_dim']
    p = cfg['outer_patch']
    nc = cfg['num_classes']
    Hp = cfg['img_size'] // p
    S = Hp * Hp + 1
    keys = iter(jax.random.split(key, 8 + cfg['depth'] * 24))

    def nrm(shape, scale=0.02):
        return scale * jax.random.normal(next(keys), shape, dtype=jnp.float32)

    params = dict(
        conv_w=nrm((3 * p * p, 2 * D)),
        conv_b=nrm((2 * D,)),
        pe_ln_w=jnp.ones((2 * D,), jnp.float32),
        pe_ln_b=jnp.zeros((2 * D,), jnp.float32),
        cls=nrm((1, 1, D, 2), 1.0),
        pos=nrm((1, S, D, 2), 0.02),
        norm_w=jnp.ones((2 * D,), jnp.float32),
        norm_b=jnp.zeros((2 * D,), jnp.float32),
        head_wr=nrm((D, nc)),
        head_wi=nrm((D, nc)),
        head_br=nrm((nc,)),
        head_bi=nrm((nc,)),
    )
    blocks = []
    for _ in range(cfg['depth']):
        blk = dict(
            ln1_w=jnp.ones((2 * D,), jnp.float32),
            ln1_b=jnp.zeros((2 * D,), jnp.float32),
            ln2_w=jnp.ones((2 * D,), jnp.float32),
            ln2_b=jnp.zeros((2 * D,), jnp.float32),
        )
        for name, din, dout in [('q', D, D), ('k', D, D), ('v', D, D),
                                ('proj', D, D), ('fc1', D, 4 * D), ('fc2', 4 * D, D)]:
            blk[f'{name}_wr'] = nrm((din, dout))
            blk[f'{name}_wi'] = nrm((din, dout))
            blk[f'{name}_br'] = nrm((dout,))
            blk[f'{name}_bi'] = nrm((dout,))
        blocks.append(blk)
    params['blocks'] = blocks
    return params


def _pack_w(wr, wi):
    # Packed complex weight: [xr | xi] @ [[wr, wi], [-wi, wr]] = [yr | yi]
    return jnp.concatenate(
        [jnp.concatenate([wr, wi], axis=1),
         jnp.concatenate([-wi, wr], axis=1)], axis=0)


def _pack_b(br, bi):
    return jnp.concatenate([br, bi], axis=0)


def _perm_ln(v):
    # interleaved [w_r0, w_i0, w_r1, ...] -> packed [w_r0.. | w_i0..]
    return jnp.concatenate([v[0::2], v[1::2]], axis=0)


def pack_params(params, cfg):
    """Pre-pack weights into the lane-dense packed-complex layout (done once).
    For lane-dense deployments, choose outer_dim as a multiple of 64 so that
    2D / 6D / 8D are 128-multiples."""
    D = cfg['outer_dim']
    scale = 1.0 / math.sqrt(D)
    pk = dict(
        conv_w=params['conv_w'].astype(MATMUL_DTYPE),
        conv_b=params['conv_b'],
        pe_ln_w=params['pe_ln_w'],
        pe_ln_b=params['pe_ln_b'],
        cls=jnp.concatenate([params['cls'][..., 0], params['cls'][..., 1]], axis=-1),
        pos=jnp.concatenate([params['pos'][..., 0], params['pos'][..., 1]], axis=-1),
        norm_w=_perm_ln(params['norm_w']).reshape(1, 2 * D),
        norm_b=_perm_ln(params['norm_b']).reshape(1, 2 * D),
        head_w=_pack_w(params['head_wr'], params['head_wi']).astype(MATMUL_DTYPE),
        head_b=_pack_b(params['head_br'], params['head_bi']).reshape(1, -1),
    )
    blocks = []
    for blk in params['blocks']:
        # Fold the 1/sqrt(D) attention scale into the Q projection.
        wq = _pack_w(blk['q_wr'], blk['q_wi']) * scale
        bq = _pack_b(blk['q_br'], blk['q_bi']) * scale
        wk = _pack_w(blk['k_wr'], blk['k_wi'])
        bk = _pack_b(blk['k_br'], blk['k_bi'])
        wv = _pack_w(blk['v_wr'], blk['v_wi'])
        bv = _pack_b(blk['v_br'], blk['v_bi'])
        blocks.append(dict(
            ln1_w=_perm_ln(blk['ln1_w']).reshape(1, 2 * D),
            ln1_b=_perm_ln(blk['ln1_b']).reshape(1, 2 * D),
            ln2_w=_perm_ln(blk['ln2_w']).reshape(1, 2 * D),
            ln2_b=_perm_ln(blk['ln2_b']).reshape(1, 2 * D),
            wqkv=jnp.concatenate([wq, wk, wv], axis=1).astype(MATMUL_DTYPE),  # (2D, 6D)
            bqkv=jnp.concatenate([bq, bk, bv], axis=0).reshape(1, 6 * D),
            wproj=_pack_w(blk['proj_wr'], blk['proj_wi']).astype(MATMUL_DTYPE),
            bproj=_pack_b(blk['proj_br'], blk['proj_bi']).reshape(1, 2 * D),
            w1=_pack_w(blk['fc1_wr'], blk['fc1_wi']).astype(MATMUL_DTYPE),    # (2D, 8D)
            b1=_pack_b(blk['fc1_br'], blk['fc1_bi']).reshape(1, 8 * D),
            w2=_pack_w(blk['fc2_wr'], blk['fc2_wi']).astype(MATMUL_DTYPE),    # (8D, 2D)
            b2=_pack_b(blk['fc2_br'], blk['fc2_bi']).reshape(1, 2 * D),
        ))
    pk['blocks'] = blocks
    return pk


# ----------------------------- forward ------------------------------------ #

def forward(pk, x, cfg):
    B = x.shape[0]
    D = cfg['outer_dim']
    p = cfg['outer_patch']
    Hp = cfg['img_size'] // p
    # The PyTorch nn.LayerNorm(2D) on the NCHW conv output is only shape-valid
    # when the last spatial dim equals 2*outer_dim.
    assert Hp == 2 * D, "img_size // outer_patch must equal 2 * outer_dim"
    d2 = 2 * D

    # ---- outer_patch_embed: Conv2d(kernel=stride=patch) as a matmul ---- #
    patches = (x.reshape(B, 3, Hp, p, Hp, p)
                 .transpose(0, 2, 4, 1, 3, 5)
                 .reshape(B * Hp * Hp, 3 * p * p)
                 .astype(MATMUL_DTYPE))               # bf16 DMA: half the bytes
    conv = patch_embed_matmul(patches, pk['conv_w'], pk['conv_b'])   # (B*Hp*Hp, 2D)
    conv = conv.reshape(B, Hp, Hp, d2).transpose(0, 3, 1, 2)         # NCHW
    # LayerNorm over the last (W') axis + GELU, exactly as the Sequential does.
    rows = ln_gelu(conv.reshape(B * d2 * Hp, Hp), pk['pe_ln_w'], pk['pe_ln_b'])

    # reshape(B, -1, D, 2) then de-interleave into the packed [real | imag]
    # layout (one-time layout glue in plain JAX).
    tok = rows.reshape(B, Hp * Hp, d2)
    x_packed = jnp.concatenate([tok[..., 0::2], tok[..., 1::2]], axis=-1)

    # cls token + positional embedding (already packed at init)
    cls = jnp.broadcast_to(pk['cls'], (B, 1, d2))
    x_packed = jnp.concatenate([cls, x_packed], axis=1) + pk['pos']
    S = x_packed.shape[1]

    # Pad the sequence to a multiple of 128 so attention-score tiles are
    # lane-dense and flash tiling is uniform; padded keys are masked in-kernel
    # and padded rows never influence real tokens.
    s_pad = _round_up(S, 128)
    if s_pad != S:
        x_packed = jnp.pad(x_packed, ((0, 0), (0, s_pad - S), (0, 0)))

    for blk in pk['blocks']:
        # LN1 + packed QKV (row-wise, bf16 outputs)
        q, k, v = ln_qkv(x_packed.reshape(B * s_pad, d2),
                         blk['ln1_w'], blk['ln1_b'], blk['wqkv'], blk['bqkv'])
        # flash-style attention + output proj + residual
        x_packed = attention_block(
            x_packed,
            q.reshape(B, s_pad, d2), k.reshape(B, s_pad, d2),
            v.reshape(B, s_pad, d2),
            blk['wproj'], blk['bproj'], seq_len=S)
        # MLP sub-block: one fused kernel (LN2+FC1+GELU+FC2+residual), M-tiled
        x2 = mlp_block(x_packed.reshape(B * s_pad, d2), blk['ln2_w'], blk['ln2_b'],
                       blk['w1'], blk['b1'], blk['w2'], blk['b2'])
        x_packed = x2.reshape(B, s_pad, d2)

    # final norm + classification head on the cls token
    head = norm_head(x_packed[:, 0], pk['norm_w'], pk['norm_b'],
                     pk['head_w'], pk['head_b'])                    # (B, 2*C) packed
    C = cfg['num_classes']
    return jnp.stack([head[:, :C], head[:, C:]], axis=-1)           # (B, C, 2)


# ----------------------------- main ---------------------------------------- #

if __name__ == "__main__":
    cfg = dict(img_size=16, outer_patch=2, outer_dim=4, depth=2, num_classes=10)

    # Prime generation / feature probes eagerly (outside the jit trace).
    _ = _vmem_limit_bytes()
    _ = _big_vmem()
    _ = _buffered_supported()

    key = jax.random.PRNGKey(0)
    pkey, xkey = jax.random.split(key)
    raw_params = init_params(pkey, cfg)
    packed_params = pack_params(raw_params, cfg)     # pack once, outside the jit
    x = jax.random.normal(xkey, (2, 3, cfg['img_size'], cfg['img_size']),
                          dtype=jnp.float32)

    fwd = jax.jit(functools.partial(forward, cfg=cfg))
    out = fwd(packed_params, x)
    jax.block_until_ready(out)
    assert out.shape == (2, cfg['num_classes'], 2)
    assert bool(jnp.all(jnp.isfinite(out)))
    print("KERNEL_OK")
</pallas_src>

<mosaic_0001>
module attributes {stable_mosaic.version = 11 : i64} {
  func.func @k(%arg0: i32, %arg1: memref<8x128xf32, #tpu.memory_space<vmem>>, %arg2: memref<8x128xf32, #tpu.memory_space<vmem>>) attributes {dimension_semantics = [#tpu.dimension_semantics<arbitrary>], iteration_bounds = array<i64: 1>, scalar_prefetch = 0 : i64, scratch_operands = 0 : i64, tpu.core_type = #tpu.core_type<tc>, window_params = [{pipeline_mode = #tpu.pipeline_mode<synchronous>, transform_indices = @transform_0, window_bounds = array<i64: 8, 128>}, {pipeline_mode = #tpu.pipeline_mode<synchronous>, transform_indices = @transform_1, window_bounds = array<i64: 8, 128>}]} {
    %c0 = arith.constant 0 : index
    %c0_0 = arith.constant 0 : index
    %0 = vector.load %arg1[%c0, %c0_0] : memref<8x128xf32, #tpu.memory_space<vmem>>, vector<8x128xf32>
    %c0_1 = arith.constant 0 : index
    %c0_2 = arith.constant 0 : index
    %1 = vector.load %arg2[%c0_1, %c0_2] : memref<8x128xf32, #tpu.memory_space<vmem>>, vector<8x128xf32>
    tpu.vector_store %arg2[%c0_1, %c0_2], %0 {strides = array<i32>} : memref<8x128xf32, #tpu.memory_space<vmem>>, vector<8x128xf32>,
    return
  }
  func.func @transform_0(%arg0: i32) -> (i32, i32) {
    %c0_i32 = arith.constant 0 : i32
    %c0_i32_0 = arith.constant 0 : i32
    %c0_i32_1 = arith.constant 0 : i32
    return %c0_i32, %c0_i32_0 : i32, i32
  }
  func.func @transform_1(%arg0: i32) -> (i32, i32) {
    %c0_i32 = arith.constant 0 : i32
    %c0_i32_0 = arith.constant 0 : i32
    %c0_i32_1 = arith.constant 0 : i32
    return %c0_i32, %c0_i32_0 : i32, i32
  }
}

module attributes {stable_mosaic.version = 11 : i64} {
  func.func @_patch_embed_kernel(%arg0: i32, %arg1: memref<128x12xbf16, #tpu.memory_space<vmem>>, %arg2: memref<12x8xbf16, #tpu.memory_space<vmem>>, %arg3: memref<1x8xf32, #tpu.memory_space<vmem>>, %arg4: memref<128x8xf32, #tpu.memory_space<vmem>>) attributes {dimension_semantics = [#tpu.dimension_semantics<parallel>], iteration_bounds = array<i64: 1>, scalar_prefetch = 0 : i64, scratch_operands = 0 : i64, tpu.core_type = #tpu.core_type<tc>, window_params = [{transform_indices = @transform_0, window_bounds = array<i64: 128, 12>}, {pipeline_mode = #tpu.pipeline_mode<synchronous>, transform_indices = @transform_1, window_bounds = array<i64: 12, 8>}, {pipeline_mode = #tpu.pipeline_mode<synchronous>, transform_indices = @transform_2, window_bounds = array<i64: 1, 8>}, {transform_indices = @transform_3, window_bounds = array<i64: 128, 8>}]} {
    %c0 = arith.constant 0 : index
    %c0_0 = arith.constant 0 : index
    %0 = vector.load %arg1[%c0, %c0_0] : memref<128x12xbf16, #tpu.memory_space<vmem>>, vector<128x12xbf16>
    %c0_1 = arith.constant 0 : index
    %c0_2 = arith.constant 0 : index
    %1 = vector.load %arg2[%c0_1, %c0_2] : memref<12x8xbf16, #tpu.memory_space<vmem>>, vector<12x8xbf16>
    %cst = arith.constant dense<0.000000e+00> : vector<128x8xf32>
    %2 = tpu.matmul %0, %1, %cst {dimension_numbers = #tpu.dot_dimension_numbers<[1], [0], [0], [1], [0, 0, 1, 1], [], []>} : vector<128x12xbf16>, vector<12x8xbf16>, vector<128x8xf32> -> vector<128x8xf32>
    %c0_3 = arith.constant 0 : index
    %c0_4 = arith.constant 0 : index
    %3 = vector.load %arg3[%c0_3, %c0_4] : memref<1x8xf32, #tpu.memory_space<vmem>>, vector<1x8xf32>
    %4 = vector.broadcast %3 : vector<1x8xf32> to vector<128x8xf32>
    %5 = arith.addf %2, %4 : vector<128x8xf32>
    %c0_5 = arith.constant 0 : index
    %c0_6 = arith.constant 0 : index
    %6 = vector.load %arg4[%c0_5, %c0_6] : memref<128x8xf32, #tpu.memory_space<vmem>>, vector<128x8xf32>
    tpu.vector_store %arg4[%c0_5, %c0_6], %5 {strides = array<i32>} : memref<128x8xf32, #tpu.memory_space<vmem>>, vector<128x8xf32>,
    return
  }
  func.func @transform_0(%arg0: i32) -> (i32, i32) {
    %c0_i32 = arith.constant 0 : i32
    %c0_i32_0 = arith.constant 0 : i32
    return %arg0, %c0_i32 : i32, i32
  }
  func.func @transform_1(%arg0: i32) -> (i32, i32) {
    %c0_i32 = arith.constant 0 : i32
    %c0_i32_0 = arith.constant 0 : i32
    %c0_i32_1 = arith.constant 0 : i32
    return %c0_i32, %c0_i32_0 : i32, i32
  }
  func.func @transform_2(%arg0: i32) -> (i32, i32) {
    %c0_i32 = arith.constant 0 : i32
    %c0_i32_0 = arith.constant 0 : i32
    %c0_i32_1 = arith.constant 0 : i32
    return %c0_i32, %c0_i32_0 : i32, i32
  }
  func.func @transform_3(%arg0: i32) -> (i32, i32) {
    %c0_i32 = arith.constant 0 : i32
    %c0_i32_0 = arith.constant 0 : i32
    return %arg0, %c0_i32 : i32, i32
  }
}

module attributes {stable_mosaic.version = 11 : i64} {
  func.func @_ln_gelu_kernel(%arg0: i32, %arg1: memref<128x8xf32, #tpu.memory_space<vmem>>, %arg2: memref<1x8xf32, #tpu.memory_space<vmem>>, %arg3: memref<1x8xf32, #tpu.memory_space<vmem>>, %arg4: memref<128x8xf32, #tpu.memory_space<vmem>>) attributes {dimension_semantics = [#tpu.dimension_semantics<parallel>], iteration_bounds = array<i64: 1>, scalar_prefetch = 0 : i64, scratch_operands = 0 : i64, tpu.core_type = #tpu.core_type<tc>, window_params = [{transform_indices = @transform_0, window_bounds = array<i64: 128, 8>}, {pipeline_mode = #tpu.pipeline_mode<synchronous>, transform_indices = @transform_1, window_bounds = array<i64: 1, 8>}, {pipeline_mode = #tpu.pipeline_mode<synchronous>, transform_indices = @transform_2, window_bounds = array<i64: 1, 8>}, {transform_indices = @transform_3, window_bounds = array<i64: 128, 8>}]} {
    %c0 = arith.constant 0 : index
    %c0_0 = arith.constant 0 : index
    %0 = vector.load %arg1[%c0, %c0_0] : memref<128x8xf32, #tpu.memory_space<vmem>>, vector<128x8xf32>
    %cst = arith.constant dense<0.000000e+00> : vector<128xf32>
    %1 = vector.multi_reduction <add>, %0, %cst [1] : vector<128x8xf32> to vector<128xf32>
    %2 = vector.shape_cast %1 : vector<128xf32> to vector<128x1xf32>
    %cst_1 = arith.constant 8.000000e+00 : f32
    %3 = vector.broadcast %cst_1 : f32 to vector<128x1xf32>
    %4 = arith.divf %2, %3 : vector<128x1xf32>
    %5 = vector.broadcast %4 : vector<128x1xf32> to vector<128x8xf32>
    %6 = arith.subf %0, %5 : vector<128x8xf32>
    %7 = arith.mulf %6, %6 : vector<128x8xf32>
    %cst_2 = arith.constant dense<0.000000e+00> : vector<128xf32>
    %8 = vector.multi_reduction <add>, %7, %cst_2 [1] : vector<128x8xf32> to vector<128xf32>
    %9 = vector.shape_cast %8 : vector<128xf32> to vector<128x1xf32>
    %cst_3 = arith.constant 8.000000e+00 : f32
    %10 = vector.broadcast %cst_3 : f32 to vector<128x1xf32>
    %11 = arith.divf %9, %10 : vector<128x1xf32>
    %12 = vector.broadcast %4 : vector<128x1xf32> to vector<128x8xf32>
    %13 = arith.subf %0, %12 : vector<128x8xf32>
    %cst_4 = arith.constant 9.99999974E-6 : f32
    %14 = vector.broadcast %cst_4 : f32 to vector<128x1xf32>
    %15 = arith.addf %11, %14 : vector<128x1xf32>
    %16 = math.rsqrt %15 : vector<128x1xf32>
    %17 = vector.broadcast %16 : vector<128x1xf32> to vector<128x8xf32>
    %18 = arith.mulf %13, %17 : vector<128x8xf32>
    %c0_5 = arith.constant 0 : index
    %c0_6 = arith.constant 0 : index
    %19 = vector.load %arg2[%c0_5, %c0_6] : memref<1x8xf32, #tpu.memory_space<vmem>>, vector<1x8xf32>
    %20 = vector.broadcast %19 : vector<1x8xf32> to vector<128x8xf32>
    %21 = arith.mulf %18, %20 : vector<128x8xf32>
    %c0_7 = arith.constant 0 : index
    %c0_8 = arith.constant 0 : index
    %22 = vector.load %arg3[%c0_7, %c0_8] : memref<1x8xf32, #tpu.memory_space<vmem>>, vector<1x8xf32>
    %23 = vector.broadcast %22 : vector<1x8xf32> to vector<128x8xf32>
    %24 = arith.addf %21, %23 : vector<128x8xf32>
    %cst_9 = arith.constant 5.000000e-01 : f32
    %25 = vector.broadcast %cst_9 : f32 to vector<128x8xf32>
    %26 = arith.mulf %25, %24 : vector<128x8xf32>
    %cst_10 = arith.constant 0.707106769 : f32
    %27 = vector.broadcast %cst_10 : f32 to vector<128x8xf32>
    %28 = arith.mulf %24, %27 : vector<128x8xf32>
    %29 = math.erf %28 : vector<128x8xf32>
    %cst_11 = arith.constant 1.000000e+00 : f32
    %30 = vector.broadcast %cst_11 : f32 to vector<128x8xf32>
    %31 = arith.addf %30, %29 : vector<128x8xf32>
    %32 = arith.mulf %26, %31 : vector<128x8xf32>
    %c0_12 = arith.constant 0 : index
    %c0_13 = arith.constant 0 : index
    %33 = vector.load %arg4[%c0_12, %c0_13] : memref<128x8xf32, #tpu.memory_space<vmem>>, vector<128x8xf32>
    tpu.vector_store %arg4[%c0_12, %c0_13], %32 {strides = array<i32>} : memref<128x8xf32, #tpu.memory_space<vmem>>, vector<128x8xf32>,
    return
  }
  func.func @transform_0(%arg0: i32) -> (i32, i32) {
    %c0_i32 = arith.constant 0 : i32
    %c0_i32_0 = arith.constant 0 : i32
    return %arg0, %c0_i32 : i32, i32
  }
  func.func @transform_1(%arg0: i32) -> (i32, i32) {
    %c0_i32 = arith.constant 0 : i32
    %c0_i32_0 = arith.constant 0 : i32
    %c0_i32_1 = arith.constant 0 : i32
    return %c0_i32, %c0_i32_0 : i32, i32
  }
  func.func @transform_2(%arg0: i32) -> (i32, i32) {
    %c0_i32 = arith.constant 0 : i32
    %c0_i32_0 = arith.constant 0 : i32
    %c0_i32_1 = arith.constant 0 : i32
    return %c0_i32, %c0_i32_0 : i32, i32
  }
  func.func @transform_3(%arg0: i32) -> (i32, i32) {
    %c0_i32 = arith.constant 0 : i32
    %c0_i32_0 = arith.constant 0 : i32
    return %arg0, %c0_i32 : i32, i32
  }
}

module attributes {stable_mosaic.version = 11 : i64} {
  func.func @_flash_attn_kernel(%arg0: i32, %arg1: i32, %arg2: i32, %arg3: memref<1x128x8xf32, #tpu.memory_space<vmem>>, %arg4: memref<1x128x8xbf16, #tpu.memory_space<vmem>>, %arg5: memref<1x128x8xbf16, #tpu.memory_space<vmem>>, %arg6: memref<1x128x8xbf16, #tpu.memory_space<vmem>>, %arg7: memref<8x8xbf16, #tpu.memory_space<vmem>>, %arg8: memref<1x8xf32, #tpu.memory_space<vmem>>, %arg9: memref<1x128x8xf32, #tpu.memory_space<vmem>>, %arg10: memref<128x1xf32, #tpu.memory_space<vmem>>, %arg11: memref<128x1xf32, #tpu.memory_space<vmem>>, %arg12: memref<128x8xf32, #tpu.memory_space<vmem>>) attributes {dimension_semantics = [#tpu.dimension_semantics<parallel>, #tpu.dimension_semantics<parallel>, #tpu.dimension_semantics<arbitrary>], iteration_bounds = array<i64: 2, 1, 1>, scalar_prefetch = 0 : i64, scratch_operands = 3 : i64, tpu.core_type = #tpu.core_type<tc>, window_params = [{transform_indices = @transform_0, window_bounds = array<i64: 1, 128, 8>}, {transform_indices = @transform_1, window_bounds = array<i64: 1, 128, 8>}, {transform_indices = @transform_2, window_bounds = array<i64: 1, 128, 8>}, {transform_indices = @transform_3, window_bounds = array<i64: 1, 128, 8>}, {pipeline_mode = #tpu.pipeline_mode<synchronous>, transform_indices = @transform_4, window_bounds = array<i64: 8, 8>}, {pipeline_mode = #tpu.pipeline_mode<synchronous>, transform_indices = @transform_5, window_bounds = array<i64: 1, 8>}, {transform_indices = @transform_6, window_bounds = array<i64: 1, 128, 8>}]} {
    %c0_i32 = arith.constant 0 : i32
    %0 = arith.cmpi eq, %arg2, %c0_i32 : i32
    %1 = arith.extui %0 : i1 to i32
    %c0_i32_0 = arith.constant 0 : i32
    %2 = arith.cmpi ne, %1, %c0_i32_0 : i32
    scf.if %2 {
      %cst_29 = arith.constant -1.000000e+30 : f32
      %45 = vector.broadcast %cst_29 : f32 to vector<128x1xf32>
      %c0_30 = arith.constant 0 : index
      %c0_31 = arith.constant 0 : index
      %46 = vector.load %arg10[%c0_30, %c0_31] : memref<128x1xf32, #tpu.memory_space<vmem>>, vector<128x1xf32>
      tpu.vector_store %arg10[%c0_30, %c0_31], %45 {strides = array<i32>} : memref<128x1xf32, #tpu.memory_space<vmem>>, vector<128x1xf32>,
      %cst_32 = arith.constant 0.000000e+00 : f32
      %47 = vector.broadcast %cst_32 : f32 to vector<128x1xf32>
      %c0_33 = arith.constant 0 : index
      %c0_34 = arith.constant 0 : index
      %48 = vector.load %arg11[%c0_33, %c0_34] : memref<128x1xf32, #tpu.memory_space<vmem>>, vector<128x1xf32>
      tpu.vector_store %arg11[%c0_33, %c0_34], %47 {strides = array<i32>} : memref<128x1xf32, #tpu.memory_space<vmem>>, vector<128x1xf32>,
      %cst_35 = arith.constant 0.000000e+00 : f32
      %49 = vector.broadcast %cst_35 : f32 to vector<128x8xf32>
      %c0_36 = arith.constant 0 : index
      %c0_37 = arith.constant 0 : index
      %50 = vector.load %arg12[%c0_36, %c0_37] : memref<128x8xf32, #tpu.memory_space<vmem>>, vector<128x8xf32>
      tpu.vector_store %arg12[%c0_36, %c0_37], %49 {strides = array<i32>} : memref<128x8xf32, #tpu.memory_space<vmem>>, vector<128x8xf32>,
    } else {
    }
    %c0 = arith.constant 0 : index
    %c0_1 = arith.constant 0 : index
    %c0_2 = arith.constant 0 : index
    %3 = vector.load %arg4[%c0, %c0_1, %c0_2] : memref<1x128x8xbf16, #tpu.memory_space<vmem>>, vector<1x128x8xbf16>
    %4 = vector.shape_cast %3 : vector<1x128x8xbf16> to vector<128x8xbf16>
    %c0_3 = arith.constant 0 : index
    %c0_4 = arith.constant 0 : index
    %c0_5 = arith.constant 0 : index
    %5 = vector.load %arg5[%c0_3, %c0_4, %c0_5] : memref<1x128x8xbf16, #tpu.memory_space<vmem>>, vector<1x128x8xbf16>
    %6 = vector.shape_cast %5 : vector<1x128x8xbf16> to vector<128x8xbf16>
    %cst = arith.constant dense<0.000000e+00> : vector<128x128xf32>
    %7 = tpu.matmul %4, %6, %cst {dimension_numbers = #tpu.dot_dimension_numbers<[1], [1], [0], [0], [0, 0, 1, 0], [], []>} : vector<128x8xbf16>, vector<128x8xbf16>, vector<128x128xf32> -> vector<128x128xf32>
    %c128_i32 = arith.constant 128 : i32
    %8 = arith.muli %arg2, %c128_i32 : i32
    %9 = tpu.iota {dimensions = array<i32: 1>} : vector<128x128xi32>
    %10 = vector.broadcast %8 : i32 to vector<128x128xi32>
    %11 = arith.addi %10, %9 : vector<128x128xi32>
    %c65_i32 = arith.constant 65 : i32
    %12 = vector.broadcast %c65_i32 : i32 to vector<128x128xi32>
    %13 = arith.cmpi slt, %11, %12 : vector<128x128xi32>
    %cst_6 = arith.constant -1.000000e+30 : f32
    %14 = vector.broadcast %cst_6 : f32 to vector<128x128xf32>
    %15 = arith.select %13, %7, %14 : vector<128x128xi1>, vector<128x128xf32>
    %c0_7 = arith.constant 0 : index
    %c0_8 = arith.constant 0 : index
    %16 = vector.load %arg10[%c0_7, %c0_8] : memref<128x1xf32, #tpu.memory_space<vmem>>, vector<128x1xf32>
    %cst_9 = arith.constant dense<0xFF800000> : vector<128xf32>
    %17 = vector.multi_reduction <maximumf>, %15, %cst_9 [1] : vector<128x128xf32> to vector<128xf32>
    %18 = vector.shape_cast %17 : vector<128xf32> to vector<128x1xf32>
    %19 = arith.maximumf %16, %18 : vector<128x1xf32>
    %c0_10 = arith.constant 0 : index
    %c0_11 = arith.constant 0 : index
    %20 = vector.load %arg10[%c0_10, %c0_11] : memref<128x1xf32, #tpu.memory_space<vmem>>, vector<128x1xf32>
    %21 = arith.subf %20, %19 : vector<128x1xf32>
    %22 = math.exp %21 : vector<128x1xf32>
    %23 = vector.broadcast %19 : vector<128x1xf32> to vector<128x128xf32>
    %24 = arith.subf %15, %23 : vector<128x128xf32>
    %25 = math.exp %24 : vector<128x128xf32>
    %c0_12 = arith.constant 0 : index
    %c0_13 = arith.constant 0 : index
    %26 = vector.load %arg11[%c0_12, %c0_13] : memref<128x1xf32, #tpu.memory_space<vmem>>, vector<128x1xf32>
    %27 = arith.mulf %22, %26 : vector<128x1xf32>
    %cst_14 = arith.constant dense<0.000000e+00> : vector<128xf32>
    %28 = vector.multi_reduction <add>, %25, %cst_14 [1] : vector<128x128xf32> to vector<128xf32>
    %29 = vector.shape_cast %28 : vector<128xf32> to vector<128x1xf32>
    %30 = arith.addf %27, %29 : vector<128x1xf32>
    %c0_15 = arith.constant 0 : index
    %c0_16 = arith.constant 0 : index
    %31 = vector.load %arg11[%c0_15, %c0_16] : memref<128x1xf32, #tpu.memory_space<vmem>>, vector<128x1xf32>
    tpu.vector_store %arg11[%c0_15, %c0_16], %30 {strides = array<i32>} : memref<128x1xf32, #tpu.memory_space<vmem>>, vector<128x1xf32>,
    %c0_17 = arith.constant 0 : index
    %c0_18 = arith.constant 0 : index
    %32 = vector.load %arg12[%c0_17, %c0_18] : memref<128x8xf32, #tpu.memory_space<vmem>>, vector<128x8xf32>
    %33 = vector.broadcast %22 : vector<128x1xf32> to vector<128x8xf32>
    %34 = arith.mulf %33, %32 : vector<128x8xf32>
    %35 = arith.truncf %25 : vector<128x128xf32> to vector<128x128xbf16>
    %c0_19 = arith.constant 0 : index
    %c0_20 = arith.constant 0 : index
    %c0_21 = arith.constant 0 : index
    %36 = vector.load %arg6[%c0_19, %c0_20, %c0_21] : memref<1x128x8xbf16, #tpu.memory_space<vmem>>, vector<1x128x8xbf16>
    %37 = vector.shape_cast %36 : vector<1x128x8xbf16> to vector<128x8xbf16>
    %cst_22 = arith.constant dense<0.000000e+00> : vector<128x8xf32>
    %38 = tpu.matmul %35, %37, %cst_22 {dimension_numbers = #tpu.dot_dimension_numbers<[1], [0], [0], [1], [0, 0, 1, 1], [], []>} : vector<128x128xbf16>, vector<128x8xbf16>, vector<128x8xf32> -> vector<128x8xf32>
    %39 = arith.addf %34, %38 : vector<128x8xf32>
    %c0_23 = arith.constant 0 : index
    %c0_24 = arith.constant 0 : index
    %40 = vector.load %arg12[%c0_23, %c0_24] : memref<128x8xf32, #tpu.memory_space<vmem>>, vector<128x8xf32>
    tpu.vector_store %arg12[%c0_23, %c0_24], %39 {strides = array<i32>} : memref<128x8xf32, #tpu.memory_space<vmem>>, vector<128x8xf32>,
    %c0_25 = arith.constant 0 : index
    %c0_26 = arith.constant 0 : index
    %41 = vector.load %arg10[%c0_25, %c0_26] : memref<128x1xf32, #tpu.memory_space<vmem>>, vector<128x1xf32>
    tpu.vector_store %arg10[%c0_25, %c0_26], %19 {strides = array<i32>} : memref<128x1xf32, #tpu.memory_space<vmem>>, vector<128x1xf32>,
    %c0_i32_27 = arith.constant 0 : i32
    %42 = arith.cmpi eq, %arg2, %c0_i32_27 : i32
    %43 = arith.extui %42 : i1 to i32
    %c0_i32_28 = arith.constant 0 : i32
    %44 = arith.cmpi ne, %43, %c0_i32_28 : i32
    scf.if %44 {
      %c0_29 = arith.constant 0 : index
      %c0_30 = arith.constant 0 : index
      %45 = vector.load %arg12[%c0_29, %c0_30] : memref<128x8xf32, #tpu.memory_space<vmem>>, vector<128x8xf32>
      %c0_31 = arith.constant 0 : index
      %c0_32 = arith.constant 0 : index
      %46 = vector.load %arg11[%c0_31, %c0_32] : memref<128x1xf32, #tpu.memory_space<vmem>>, vector<128x1xf32>
      %47 = tpu.reciprocal %46 {approx = true} : vector<128x1xf32> -> vector<128x1xf32>
      %48 = vector.broadcast %47 : vector<128x1xf32> to vector<128x8xf32>
      %49 = arith.mulf %45, %48 : vector<128x8xf32>
      %50 = arith.truncf %49 : vector<128x8xf32> to vector<128x8xbf16>
      %c0_33 = arith.constant 0 : index
      %c0_34 = arith.constant 0 : index
      %51 = vector.load %arg7[%c0_33, %c0_34] : memref<8x8xbf16, #tpu.memory_space<vmem>>, vector<8x8xbf16>
      %cst_35 = arith.constant dense<0.000000e+00> : vector<128x8xf32>
      %52 = tpu.matmul %50, %51, %cst_35 {dimension_numbers = #tpu.dot_dimension_numbers<[1], [0], [0], [1], [0, 0, 1, 1], [], []>} : vector<128x8xbf16>, vector<8x8xbf16>, vector<128x8xf32> -> vector<128x8xf32>
      %c0_36 = arith.constant 0 : index
      %c0_37 = arith.constant 0 : index
      %53 = vector.load %arg8[%c0_36, %c0_37] : memref<1x8xf32, #tpu.memory_space<vmem>>, vector<1x8xf32>
      %54 = vector.broadcast %53 : vector<1x8xf32> to vector<128x8xf32>
      %55 = arith.addf %52, %54 : vector<128x8xf32>
      %c0_38 = arith.constant 0 : index
      %c0_39 = arith.constant 0 : index
      %c0_40 = arith.constant 0 : index
      %56 = vector.load %arg3[%c0_38, %c0_39, %c0_40] : memref<1x128x8xf32, #tpu.memory_space<vmem>>, vector<1x128x8xf32>
      %57 = vector.shape_cast %56 : vector<1x128x8xf32> to vector<128x8xf32>
      %58 = arith.addf %57, %55 : vector<128x8xf32>
      %c0_41 = arith.constant 0 : index
      %c0_42 = arith.constant 0 : index
      %c0_43 = arith.constant 0 : index
      %59 = vector.load %arg9[%c0_41, %c0_42, %c0_43] : memref<1x128x8xf32, #tpu.memory_space<vmem>>, vector<1x128x8xf32>
      %60 = vector.shape_cast %59 : vector<1x128x8xf32> to vector<128x8xf32>
      %61 = vector.shape_cast %58 : vector<128x8xf32> to vector<1x128x8xf32>
      tpu.vector_store %arg9[%c0_41, %c0_42, %c0_43], %61 {strides = array<i32>} : memref<1x128x8xf32, #tpu.memory_space<vmem>>, vector<1x128x8xf32>,
    } else {
    }
    return
  }
  func.func @transform_0(%arg0: i32, %arg1: i32, %arg2: i32) -> (i32, i32, i32) {
    %c0_i32 = arith.constant 0 : i32
    %c0_i32_0 = arith.constant 0 : i32
    return %arg0, %arg1, %c0_i32 : i32, i32, i32
  }
  func.func @transform_1(%arg0: i32, %arg1: i32, %arg2: i32) -> (i32, i32, i32) {
    %c0_i32 = arith.constant 0 : i32
    %c0_i32_0 = arith.constant 0 : i32
    return %arg0, %arg1, %c0_i32 : i32, i32, i32
  }
  func.func @transform_2(%arg0: i32, %arg1: i32, %arg2: i32) -> (i32, i32, i32) {
    %c0_i32 = arith.constant 0 : i32
    %c0_i32_0 = arith.constant 0 : i32
    return %arg0, %arg2, %c0_i32 : i32, i32, i32
  }
  func.func @transform_3(%arg0: i32, %arg1: i32, %arg2: i32) -> (i32, i32, i32) {
    %c0_i32 = arith.constant 0 : i32
    %c0_i32_0 = arith.constant 0 : i32
    return %arg0, %arg2, %c0_i32 : i32, i32, i32
  }
  func.func @transform_4(%arg0: i32, %arg1: i32, %arg2: i32) -> (i32, i32) {
    %c0_i32 = arith.constant 0 : i32
    %c0_i32_0 = arith.constant 0 : i32
    %c0_i32_1 = arith.constant 0 : i32
    return %c0_i32, %c0_i32_0 : i32, i32
  }
  func.func @transform_5(%arg0: i32, %arg1: i32, %arg2: i32) -> (i32, i32) {
    %c0_i32 = arith.constant 0 : i32
    %c0_i32_0 = arith.constant 0 : i32
    %c0_i32_1 = arith.constant 0 : i32
    return %c0_i32, %c0_i32_0 : i32, i32
  }
  func.func @transform_6(%arg0: i32, %arg1: i32, %arg2: i32) -> (i32, i32, i32) {
    %c0_i32 = arith.constant 0 : i32
    %c0_i32_0 = arith.constant 0 : i32
    return %arg0, %arg1, %c0_i32 : i32, i32, i32
  }
}

module attributes {stable_mosaic.version = 11 : i64} {
  func.func @_ln_qkv_kernel(%arg0: i32, %arg1: memref<256x8xf32, #tpu.memory_space<vmem>>, %arg2: memref<1x8xf32, #tpu.memory_space<vmem>>, %arg3: memref<1x8xf32, #tpu.memory_space<vmem>>, %arg4: memref<8x24xbf16, #tpu.memory_space<vmem>>, %arg5: memref<1x24xf32, #tpu.memory_space<vmem>>, %arg6: memref<256x8xbf16, #tpu.memory_space<vmem>>, %arg7: memref<256x8xbf16, #tpu.memory_space<vmem>>, %arg8: memref<256x8xbf16, #tpu.memory_space<vmem>>) attributes {dimension_semantics = [#tpu.dimension_semantics<parallel>], iteration_bounds = array<i64: 1>, scalar_prefetch = 0 : i64, scratch_operands = 0 : i64, tpu.core_type = #tpu.core_type<tc>, window_params = [{transform_indices = @transform_0, window_bounds = array<i64: 256, 8>}, {pipeline_mode = #tpu.pipeline_mode<synchronous>, transform_indices = @transform_1, window_bounds = array<i64: 1, 8>}, {pipeline_mode = #tpu.pipeline_mode<synchronous>, transform_indices = @transform_2, window_bounds = array<i64: 1, 8>}, {pipeline_mode = #tpu.pipeline_mode<synchronous>, transform_indices = @transform_3, window_bounds = array<i64: 8, 24>}, {pipeline_mode = #tpu.pipeline_mode<synchronous>, transform_indices = @transform_4, window_bounds = array<i64: 1, 24>}, {transform_indices = @transform_5, window_bounds = array<i64: 256, 8>}, {transform_indices = @transform_6, window_bounds = array<i64: 256, 8>}, {transform_indices = @transform_7, window_bounds = array<i64: 256, 8>}]} {
    %c0 = arith.constant 0 : index
    %c0_0 = arith.constant 0 : index
    %0 = vector.load %arg1[%c0, %c0_0] : memref<256x8xf32, #tpu.memory_space<vmem>>, vector<256x8xf32>
    %c0_1 = arith.constant 0 : index
    %c0_2 = arith.constant 0 : index
    %1 = vector.load %arg2[%c0_1, %c0_2] : memref<1x8xf32, #tpu.memory_space<vmem>>, vector<1x8xf32>
    %c0_3 = arith.constant 0 : index
    %c0_4 = arith.constant 0 : index
    %2 = vector.load %arg3[%c0_3, %c0_4] : memref<1x8xf32, #tpu.memory_space<vmem>>, vector<1x8xf32>
    %cst = arith.constant dense<0.000000e+00> : vector<256xf32>
    %3 = vector.multi_reduction <add>, %0, %cst [1] : vector<256x8xf32> to vector<256xf32>
    %4 = vector.shape_cast %3 : vector<256xf32> to vector<256x1xf32>
    %cst_5 = arith.constant 8.000000e+00 : f32
    %5 = vector.broadcast %cst_5 : f32 to vector<256x1xf32>
    %6 = arith.divf %4, %5 : vector<256x1xf32>
    %7 = vector.broadcast %6 : vector<256x1xf32> to vector<256x8xf32>
    %8 = arith.subf %0, %7 : vector<256x8xf32>
    %9 = arith.mulf %8, %8 : vector<256x8xf32>
    %cst_6 = arith.constant dense<0.000000e+00> : vector<256xf32>
    %10 = vector.multi_reduction <add>, %9, %cst_6 [1] : vector<256x8xf32> to vector<256xf32>
    %11 = vector.shape_cast %10 : vector<256xf32> to vector<256x1xf32>
    %cst_7 = arith.constant 8.000000e+00 : f32
    %12 = vector.broadcast %cst_7 : f32 to vector<256x1xf32>
    %13 = arith.divf %11, %12 : vector<256x1xf32>
    %14 = vector.broadcast %6 : vector<256x1xf32> to vector<256x8xf32>
    %15 = arith.subf %0, %14 : vector<256x8xf32>
    %cst_8 = arith.constant 9.99999974E-6 : f32
    %16 = vector.broadcast %cst_8 : f32 to vector<256x1xf32>
    %17 = arith.addf %13, %16 : vector<256x1xf32>
    %18 = math.rsqrt %17 : vector<256x1xf32>
    %19 = vector.broadcast %18 : vector<256x1xf32> to vector<256x8xf32>
    %20 = arith.mulf %15, %19 : vector<256x8xf32>
    %21 = vector.broadcast %1 : vector<1x8xf32> to vector<256x8xf32>
    %22 = arith.mulf %20, %21 : vector<256x8xf32>
    %23 = vector.broadcast %2 : vector<1x8xf32> to vector<256x8xf32>
    %24 = arith.addf %22, %23 : vector<256x8xf32>
    %25 = arith.truncf %24 : vector<256x8xf32> to vector<256x8xbf16>
    %c0_9 = arith.constant 0 : index
    %c0_10 = arith.constant 0 : index
    %26 = vector.load %arg4[%c0_9, %c0_10] : memref<8x24xbf16, #tpu.memory_space<vmem>>, vector<8x24xbf16>
    %cst_11 = arith.constant dense<0.000000e+00> : vector<256x24xf32>
    %27 = tpu.matmul %25, %26, %cst_11 {dimension_numbers = #tpu.dot_dimension_numbers<[1], [0], [0], [1], [0, 0, 1, 1], [], []>} : vector<256x8xbf16>, vector<8x24xbf16>, vector<256x24xf32> -> vector<256x24xf32>
    %c0_12 = arith.constant 0 : index
    %c0_13 = arith.constant 0 : index
    %28 = vector.load %arg5[%c0_12, %c0_13] : memref<1x24xf32, #tpu.memory_space<vmem>>, vector<1x24xf32>
    %29 = vector.broadcast %28 : vector<1x24xf32> to vector<256x24xf32>
    %30 = arith.addf %27, %29 : vector<256x24xf32>
    %31 = arith.truncf %30 : vector<256x24xf32> to vector<256x24xbf16>
    %32 = vector.extract_strided_slice %31 {offsets = [0, 0], sizes = [256, 8], strides = [1, 1]} : vector<256x24xbf16> to vector<256x8xbf16>
    %c0_14 = arith.constant 0 : index
    %c0_15 = arith.constant 0 : index
    %33 = vector.load %arg6[%c0_14, %c0_15] : memref<256x8xbf16, #tpu.memory_space<vmem>>, vector<256x8xbf16>
    tpu.vector_store %arg6[%c0_14, %c0_15], %32 {strides = array<i32>} : memref<256x8xbf16, #tpu.memory_space<vmem>>, vector<256x8xbf16>,
    %34 = vector.extract_strided_slice %31 {offsets = [0, 8], sizes = [256, 8], strides = [1, 1]} : vector<256x24xbf16> to vector<256x8xbf16>
    %c0_16 = arith.constant 0 : index
    %c0_17 = arith.constant 0 : index
    %35 = vector.load %arg7[%c0_16, %c0_17] : memref<256x8xbf16, #tpu.memory_space<vmem>>, vector<256x8xbf16>
    tpu.vector_store %arg7[%c0_16, %c0_17], %34 {strides = array<i32>} : memref<256x8xbf16, #tpu.memory_space<vmem>>, vector<256x8xbf16>,
    %36 = vector.extract_strided_slice %31 {offsets = [0, 16], sizes = [256, 8], strides = [1, 1]} : vector<256x24xbf16> to vector<256x8xbf16>
    %c0_18 = arith.constant 0 : index
    %c0_19 = arith.constant 0 : index
    %37 = vector.load %arg8[%c0_18, %c0_19] : memref<256x8xbf16, #tpu.memory_space<vmem>>, vector<256x8xbf16>
    tpu.vector_store %arg8[%c0_18, %c0_19], %36 {strides = array<i32>} : memref<256x8xbf16, #tpu.memory_space<vmem>>, vector<256x8xbf16>,
    return
  }
  func.func @transform_0(%arg0: i32) -> (i32, i32) {
    %c0_i32 = arith.constant 0 : i32
    %c0_i32_0 = arith.constant 0 : i32
    return %arg0, %c0_i32 : i32, i32
  }
  func.func @transform_1(%arg0: i32) -> (i32, i32) {
    %c0_i32 = arith.constant 0 : i32
    %c0_i32_0 = arith.constant 0 : i32
    %c0_i32_1 = arith.constant 0 : i32
    return %c0_i32, %c0_i32_0 : i32, i32
  }
  func.func @transform_2(%arg0: i32) -> (i32, i32) {
    %c0_i32 = arith.constant 0 : i32
    %c0_i32_0 = arith.constant 0 : i32
    %c0_i32_1 = arith.constant 0 : i32
    return %c0_i32, %c0_i32_0 : i32, i32
  }
  func.func @transform_3(%arg0: i32) -> (i32, i32) {
    %c0_i32 = arith.constant 0 : i32
    %c0_i32_0 = arith.constant 0 : i32
    %c0_i32_1 = arith.constant 0 : i32
    return %c0_i32, %c0_i32_0 : i32, i32
  }
  func.func @transform_4(%arg0: i32) -> (i32, i32) {
    %c0_i32 = arith.constant 0 : i32
    %c0_i32_0 = arith.constant 0 : i32
    %c0_i32_1 = arith.constant 0 : i32
    return %c0_i32, %c0_i32_0 : i32, i32
  }
  func.func @transform_5(%arg0: i32) -> (i32, i32) {
    %c0_i32 = arith.constant 0 : i32
    %c0_i32_0 = arith.constant 0 : i32
    return %arg0, %c0_i32 : i32, i32
  }
  func.func @transform_6(%arg0: i32) -> (i32, i32) {
    %c0_i32 = arith.constant 0 : i32
    %c0_i32_0 = arith.constant 0 : i32
    return %arg0, %c0_i32 : i32, i32
  }
  func.func @transform_7(%arg0: i32) -> (i32, i32) {
    %c0_i32 = arith.constant 0 : i32
    %c0_i32_0 = arith.constant 0 : i32
    return %arg0, %c0_i32 : i32, i32
  }
}

module attributes {stable_mosaic.version = 11 : i64} {
  func.func @_mlp_block_kernel(%arg0: i32, %arg1: memref<256x8xf32, #tpu.memory_space<vmem>>, %arg2: memref<1x8xf32, #tpu.memory_space<vmem>>, %arg3: memref<1x8xf32, #tpu.memory_space<vmem>>, %arg4: memref<8x32xbf16, #tpu.memory_space<vmem>>, %arg5: memref<1x32xf32, #tpu.memory_space<vmem>>, %arg6: memref<32x8xbf16, #tpu.memory_space<vmem>>, %arg7: memref<1x8xf32, #tpu.memory_space<vmem>>, %arg8: memref<256x8xf32, #tpu.memory_space<vmem>>) attributes {dimension_semantics = [#tpu.dimension_semantics<parallel>], iteration_bounds = array<i64: 1>, scalar_prefetch = 0 : i64, scratch_operands = 0 : i64, tpu.core_type = #tpu.core_type<tc>, window_params = [{transform_indices = @transform_0, window_bounds = array<i64: 256, 8>}, {pipeline_mode = #tpu.pipeline_mode<synchronous>, transform_indices = @transform_1, window_bounds = array<i64: 1, 8>}, {pipeline_mode = #tpu.pipeline_mode<synchronous>, transform_indices = @transform_2, window_bounds = array<i64: 1, 8>}, {pipeline_mode = #tpu.pipeline_mode<synchronous>, transform_indices = @transform_3, window_bounds = array<i64: 8, 32>}, {pipeline_mode = #tpu.pipeline_mode<synchronous>, transform_indices = @transform_4, window_bounds = array<i64: 1, 32>}, {pipeline_mode = #tpu.pipeline_mode<synchronous>, transform_indices = @transform_5, window_bounds = array<i64: 32, 8>}, {pipeline_mode = #tpu.pipeline_mode<synchronous>, transform_indices = @transform_6, window_bounds = array<i64: 1, 8>}, {transform_indices = @transform_7, window_bounds = array<i64: 256, 8>}]} {
    %c0 = arith.constant 0 : index
    %c0_0 = arith.constant 0 : index
    %0 = vector.load %arg1[%c0, %c0_0] : memref<256x8xf32, #tpu.memory_space<vmem>>, vector<256x8xf32>
    %c0_1 = arith.constant 0 : index
    %c0_2 = arith.constant 0 : index
    %1 = vector.load %arg2[%c0_1, %c0_2] : memref<1x8xf32, #tpu.memory_space<vmem>>, vector<1x8xf32>
    %c0_3 = arith.constant 0 : index
    %c0_4 = arith.constant 0 : index
    %2 = vector.load %arg3[%c0_3, %c0_4] : memref<1x8xf32, #tpu.memory_space<vmem>>, vector<1x8xf32>
    %cst = arith.constant dense<0.000000e+00> : vector<256xf32>
    %3 = vector.multi_reduction <add>, %0, %cst [1] : vector<256x8xf32> to vector<256xf32>
    %4 = vector.shape_cast %3 : vector<256xf32> to vector<256x1xf32>
    %cst_5 = arith.constant 8.000000e+00 : f32
    %5 = vector.broadcast %cst_5 : f32 to vector<256x1xf32>
    %6 = arith.divf %4, %5 : vector<256x1xf32>
    %7 = vector.broadcast %6 : vector<256x1xf32> to vector<256x8xf32>
    %8 = arith.subf %0, %7 : vector<256x8xf32>
    %9 = arith.mulf %8, %8 : vector<256x8xf32>
    %cst_6 = arith.constant dense<0.000000e+00> : vector<256xf32>
    %10 = vector.multi_reduction <add>, %9, %cst_6 [1] : vector<256x8xf32> to vector<256xf32>
    %11 = vector.shape_cast %10 : vector<256xf32> to vector<256x1xf32>
    %cst_7 = arith.constant 8.000000e+00 : f32
    %12 = vector.broadcast %cst_7 : f32 to vector<256x1xf32>
    %13 = arith.divf %11, %12 : vector<256x1xf32>
    %14 = vector.broadcast %6 : vector<256x1xf32> to vector<256x8xf32>
    %15 = arith.subf %0, %14 : vector<256x8xf32>
    %cst_8 = arith.constant 9.99999974E-6 : f32
    %16 = vector.broadcast %cst_8 : f32 to vector<256x1xf32>
    %17 = arith.addf %13, %16 : vector<256x1xf32>
    %18 = math.rsqrt %17 : vector<256x1xf32>
    %19 = vector.broadcast %18 : vector<256x1xf32> to vector<256x8xf32>
    %20 = arith.mulf %15, %19 : vector<256x8xf32>
    %21 = vector.broadcast %1 : vector<1x8xf32> to vector<256x8xf32>
    %22 = arith.mulf %20, %21 : vector<256x8xf32>
    %23 = vector.broadcast %2 : vector<1x8xf32> to vector<256x8xf32>
    %24 = arith.addf %22, %23 : vector<256x8xf32>
    %25 = arith.truncf %24 : vector<256x8xf32> to vector<256x8xbf16>
    %c0_9 = arith.constant 0 : index
    %c0_10 = arith.constant 0 : index
    %26 = vector.load %arg4[%c0_9, %c0_10] : memref<8x32xbf16, #tpu.memory_space<vmem>>, vector<8x32xbf16>
    %cst_11 = arith.constant dense<0.000000e+00> : vector<256x32xf32>
    %27 = tpu.matmul %25, %26, %cst_11 {dimension_numbers = #tpu.dot_dimension_numbers<[1], [0], [0], [1], [0, 0, 1, 1], [], []>} : vector<256x8xbf16>, vector<8x32xbf16>, vector<256x32xf32> -> vector<256x32xf32>
    %c0_12 = arith.constant 0 : index
    %c0_13 = arith.constant 0 : index
    %28 = vector.load %arg5[%c0_12, %c0_13] : memref<1x32xf32, #tpu.memory_space<vmem>>, vector<1x32xf32>
    %29 = vector.broadcast %28 : vector<1x32xf32> to vector<256x32xf32>
    %30 = arith.addf %27, %29 : vector<256x32xf32>
    %cst_14 = arith.constant 5.000000e-01 : f32
    %31 = vector.broadcast %cst_14 : f32 to vector<256x32xf32>
    %32 = arith.mulf %31, %30 : vector<256x32xf32>
    %cst_15 = arith.constant 0.707106769 : f32
    %33 = vector.broadcast %cst_15 : f32 to vector<256x32xf32>
    %34 = arith.mulf %30, %33 : vector<256x32xf32>
    %35 = math.erf %34 : vector<256x32xf32>
    %cst_16 = arith.constant 1.000000e+00 : f32
    %36 = vector.broadcast %cst_16 : f32 to vector<256x32xf32>
    %37 = arith.addf %36, %35 : vector<256x32xf32>
    %38 = arith.mulf %32, %37 : vector<256x32xf32>
    %39 = arith.truncf %38 : vector<256x32xf32> to vector<256x32xbf16>
    %c0_17 = arith.constant 0 : index
    %c0_18 = arith.constant 0 : index
    %40 = vector.load %arg6[%c0_17, %c0_18] : memref<32x8xbf16, #tpu.memory_space<vmem>>, vector<32x8xbf16>
    %cst_19 = arith.constant dense<0.000000e+00> : vector<256x8xf32>
    %41 = tpu.matmul %39, %40, %cst_19 {dimension_numbers = #tpu.dot_dimension_numbers<[1], [0], [0], [1], [0, 0, 1, 1], [], []>} : vector<256x32xbf16>, vector<32x8xbf16>, vector<256x8xf32> -> vector<256x8xf32>
    %c0_20 = arith.constant 0 : index
    %c0_21 = arith.constant 0 : index
    %42 = vector.load %arg7[%c0_20, %c0_21] : memref<1x8xf32, #tpu.memory_space<vmem>>, vector<1x8xf32>
    %43 = vector.broadcast %42 : vector<1x8xf32> to vector<256x8xf32>
    %44 = arith.addf %41, %43 : vector<256x8xf32>
    %45 = arith.addf %0, %44 : vector<256x8xf32>
    %c0_22 = arith.constant 0 : index
    %c0_23 = arith.constant 0 : index
    %46 = vector.load %arg8[%c0_22, %c0_23] : memref<256x8xf32, #tpu.memory_space<vmem>>, vector<256x8xf32>
    tpu.vector_store %arg8[%c0_22, %c0_23], %45 {strides = array<i32>} : memref<256x8xf32, #tpu.memory_space<vmem>>, vector<256x8xf32>,
    return
  }
  func.func @transform_0(%arg0: i32) -> (i32, i32) {
    %c0_i32 = arith.constant 0 : i32
    %c0_i32_0 = arith.constant 0 : i32
    return %arg0, %c0_i32 : i32, i32
  }
  func.func @transform_1(%arg0: i32) -> (i32, i32) {
    %c0_i32 = arith.constant 0 : i32
    %c0_i32_0 = arith.constant 0 : i32
    %c0_i32_1 = arith.constant 0 : i32
    return %c0_i32, %c0_i32_0 : i32, i32
  }
  func.func @transform_2(%arg0: i32) -> (i32, i32) {
    %c0_i32 = arith.constant 0 : i32
    %c0_i32_0 = arith.constant 0 : i32
    %c0_i32_1 = arith.constant 0 : i32
    return %c0_i32, %c0_i32_0 : i32, i32
  }
  func.func @transform_3(%arg0: i32) -> (i32, i32) {
    %c0_i32 = arith.constant 0 : i32
    %c0_i32_0 = arith.constant 0 : i32
    %c0_i32_1 = arith.constant 0 : i32
    return %c0_i32, %c0_i32_0 : i32, i32
  }
  func.func @transform_4(%arg0: i32) -> (i32, i32) {
    %c0_i32 = arith.constant 0 : i32
    %c0_i32_0 = arith.constant 0 : i32
    %c0_i32_1 = arith.constant 0 : i32
    return %c0_i32, %c0_i32_0 : i32, i32
  }
  func.func @transform_5(%arg0: i32) -> (i32, i32) {
    %c0_i32 = arith.constant 0 : i32
    %c0_i32_0 = arith.constant 0 : i32
    %c0_i32_1 = arith.constant 0 : i32
    return %c0_i32, %c0_i32_0 : i32, i32
  }
  func.func @transform_6(%arg0: i32) -> (i32, i32) {
    %c0_i32 = arith.constant 0 : i32
    %c0_i32_0 = arith.constant 0 : i32
    %c0_i32_1 = arith.constant 0 : i32
    return %c0_i32, %c0_i32_0 : i32, i32
  }
  func.func @transform_7(%arg0: i32) -> (i32, i32) {
    %c0_i32 = arith.constant 0 : i32
    %c0_i32_0 = arith.constant 0 : i32
    return %arg0, %c0_i32 : i32, i32
  }
}

module attributes {stable_mosaic.version = 11 : i64} {
  func.func @_head_kernel(%arg0: memref<2x8xf32, #tpu.memory_space<vmem>>, %arg1: memref<1x8xf32, #tpu.memory_space<vmem>>, %arg2: memref<1x8xf32, #tpu.memory_space<vmem>>, %arg3: memref<8x20xbf16, #tpu.memory_space<vmem>>, %arg4: memref<1x20xf32, #tpu.memory_space<vmem>>, %arg5: memref<2x20xf32, #tpu.memory_space<vmem>>) attributes {dimension_semantics = [], scalar_prefetch = 0 : i64, scratch_operands = 0 : i64, tpu.core_type = #tpu.core_type<tc>} {
    %c0 = arith.constant 0 : index
    %c0_0 = arith.constant 0 : index
    %0 = vector.load %arg0[%c0, %c0_0] : memref<2x8xf32, #tpu.memory_space<vmem>>, vector<2x8xf32>
    %c0_1 = arith.constant 0 : index
    %c0_2 = arith.constant 0 : index
    %1 = vector.load %arg1[%c0_1, %c0_2] : memref<1x8xf32, #tpu.memory_space<vmem>>, vector<1x8xf32>
    %c0_3 = arith.constant 0 : index
    %c0_4 = arith.constant 0 : index
    %2 = vector.load %arg2[%c0_3, %c0_4] : memref<1x8xf32, #tpu.memory_space<vmem>>, vector<1x8xf32>
    %cst = arith.constant dense<0.000000e+00> : vector<2xf32>
    %3 = vector.multi_reduction <add>, %0, %cst [1] : vector<2x8xf32> to vector<2xf32>
    %4 = vector.shape_cast %3 : vector<2xf32> to vector<2x1xf32>
    %cst_5 = arith.constant 8.000000e+00 : f32
    %5 = vector.broadcast %cst_5 : f32 to vector<2x1xf32>
    %6 = arith.divf %4, %5 : vector<2x1xf32>
    %7 = vector.broadcast %6 : vector<2x1xf32> to vector<2x8xf32>
    %8 = arith.subf %0, %7 : vector<2x8xf32>
    %9 = arith.mulf %8, %8 : vector<2x8xf32>
    %cst_6 = arith.constant dense<0.000000e+00> : vector<2xf32>
    %10 = vector.multi_reduction <add>, %9, %cst_6 [1] : vector<2x8xf32> to vector<2xf32>
    %11 = vector.shape_cast %10 : vector<2xf32> to vector<2x1xf32>
    %cst_7 = arith.constant 8.000000e+00 : f32
    %12 = vector.broadcast %cst_7 : f32 to vector<2x1xf32>
    %13 = arith.divf %11, %12 : vector<2x1xf32>
    %14 = vector.broadcast %6 : vector<2x1xf32> to vector<2x8xf32>
    %15 = arith.subf %0, %14 : vector<2x8xf32>
    %cst_8 = arith.constant 9.99999974E-6 : f32
    %16 = vector.broadcast %cst_8 : f32 to vector<2x1xf32>
    %17 = arith.addf %13, %16 : vector<2x1xf32>
    %18 = math.rsqrt %17 : vector<2x1xf32>
    %19 = vector.broadcast %18 : vector<2x1xf32> to vector<2x8xf32>
    %20 = arith.mulf %15, %19 : vector<2x8xf32>
    %21 = vector.broadcast %1 : vector<1x8xf32> to vector<2x8xf32>
    %22 = arith.mulf %20, %21 : vector<2x8xf32>
    %23 = vector.broadcast %2 : vector<1x8xf32> to vector<2x8xf32>
    %24 = arith.addf %22, %23 : vector<2x8xf32>
    %25 = arith.truncf %24 : vector<2x8xf32> to vector<2x8xbf16>
    %c0_9 = arith.constant 0 : index
    %c0_10 = arith.constant 0 : index
    %26 = vector.load %arg3[%c0_9, %c0_10] : memref<8x20xbf16, #tpu.memory_space<vmem>>, vector<8x20xbf16>
    %cst_11 = arith.constant dense<0.000000e+00> : vector<2x20xf32>
    %27 = tpu.matmul %25, %26, %cst_11 {dimension_numbers = #tpu.dot_dimension_numbers<[1], [0], [0], [1], [0, 0, 1, 1], [], []>} : vector<2x8xbf16>, vector<8x20xbf16>, vector<2x20xf32> -> vector<2x20xf32>
    %c0_12 = arith.constant 0 : index
    %c0_13 = arith.constant 0 : index
    %28 = vector.load %arg4[%c0_12, %c0_13] : memref<1x20xf32, #tpu.memory_space<vmem>>, vector<1x20xf32>
    %29 = vector.broadcast %28 : vector<1x20xf32> to vector<2x20xf32>
    %30 = arith.addf %27, %29 : vector<2x20xf32>
    %c0_14 = arith.constant 0 : index
    %c0_15 = arith.constant 0 : index
    %31 = vector.load %arg5[%c0_14, %c0_15] : memref<2x20xf32, #tpu.memory_space<vmem>>, vector<2x20xf32>
    tpu.vector_store %arg5[%c0_14, %c0_15], %30 {strides = array<i32>} : memref<2x20xf32, #tpu.memory_space<vmem>>, vector<2x20xf32>,
    return
  }
}

</mosaic_0001>

<bundles_post_ra>
// kernel: tpu_custom_call.1
= control target key start
LH: loop header
LB: loop body
LE: loop exit
PB: predicated region body
PF: predicated region fallthrough
CT: control target
= control target key end

     0   :  { %6 = vsyncpa [#allocation3], 0  ;;  %s124_s0 = inlined_call_operand.hbm [shape: f32[8,128], index: 0, kind: input, shape index: {}]   ;;  %s125_s1 = inlined_call_operand.hbm [shape: f32[8,128], index: 1, kind: output, shape index: {}]  }
   0x1   :  { %7 = vsyncpa [#allocation4], 0  ;;  %s88_s6 = smov [#allocation2]   ;;  %s40_s10 = scalar_lea.hbm %s124_s0, 128 }
   0x2   :  { %s14_s7 = sshll.u32 %s88_s6, 4  ;;  %p41_p0 = scmp.ne.s32.totalorder %s124_s0, %s40_s10  ;;  %s15_s7 = int_to_ptr.vmem [resolvable:$true] %s14_s7 }
   0x3   :  { %p44_p1 = scmp.lt.u32.totalorder %s40_s10, %s124_s0 }
   0x5   :  { %p46_p2 = pnand %p44_p1, %p41_p0 }
   0x7   :  { %49 = shalt.err (!%p46_p2)
}
   0x8   :  { %s50_s15 = scalar_lea.vmem %s15_s7, 128  ;;  %p55_p4 = scmp.lt.s32.totalorder %s15_s7, %s15_s7 }
   0x9   :  { %p51_p3 = scmp.ne.s32.totalorder %s15_s7, %s50_s15  ;;  %p56_p5 = scmp.lt.s32.totalorder %s50_s15, %s50_s15 }
   0xb   :  { %p57_p6 = por %p56_p5, %p55_p4 }
   0xd   :  { %p58_p7 = pnand %p57_p6, %p51_p3 }
   0xf   :  { %61 = shalt.err (!%p58_p7)
}
  0x10   :  { %17 = dma.hbm_to_vmem [thread:$0]  %s124_s0, 128, %s15_s7, [#allocation3]  }
  0x11   :  { %84 = dma.done.wait [#allocation3], 128  }
  0x12   :  { %85 = vsyncadd [#allocation3], 4294967168  ;;  %s89_s18 = smov [#allocation5]   ;;  %v21_v0 = vld [vmem:[#allocation2] sm:$0xff] }
  0x13   :  { %s29_s19 = sshll.u32 %s89_s18, 4  ;;  %22 = vst [vmem:[#allocation5] sm:$0xff] %v21_v0  ;;  %s30_s19 = int_to_ptr.vmem [resolvable:$true] %s29_s19 }
  0x14   :  { %s62_s20 = scalar_lea.vmem %s30_s19, 128  ;;  %p67_p9 = scmp.lt.s32.totalorder %s30_s19, %s30_s19 }
  0x15   :  { %p63_p8 = scmp.ne.s32.totalorder %s30_s19, %s62_s20  ;;  %p68_p10 = scmp.lt.s32.totalorder %s62_s20, %s62_s20 }
  0x17   :  { %p69_p11 = por %p68_p10, %p67_p9 }
  0x19   :  { %p70_p12 = pnand %p69_p11, %p63_p8 }
  0x1b   :  { %73 = shalt.err (!%p70_p12)
}
  0x1c   :  { %s74_s23 = scalar_lea.hbm %s125_s1, 128 }
  0x1d   :  { %p75_p13 = scmp.ne.s32.totalorder %s125_s1, %s74_s23  ;;  %p78_p0 = scmp.lt.u32.totalorder %s74_s23, %s125_s1 }
  0x1f   :  { %p80_p1 = pnand %p78_p0, %p75_p13 }
  0x21   :  { %83 = shalt.err (!%p80_p1)
}
  0x22   :  { %32 = dma.vmem_to_hbm [thread:$0]  %s30_s19, 128, %s125_s1, [#allocation4]  }
  0x23   :  { %86 = dma.done.wait [#allocation4], 128  }
  0x24   :  { %87 = vsyncadd [#allocation4], 4294967168 }
  0x25   :  { %36 = vsyncpa [#allocation3], 1 }
  0x26   :  { %37 = vsyncpa [#allocation4], 1 }

// kernel: forward.9
= control target key start
LH: loop header
LB: loop body
LE: loop exit
PB: predicated region body
PF: predicated region fallthrough
CT: control target
= control target key end

     0   :  { %vm110_vm0 = vcmask 1045504   ;;  %vm85_vm1 = vcmask 97280   ;;  %vm211_vm2 = vcmask 64512   ;;  %s412_s1 = inlined_call_operand.vmem [shape: bf16[12,8], index: 1, kind: input, shape index: {}]   ;;  %s413_s0 = inlined_call_operand.vmem [shape: bf16[128,12], index: 0, kind: input, shape index: {}]   ;;  %s414_s2 = inlined_call_operand.vmem [shape: f32[1,8], index: 2, kind: input, shape index: {}]   ;;  %s415_s3 = inlined_call_operand.vmem [shape: f32[128,8], index: 3, kind: output, shape index: {}]  }
   0x1   :  { %v281_v0 = vld [vmem:[%s412_s1] sm:$0x3f]   ;;  %v284_v4 = vld [vmem:[%s413_s0 + $0x8] sm:$0xff]   ;;  %v286_v6 = vld [vmem:[%s413_s0 + $0x10] sm:$0xff]  }
   0x2   :  { %v282_v1 = vld [vmem:[%s413_s0] sm:$0xff]   ;;  %279 = vmatprep.subr.msk.bf16.mxu0 %vm110_vm0, %v281_v0  ;;  %280 = vmatprep.subr.msk.bf16.mxu1 %vm110_vm0, %v281_v0  ;;  %v112_v2 = vsel %vm110_vm0, %v281_v0, 0  ;;  %v285_v5 = vld [vmem:[%s413_s0 + $0x28] sm:$0xff]   ;;  %v287_v7 = vld [vmem:[%s413_s0 + $0x30] sm:$0xff]  }
   0x3   :  { %v283_v3 = vld [vmem:[%s413_s0 + $0x20] sm:$0xff]   ;;  %260 = vmatpush3.bf16.msra.mxu0 %v112_v2  ;;  %278 = vmatpush3.bf16.msra.mxu1 %v112_v2  ;;  %v288_v8 = vld [vmem:[%s413_s0 + $0x18] sm:$0xff]  }
   0x4   :  { %261 = vmatprep.mubr.msk.bf16.mxu0 %vm85_vm1, %v282_v1  ;;  %269 = vmatprep.mubr.msk.bf16.mxu1 %vm85_vm1, %v283_v3  ;;  %v289_v9 = vld [vmem:[%s413_s0 + $0x38] sm:$0xff]   ;;  %v232_v10 = vld [vmem:[%s414_s2] ss:$0 sm:$0xff] }
   0x6   :  { %262 = vmatmul.mubr.msk.bf16.vlgmr.msra.gmra.mrb[0].mxu0 %vm85_vm1, %v284_v4  ;;  %270 = vmatmul.mubr.msk.bf16.vlgmr.msra.gmra.mrb[0].mxu1 %vm85_vm1, %v285_v5 }
   0x7   :  { %265 = vmatprep.mubr.msk.bf16.mxu0 %vm85_vm1, %v286_v6  ;;  %273 = vmatprep.mubr.msk.bf16.mxu1 %vm85_vm1, %v287_v7 }
   0xe   :  { %266 = vmatmul.mubr.msk.bf16.gmra.mrb[4].mxu0 %vm85_vm1, %v288_v8  ;;  %274 = vmatmul.mubr.msk.bf16.gmra.mrb[4].mxu1 %vm85_vm1, %v289_v9 }
  0xd9   :  { %v263_v11 = vpop.f32.mrb[0].mxu0  ;;  %v271_v12 = vpop.f32.mrb[0].mxu1 }
  0xda   :  { %v157_v13 = vadd.f32 %v263_v11, %v232_v10  ;;  %v189_v14 = vadd.f32 %v271_v12, %v232_v10  ;;  %v148_v15 = vpop.f32.mrb[1].mxu0  ;;  %v180_v16 = vpop.f32.mrb[1].mxu1 }
  0xdb   :  { %v149_v17 = vadd.f32 %v232_v10, %v148_v15  ;;  %v181_v18 = vadd.f32 %v232_v10, %v180_v16  ;;  %v264_v19 = vpop.f32.mrb[2].mxu0  ;;  %v272_v20 = vpop.f32.mrb[2].mxu1 }
  0xdc   :  { %214 = vst.msk [vmem:[%s415_s3 + $0x10] sm:$0xff] %vm211_vm2, %v157_v13  ;;  %222 = vst.msk [vmem:[%s415_s3 + $0x50] sm:$0xff] %vm211_vm2, %v189_v14  ;;  %v160_v21 = vadd.f32 %v264_v19, %v232_v10  ;;  %v192_v22 = vadd.f32 %v272_v20, %v232_v10  ;;  %v151_v23 = vpop.f32.mrb[3].mxu0  ;;  %v183_v24 = vpop.f32.mrb[3].mxu1 }
  0xdd   :  { %212 = vst.msk [vmem:[%s415_s3] sm:$0xff] %vm211_vm2, %v149_v17  ;;  %220 = vst.msk [vmem:[%s415_s3 + $0x40] sm:$0xff] %vm211_vm2, %v181_v18  ;;  %v152_v25 = vadd.f32 %v232_v10, %v151_v23  ;;  %v184_v26 = vadd.f32 %v232_v10, %v183_v24 }
  0xde   :  { %215 = vst.msk [vmem:[%s415_s3 + $0x18] sm:$0xff] %vm211_vm2, %v160_v21  ;;  %223 = vst.msk [vmem:[%s415_s3 + $0x58] sm:$0xff] %vm211_vm2, %v192_v22 }
  0xdf   :  { %213 = vst.msk [vmem:[%s415_s3 + $0x8] sm:$0xff] %vm211_vm2, %v152_v25  ;;  %221 = vst.msk [vmem:[%s415_s3 + $0x48] sm:$0xff] %vm211_vm2, %v184_v26 }
  0xe1   :  { %v267_v27 = vpop.f32.mrb[4].mxu0  ;;  %v275_v28 = vpop.f32.mrb[4].mxu1 }
  0xe2   :  { %v173_v29 = vadd.f32 %v267_v27, %v232_v10  ;;  %v205_v30 = vadd.f32 %v275_v28, %v232_v10  ;;  %v164_v31 = vpop.f32.mrb[5].mxu0  ;;  %v196_v32 = vpop.f32.mrb[5].mxu1 }
  0xe3   :  { %v165_v33 = vadd.f32 %v232_v10, %v164_v31  ;;  %v197_v34 = vadd.f32 %v232_v10, %v196_v32  ;;  %v268_v35 = vpop.f32.mrb[6].mxu0  ;;  %v276_v36 = vpop.f32.mrb[6].mxu1 }
  0xe4   :  { %218 = vst.msk [vmem:[%s415_s3 + $0x30] sm:$0xff] %vm211_vm2, %v173_v29  ;;  %226 = vst.msk [vmem:[%s415_s3 + $0x70] sm:$0xff] %vm211_vm2, %v205_v30  ;;  %v176_v37 = vadd.f32 %v268_v35, %v232_v10  ;;  %v208_v38 = vadd.f32 %v276_v36, %v232_v10  ;;  %v167_v39 = vpop.f32.mrb[7].mxu0  ;;  %v199_v40 = vpop.f32.mrb[7].mxu1 }
  0xe5   :  { %216 = vst.msk [vmem:[%s415_s3 + $0x20] sm:$0xff] %vm211_vm2, %v165_v33  ;;  %224 = vst.msk [vmem:[%s415_s3 + $0x60] sm:$0xff] %vm211_vm2, %v197_v34  ;;  %v168_v41 = vadd.f32 %v232_v10, %v167_v39  ;;  %v200_v42 = vadd.f32 %v232_v10, %v199_v40 }
  0xe6   :  { %219 = vst.msk [vmem:[%s415_s3 + $0x38] sm:$0xff] %vm211_vm2, %v176_v37  ;;  %227 = vst.msk [vmem:[%s415_s3 + $0x78] sm:$0xff] %vm211_vm2, %v208_v38 }
  0xe7   :  { %217 = vst.msk [vmem:[%s415_s3 + $0x28] sm:$0xff] %vm211_vm2, %v168_v41  ;;  %225 = vst.msk [vmem:[%s415_s3 + $0x68] sm:$0xff] %vm211_vm2, %v200_v42 }

// kernel: forward.10
= control target key start
LH: loop header
LB: loop body
LE: loop exit
PB: predicated region body
PF: predicated region fallthrough
CT: control target
= control target key end

     0   :  { %vm30_vm0 = vcmask 64512   ;;  %s818_s0 = inlined_call_operand.vmem [shape: f32[128,8], index: 0, kind: input, shape index: {}]   ;;  %s819_s1 = inlined_call_operand.vmem [shape: f32[1,8], index: 1, kind: input, shape index: {}]   ;;  %s820_s2 = inlined_call_operand.vmem [shape: f32[1,8], index: 2, kind: input, shape index: {}]   ;;  %s821_s3 = inlined_call_operand.vmem [shape: f32[128,8], index: 3, kind: output, shape index: {}]  }
   0x1   :  { %v14_v0 = vld [vmem:[%s818_s0] sm:$0xff]  ;;  %v16_v1 = vld [vmem:[%s818_s0 + $0x10] sm:$0xff]  ;;  %v15_v2 = vld [vmem:[%s818_s0 + $0x8] sm:$0xff] }
   0x2   :  { %v31_v3 = vsel %vm30_vm0, %v14_v0, 0.0  ;;  %v37_v4 = vsel %vm30_vm0, %v16_v1, 0.0  ;;  %v17_v5 = vld [vmem:[%s818_s0 + $0x18] sm:$0xff]  ;;  %v34_v6 = vsel %vm30_vm0, %v15_v2, 0.0  ;;  %v18_v8 = vld [vmem:[%s818_s0 + $0x20] sm:$0xff]  ;;  %v19_v9 = vld [vmem:[%s818_s0 + $0x28] sm:$0xff] }
   0x3   :  { %32 = vadd.xlane.f32.xlu0 %v31_v3  ;;  %38 = vadd.xlane.f32.xlu1 %v37_v4  ;;  %v40_v7 = vsel %vm30_vm0, %v17_v5, 0.0  ;;  %v43_v10 = vsel %vm30_vm0, %v18_v8, 0.0  ;;  %v46_v11 = vsel %vm30_vm0, %v19_v9, 0.0  ;;  %v499_v12 = vld [vmem:[%s818_s0 + $0x30] sm:$0xff]  ;;  %v504_v13 = vld [vmem:[%s818_s0 + $0x38] sm:$0xff]  ;;  %v513_v16 = vld [vmem:[%s818_s0 + $0x40] sm:$0xff] }
   0x4   :  { %v49_v14 = vsel %vm30_vm0, %v499_v12, 0.0  ;;  %v52_v15 = vsel %vm30_vm0, %v504_v13, 0.0  ;;  %v518_v17 = vld [vmem:[%s818_s0 + $0x48] sm:$0xff]  ;;  %v55_v18 = vsel %vm30_vm0, %v513_v16, 0.0  ;;  %v527_v20 = vld [vmem:[%s818_s0 + $0x50] sm:$0xff]  ;;  %v532_v21 = vld [vmem:[%s818_s0 + $0x58] sm:$0xff] }
   0x5   :  { %v58_v19 = vsel %vm30_vm0, %v518_v17, 0.0  ;;  %v61_v22 = vsel %vm30_vm0, %v527_v20, 0.0  ;;  %v64_v23 = vsel %vm30_vm0, %v532_v21, 0.0  ;;  %v541_v24 = vld [vmem:[%s818_s0 + $0x60] sm:$0xff]  ;;  %v546_v25 = vld [vmem:[%s818_s0 + $0x68] sm:$0xff]  ;;  %v555_v28 = vld [vmem:[%s818_s0 + $0x70] sm:$0xff] }
   0x6   :  { %v67_v26 = vsel %vm30_vm0, %v541_v24, 0.0  ;;  %v70_v27 = vsel %vm30_vm0, %v546_v25, 0.0  ;;  %v560_v29 = vld [vmem:[%s818_s0 + $0x78] sm:$0xff]  ;;  %v73_v30 = vsel %vm30_vm0, %v555_v28, 0.0 }
   0x7   :  { %35 = vadd.xlane.f32.xlu0 %v34_v6  ;;  %41 = vadd.xlane.f32.xlu1 %v40_v7  ;;  %v76_v31 = vsel %vm30_vm0, %v560_v29, 0.0 }
   0xb   :  { %44 = vadd.xlane.f32.xlu0 %v43_v10  ;;  %47 = vadd.xlane.f32.xlu1 %v46_v11 }
   0xf   :  { %50 = vadd.xlane.f32.xlu0 %v49_v14  ;;  %53 = vadd.xlane.f32.xlu1 %v52_v15 }
  0x13   :  { %56 = vadd.xlane.f32.xlu0 %v55_v18  ;;  %59 = vadd.xlane.f32.xlu1 %v58_v19 }
  0x17   :  { %62 = vadd.xlane.f32.xlu0 %v61_v22  ;;  %65 = vadd.xlane.f32.xlu1 %v64_v23 }
  0x1b   :  { %68 = vadd.xlane.f32.xlu0 %v67_v26  ;;  %71 = vadd.xlane.f32.xlu1 %v70_v27 }
  0x1f   :  { %74 = vadd.xlane.f32.xlu0 %v73_v30  ;;  %77 = vadd.xlane.f32.xlu1 %v76_v31 }
  0x90   :  { %v33_v32 = vpop.xlane.xlu0 %32  ;;  %v39_v33 = vpop.xlane.xlu1 %38 }
  0x91   :  { %v80_v34 = vmul.f32 0.125, %v33_v32  ;;  %v82_v35 = vmul.f32 0.125, %v39_v33 }
  0x93   :  { %v566_v36 = vsub.f32 %v14_v0, %v80_v34  ;;  %v568_v37 = vsub.f32 %v16_v1, %v82_v35 }
  0x94   :  { %v36_v38 = vpop.xlane.xlu0 %35  ;;  %v42_v39 = vpop.xlane.xlu1 %41 }
  0x95   :  { %v81_v40 = vmul.f32 0.125, %v36_v38  ;;  %v83_v41 = vmul.f32 0.125, %v42_v39  ;;  %v112_v42 = vmul.f32 %v566_v36, %v566_v36  ;;  %v114_v43 = vmul.f32 %v568_v37, %v568_v37 }
  0x97   :  { %v574_v44 = vsub.f32 %v15_v2, %v81_v40  ;;  %v576_v45 = vsub.f32 %v17_v5, %v83_v41  ;;  %v128_v46 = vsel %vm30_vm0, %v112_v42, 0.0  ;;  %v134_v49 = vsel %vm30_vm0, %v114_v43, 0.0 }
  0x98   :  { %129 = vadd.xlane.f32.xlu0 %v128_v46  ;;  %v45_v47 = vpop.xlane.xlu0 %44  ;;  %v48_v48 = vpop.xlane.xlu1 %47 }
  0x99   :  { %v84_v50 = vmul.f32 0.125, %v45_v47  ;;  %v85_v51 = vmul.f32 0.125, %v48_v48  ;;  %v113_v52 = vmul.f32 %v574_v44, %v574_v44  ;;  %v115_v53 = vmul.f32 %v576_v45, %v576_v45 }
  0x9b   :  { %v584_v54 = vsub.f32 %v18_v8, %v84_v50  ;;  %v586_v55 = vsub.f32 %v19_v9, %v85_v51  ;;  %v131_v56 = vsel %vm30_vm0, %v113_v52, 0.0  ;;  %v137_v59 = vsel %vm30_vm0, %v115_v53, 0.0 }
  0x9c   :  { %135 = vadd.xlane.f32.xlu0 %v134_v49  ;;  %132 = vadd.xlane.f32.xlu1 %v131_v56  ;;  %v51_v57 = vpop.xlane.xlu0 %50  ;;  %v54_v58 = vpop.xlane.xlu1 %53 }
  0x9d   :  { %v86_v60 = vmul.f32 0.125, %v51_v57  ;;  %v87_v61 = vmul.f32 0.125, %v54_v58  ;;  %v116_v62 = vmul.f32 %v584_v54, %v584_v54  ;;  %v117_v63 = vmul.f32 %v586_v55, %v586_v55 }
  0x9f   :  { %v595_v0 = vsub.f32 %v499_v12, %v86_v60  ;;  %v598_v1 = vsub.f32 %v504_v13, %v87_v61  ;;  %v140_v2 = vsel %vm30_vm0, %v116_v62, 0.0  ;;  %v143_v5 = vsel %vm30_vm0, %v117_v63, 0.0 }
  0xa0   :  { %138 = vadd.xlane.f32.xlu1 %v137_v59  ;;  %141 = vadd.xlane.f32.xlu0 %v140_v2  ;;  %v57_v3 = vpop.xlane.xlu0 %56  ;;  %v60_v4 = vpop.xlane.xlu1 %59 }
  0xa1   :  { %v88_v6 = vmul.f32 0.125, %v57_v3  ;;  %v89_v7 = vmul.f32 0.125, %v60_v4  ;;  %v118_v8 = vmul.f32 %v595_v0, %v595_v0  ;;  %v119_v9 = vmul.f32 %v598_v1, %v598_v1 }
  0xa3   :  { %v607_v10 = vsub.f32 %v513_v16, %v88_v6  ;;  %v610_v11 = vsub.f32 %v518_v17, %v89_v7  ;;  %v146_v12 = vsel %vm30_vm0, %v118_v8, 0.0  ;;  %v149_v15 = vsel %vm30_vm0, %v119_v9, 0.0 }
  0xa4   :  { %144 = vadd.xlane.f32.xlu1 %v143_v5  ;;  %147 = vadd.xlane.f32.xlu0 %v146_v12  ;;  %v63_v13 = vpop.xlane.xlu0 %62  ;;  %v66_v14 = vpop.xlane.xlu1 %65 }
  0xa5   :  { %v90_v18 = vmul.f32 0.125, %v63_v13  ;;  %v91_v19 = vmul.f32 0.125, %v66_v14  ;;  %v120_v22 = vmul.f32 %v607_v10, %v607_v10  ;;  %v121_v16 = vmul.f32 %v610_v11, %v610_v11  ;;  %v659_v14 = vld [vmem:[%s819_s1] ss:$0 sm:$0xff] }
  0xa7   :  { %v619_v23 = vsub.f32 %v527_v20, %v90_v18  ;;  %v622_v17 = vsub.f32 %v532_v21, %v91_v19  ;;  %v152_v26 = vsel %vm30_vm0, %v120_v22, 0.0  ;;  %v155_v31 = vsel %vm30_vm0, %v121_v16, 0.0 }
  0xa8   :  { %150 = vadd.xlane.f32.xlu1 %v149_v15  ;;  %153 = vadd.xlane.f32.xlu0 %v152_v26  ;;  %v69_v27 = vpop.xlane.xlu0 %68  ;;  %v72_v30 = vpop.xlane.xlu1 %71  ;;  %v665_v26 = vld [vmem:[%s820_s2] ss:$0 sm:$0xff] }
  0xa9   :  { %v92_v32 = vmul.f32 0.125, %v69_v27  ;;  %v93_v33 = vmul.f32 0.125, %v72_v30  ;;  %v122_v34 = vmul.f32 %v619_v23, %v619_v23  ;;  %v123_v20 = vmul.f32 %v622_v17, %v622_v17 }
  0xab   :  { %v631_v35 = vsub.f32 %v541_v24, %v92_v32  ;;  %v634_v21 = vsub.f32 %v546_v25, %v93_v33  ;;  %v158_v38 = vsel %vm30_vm0, %v122_v34, 0.0  ;;  %v161_v41 = vsel %vm30_vm0, %v123_v20, 0.0 }
  0xac   :  { %156 = vadd.xlane.f32.xlu1 %v155_v31  ;;  %159 = vadd.xlane.f32.xlu0 %v158_v38  ;;  %v75_v39 = vpop.xlane.xlu0 %74  ;;  %v78_v40 = vpop.xlane.xlu1 %77 }
  0xad   :  { %v94_v42 = vmul.f32 0.125, %v75_v39  ;;  %v95_v43 = vmul.f32 0.125, %v78_v40  ;;  %v124_v46 = vmul.f32 %v631_v35, %v631_v35  ;;  %v125_v24 = vmul.f32 %v634_v21, %v634_v21 }
  0xaf   :  { %v643_v47 = vsub.f32 %v555_v28, %v94_v42  ;;  %v646_v25 = vsub.f32 %v560_v29, %v95_v43  ;;  %v164_v48 = vsel %vm30_vm0, %v124_v46, 0.0  ;;  %v167_v49 = vsel %vm30_vm0, %v125_v24, 0.0 }
  0xb0   :  { %162 = vadd.xlane.f32.xlu1 %v161_v41  ;;  %165 = vadd.xlane.f32.xlu0 %v164_v48 }
  0xb1   :  { %v126_v50 = vmul.f32 %v643_v47, %v643_v47  ;;  %v127_v51 = vmul.f32 %v646_v25, %v646_v25 }
  0xb3   :  { %v170_v52 = vsel %vm30_vm0, %v126_v50, 0.0  ;;  %v173_v28 = vsel %vm30_vm0, %v127_v51, 0.0 }
  0xb4   :  { %168 = vadd.xlane.f32.xlu1 %v167_v49  ;;  %171 = vadd.xlane.f32.xlu0 %v170_v52 }
  0xb8   :  { %174 = vadd.xlane.f32.xlu1 %v173_v28 }
 0x125   :  { %v130_v29 = vpop.xlane.xlu0 %129 }
 0x126   :  { %v176_v53 = vmul.f32 0.125, %v130_v29 }
 0x128   :  { %v192_v56 = vadd.f32 1e-05, %v176_v53 }
 0x129   :  { %v133_v57 = vpop.xlane.xlu1 %132  ;;  %v136_v58 = vpop.xlane.xlu0 %135 }
 0x12a   :  { %388 = vrsqrt.f32 %v192_v56  ;;  %v177_v59 = vmul.f32 0.125, %v133_v57  ;;  %v178_v60 = vmul.f32 0.125, %v136_v58 }
 0x12c   :  { %v193_v61 = vadd.f32 1e-05, %v177_v59  ;;  %v194_v62 = vadd.f32 1e-05, %v178_v60 }
 0x12d   :  { %v139_v63 = vpop.xlane.xlu1 %138  ;;  %v142_v2 = vpop.xlane.xlu0 %141 }
 0x12e   :  { %390 = vrsqrt.f32 %v193_v61  ;;  %v179_v3 = vmul.f32 0.125, %v139_v63  ;;  %v180_v4 = vmul.f32 0.125, %v142_v2 }
 0x12f   :  { %392 = vrsqrt.f32 %v194_v62 }
 0x130   :  { %v195_v5 = vadd.f32 1e-05, %v179_v3  ;;  %v196_v6 = vadd.f32 1e-05, %v180_v4 }
 0x131   :  { %v145_v7 = vpop.xlane.xlu1 %144  ;;  %v148_v8 = vpop.xlane.xlu0 %147 }
 0x132   :  { %394 = vrsqrt.f32 %v195_v5  ;;  %v181_v9 = vmul.f32 0.125, %v145_v7  ;;  %v182_v12 = vmul.f32 0.125, %v148_v8 }
 0x133   :  { %396 = vrsqrt.f32 %v196_v6 }
 0x134   :  { %v389_v13 = vpop.eup %388  ;;  %v197_v15 = vadd.f32 1e-05, %v181_v9  ;;  %v198_v18 = vadd.f32 1e-05, %v182_v12 }
 0x135   :  { %v224_v19 = vmul.f32 %v389_v13, %v566_v36  ;;  %v151_v22 = vpop.xlane.xlu1 %150  ;;  %v154_v16 = vpop.xlane.xlu0 %153 }
 0x136   :  { %398 = vrsqrt.f32 %v197_v15  ;;  %v183_v27 = vmul.f32 0.125, %v151_v22  ;;  %v184_v30 = vmul.f32 0.125, %v154_v16 }
 0x137   :  { %v247_v31 = vmul.f32 %v659_v14, %v224_v19  ;;  %400 = vrsqrt.f32 %v198_v18 }
 0x138   :  { %v391_v32 = vpop.eup %390  ;;  %v199_v33 = vadd.f32 1e-05, %v183_v27  ;;  %v200_v34 = vadd.f32 1e-05, %v184_v30 }
 0x139   :  { %v393_v20 = vpop.eup %392  ;;  %v669_v38 = vadd.f32 %v665_v26, %v247_v31  ;;  %v225_v36 = vmul.f32 %v391_v32, %v574_v44  ;;  %v157_v39 = vpop.xlane.xlu1 %156 }
 0x13a   :  { %v160_v40 = vpop.xlane.xlu0 %159  ;;  %v226_v41 = vmul.f32 %v393_v20, %v568_v37  ;;  %402 = vrsqrt.f32 %v199_v33  ;;  %v185_v42 = vmul.f32 0.125, %v157_v39 }
 0x13b   :  { %v186_v43 = vmul.f32 0.125, %v160_v40  ;;  %v302_v46 = vmul.f32 0.70710677, %v669_v38  ;;  %v248_v24 = vmul.f32 %v659_v14, %v225_v36  ;;  %404 = vrsqrt.f32 %v200_v34 }
 0x13c   :  { %v395_v48 = vpop.eup %394  ;;  %v249_v49 = vmul.f32 %v659_v14, %v226_v41  ;;  %v201_v50 = vadd.f32 1e-05, %v185_v42  ;;  %v286_v36 = vmul.f32 0.5, %v669_v38 }
 0x13d   :  { %v202_v51 = vadd.f32 1e-05, %v186_v43  ;;  %v397_v52 = vpop.eup %396  ;;  %406 = verf.f32 %v302_v46  ;;  %v271_v44 = vadd.f32 %v665_v26, %v248_v24  ;;  %v227_v28 = vmul.f32 %v395_v48, %v576_v45  ;;  %v163_v37 = vpop.xlane.xlu1 %162 }
 0x13e   :  { %v679_v29 = vadd.f32 %v665_v26, %v249_v49  ;;  %v228_v53 = vmul.f32 %v397_v52, %v584_v54  ;;  %408 = vrsqrt.f32 %v201_v50  ;;  %v187_v56 = vmul.f32 0.125, %v163_v37  ;;  %v166_v57 = vpop.xlane.xlu0 %165 }
 0x13f   :  { %v303_v58 = vmul.f32 0.70710677, %v271_v44  ;;  %v250_v59 = vmul.f32 %v659_v14, %v227_v28  ;;  %410 = vrsqrt.f32 %v202_v51  ;;  %v188_v3 = vmul.f32 0.125, %v166_v57 }
 0x140   :  { %v399_v60 = vpop.eup %398  ;;  %v304_v61 = vmul.f32 0.70710677, %v679_v29  ;;  %v251_v62 = vmul.f32 %v659_v14, %v228_v53  ;;  %v203_v63 = vadd.f32 1e-05, %v187_v56  ;;  %v287_v42 = vmul.f32 0.5, %v271_v44 }
 0x141   :  { %v401_v45 = vpop.eup %400  ;;  %412 = verf.f32 %v303_v58  ;;  %v686_v2 = vadd.f32 %v665_v26, %v250_v59  ;;  %v229_v54 = vmul.f32 %v399_v60, %v586_v55  ;;  %v169_v4 = vpop.xlane.xlu1 %168  ;;  %v204_v55 = vadd.f32 1e-05, %v188_v3 }
 0x142   :  { %414 = verf.f32 %v304_v61  ;;  %v690_v5 = vadd.f32 %v665_v26, %v251_v62  ;;  %v230_v6 = vmul.f32 %v401_v45, %v595_v0  ;;  %v189_v7 = vmul.f32 0.125, %v169_v4  ;;  %v172_v18 = vpop.xlane.xlu0 %171 }
 0x143   :  { %v305_v8 = vmul.f32 0.70710677, %v686_v2  ;;  %v252_v9 = vmul.f32 %v659_v14, %v229_v54  ;;  %416 = vrsqrt.f32 %v203_v63  ;;  %v190_v34 = vmul.f32 0.125, %v172_v18 }
 0x144   :  { %v403_v12 = vpop.eup %402  ;;  %v306_v13 = vmul.f32 0.70710677, %v690_v5  ;;  %v253_v15 = vmul.f32 %v659_v14, %v230_v6  ;;  %v205_v30 = vadd.f32 1e-05, %v189_v7  ;;  %v288_v28 = vmul.f32 0.5, %v679_v29 }
 0x145   :  { %v405_v19 = vpop.eup %404  ;;  %418 = verf.f32 %v305_v8  ;;  %v698_v22 = vadd.f32 %v665_v26, %v252_v9  ;;  %v231_v0 = vmul.f32 %v403_v12, %v598_v1  ;;  %v175_v48 = vpop.xlane.xlu1 %174  ;;  %v206_v52 = vadd.f32 1e-05, %v190_v34 }
 0x146   :  { %420 = verf.f32 %v306_v13  ;;  %v702_v16 = vadd.f32 %v665_v26, %v253_v15  ;;  %v232_v27 = vmul.f32 %v405_v19, %v607_v10  ;;  %v191_v58 = vmul.f32 0.125, %v175_v48 }
 0x147   :  { %v407_v31 = vpop.eup %406  ;;  %v307_v32 = vmul.f32 0.70710677, %v698_v22  ;;  %v254_v33 = vmul.f32 %v659_v14, %v231_v0  ;;  %422 = vrsqrt.f32 %v204_v55  ;;  %v289_v54 = vmul.f32 0.5, %v686_v2 }
 0x148   :  { %v409_v20 = vpop.eup %408  ;;  %v334_v39 = vadd.f32 1.0, %v407_v31  ;;  %v308_v1 = vmul.f32 0.70710677, %v702_v16  ;;  %v255_v40 = vmul.f32 %v659_v14, %v232_v27  ;;  %v207_v9 = vadd.f32 1e-05, %v191_v58 }
 0x149   :  { %v411_v41 = vpop.eup %410  ;;  %424 = verf.f32 %v307_v32  ;;  %v711_v10 = vadd.f32 %v665_v26, %v254_v33  ;;  %v233_v43 = vmul.f32 %v409_v20, %v610_v11 }
 0x14a   :  { %v350_v46 = vmul.f32 %v334_v39, %v286_v36  ;;  %426 = verf.f32 %v308_v1  ;;  %v715_v24 = vadd.f32 %v665_v26, %v255_v40  ;;  %v234_v38 = vmul.f32 %v411_v41, %v619_v23 }
 0x14b   :  { %v413_v49 = vpop.eup %412  ;;  %v309_v50 = vmul.f32 0.70710677, %v711_v10  ;;  %v256_v51 = vmul.f32 %v659_v14, %v233_v43  ;;  %428 = vrsqrt.f32 %v205_v30  ;;  %v293_v39 = vmul.f32 0.5, %v711_v10 }
 0x14c   :  { %v415_v44 = vpop.eup %414  ;;  %366 = vst.msk [vmem:[%s821_s3] sm:$0xff] %vm30_vm0, %v350_v46  ;;  %v335_v11 = vadd.f32 1.0, %v413_v49  ;;  %v310_v37 = vmul.f32 0.70710677, %v715_v24  ;;  %v257_v23 = vmul.f32 %v659_v14, %v234_v38 }
 0x14d   :  { %v417_v53 = vpop.eup %416  ;;  %v336_v56 = vadd.f32 1.0, %v415_v44  ;;  %430 = verf.f32 %v309_v50  ;;  %v728_v57 = vadd.f32 %v665_v26, %v256_v51 }
 0x14e   :  { %v351_v59 = vmul.f32 %v335_v11, %v287_v42  ;;  %432 = verf.f32 %v310_v37  ;;  %v731_v60 = vadd.f32 %v665_v26, %v257_v23  ;;  %v235_v61 = vmul.f32 %v417_v53, %v622_v17 }
 0x14f   :  { %v419_v62 = vpop.eup %418  ;;  %v352_v29 = vmul.f32 %v336_v56, %v288_v28  ;;  %v311_v63 = vmul.f32 0.70710677, %v728_v57  ;;  %434 = vrsqrt.f32 %v206_v52  ;;  %v290_v17 = vmul.f32 0.5, %v690_v5 }
 0x150   :  { %v421_v45 = vpop.eup %420  ;;  %367 = vst.msk [vmem:[%s821_s3 + $0x8] sm:$0xff] %vm30_vm0, %v351_v59  ;;  %v337_v3 = vadd.f32 1.0, %v419_v62  ;;  %v312_v4 = vmul.f32 0.70710677, %v731_v60  ;;  %v258_v6 = vmul.f32 %v659_v14, %v235_v61  ;;  %v291_v5 = vmul.f32 0.5, %v698_v22 }
 0x151   :  { %v423_v7 = vpop.eup %422  ;;  %368 = vst.msk [vmem:[%s821_s3 + $0x10] sm:$0xff] %vm30_vm0, %v352_v29  ;;  %v338_v8 = vadd.f32 1.0, %v421_v45  ;;  %436 = verf.f32 %v311_v63  ;;  %v295_v50 = vmul.f32 0.5, %v728_v57 }
 0x152   :  { %v353_v12 = vmul.f32 %v337_v3, %v289_v54  ;;  %438 = verf.f32 %v312_v4  ;;  %v281_v2 = vadd.f32 %v665_v26, %v258_v6  ;;  %v236_v13 = vmul.f32 %v423_v7, %v631_v35 }
 0x153   :  { %v425_v15 = vpop.eup %424  ;;  %v354_v55 = vmul.f32 %v338_v8, %v290_v17  ;;  %440 = vrsqrt.f32 %v207_v9  ;;  %v292_v35 = vmul.f32 0.5, %v702_v16 }
 0x154   :  { %v427_v18 = vpop.eup %426  ;;  %369 = vst.msk [vmem:[%s821_s3 + $0x18] sm:$0xff] %vm30_vm0, %v353_v12  ;;  %v339_v19 = vadd.f32 1.0, %v425_v15  ;;  %v313_v0 = vmul.f32 0.70710677, %v281_v2  ;;  %v259_v27 = vmul.f32 %v659_v14, %v236_v13  ;;  %v297_v59 = vmul.f32 0.5, %v281_v2 }
 0x155   :  { %v429_v30 = vpop.eup %428  ;;  %370 = vst.msk [vmem:[%s821_s3 + $0x20] sm:$0xff] %vm30_vm0, %v354_v55  ;;  %v340_v31 = vadd.f32 1.0, %v427_v18 }
 0x156   :  { %v355_v32 = vmul.f32 %v339_v19, %v291_v5  ;;  %442 = verf.f32 %v313_v0  ;;  %v282_v33 = vadd.f32 %v665_v26, %v259_v27  ;;  %v237_v34 = vmul.f32 %v429_v30, %v634_v21 }
 0x157   :  { %v431_v22 = vpop.eup %430  ;;  %v356_v20 = vmul.f32 %v340_v31, %v292_v35  ;;  %v294_v21 = vmul.f32 0.5, %v715_v24 }
 0x158   :  { %v433_v36 = vpop.eup %432  ;;  %371 = vst.msk [vmem:[%s821_s3 + $0x28] sm:$0xff] %vm30_vm0, %v355_v32  ;;  %v341_v1 = vadd.f32 1.0, %v431_v22  ;;  %v314_v40 = vmul.f32 0.70710677, %v282_v33  ;;  %v260_v16 = vmul.f32 %v659_v14, %v237_v34  ;;  %v298_v63 = vmul.f32 0.5, %v282_v33 }
 0x159   :  { %v435_v41 = vpop.eup %434  ;;  %372 = vst.msk [vmem:[%s821_s3 + $0x30] sm:$0xff] %vm30_vm0, %v356_v20  ;;  %v342_v42 = vadd.f32 1.0, %v433_v36 }
 0x15a   :  { %v357_v43 = vmul.f32 %v341_v1, %v293_v39  ;;  %444 = verf.f32 %v314_v40  ;;  %v283_v46 = vadd.f32 %v665_v26, %v260_v16  ;;  %v238_v38 = vmul.f32 %v435_v41, %v643_v47 }
 0x15b   :  { %v437_v10 = vpop.eup %436  ;;  %v358_v48 = vmul.f32 %v342_v42, %v294_v21  ;;  %v296_v47 = vmul.f32 0.5, %v731_v60 }
 0x15c   :  { %v439_v49 = vpop.eup %438  ;;  %373 = vst.msk [vmem:[%s821_s3 + $0x38] sm:$0xff] %vm30_vm0, %v357_v43  ;;  %v343_v51 = vadd.f32 1.0, %v437_v10  ;;  %v315_v52 = vmul.f32 0.70710677, %v283_v46  ;;  %v261_v24 = vmul.f32 %v659_v14, %v238_v38  ;;  %v299_v3 = vmul.f32 0.5, %v283_v46 }
 0x15d   :  { %v441_v44 = vpop.eup %440  ;;  %374 = vst.msk [vmem:[%s821_s3 + $0x40] sm:$0xff] %vm30_vm0, %v358_v48  ;;  %v344_v11 = vadd.f32 1.0, %v439_v49 }
 0x15e   :  { %v359_v28 = vmul.f32 %v343_v51, %v295_v50  ;;  %446 = verf.f32 %v315_v52  ;;  %v284_v37 = vadd.f32 %v665_v26, %v261_v24  ;;  %v239_v23 = vmul.f32 %v441_v44, %v646_v25 }
 0x15f   :  { %v360_v53 = vmul.f32 %v344_v11, %v296_v47 }
 0x160   :  { %v443_v56 = vpop.eup %442  ;;  %375 = vst.msk [vmem:[%s821_s3 + $0x48] sm:$0xff] %vm30_vm0, %v359_v28  ;;  %v316_v57 = vmul.f32 0.70710677, %v284_v37  ;;  %v262_v58 = vmul.f32 %v659_v14, %v239_v23  ;;  %v300_v7 = vmul.f32 0.5, %v284_v37 }
 0x161   :  { %376 = vst.msk [vmem:[%s821_s3 + $0x50] sm:$0xff] %vm30_vm0, %v360_v53  ;;  %v345_v60 = vadd.f32 1.0, %v443_v56 }
 0x162   :  { %448 = verf.f32 %v316_v57  ;;  %v285_v25 = vadd.f32 %v665_v26, %v262_v58 }
 0x163   :  { %v361_v61 = vmul.f32 %v345_v60, %v297_v59 }
 0x164   :  { %v445_v62 = vpop.eup %444  ;;  %v317_v29 = vmul.f32 0.70710677, %v285_v25  ;;  %v301_v12 = vmul.f32 0.5, %v285_v25 }
 0x165   :  { %377 = vst.msk [vmem:[%s821_s3 + $0x58] sm:$0xff] %vm30_vm0, %v361_v61  ;;  %v346_v14 = vadd.f32 1.0, %v445_v62 }
 0x166   :  { %450 = verf.f32 %v317_v29 }
 0x167   :  { %v362_v45 = vmul.f32 %v346_v14, %v298_v63 }
 0x168   :  { %v447_v54 = vpop.eup %446 }
 0x169   :  { %378 = vst.msk [vmem:[%s821_s3 + $0x60] sm:$0xff] %vm30_vm0, %v362_v45  ;;  %v347_v26 = vadd.f32 1.0, %v447_v54 }
 0x16b   :  { %v363_v4 = vmul.f32 %v347_v26, %v299_v3 }
 0x16c   :  { %v449_v6 = vpop.eup %448 }
 0x16d   :  { %379 = vst.msk [vmem:[%s821_s3 + $0x68] sm:$0xff] %vm30_vm0, %v363_v4  ;;  %v348_v17 = vadd.f32 1.0, %v449_v6 }
 0x16f   :  { %v364_v8 = vmul.f32 %v348_v17, %v300_v7 }
 0x170   :  { %v451_v9 = vpop.eup %450 }
 0x171   :  { %380 = vst.msk [vmem:[%s821_s3 + $0x70] sm:$0xff] %vm30_vm0, %v364_v8  ;;  %v349_v2 = vadd.f32 1.0, %v451_v9 }
 0x173   :  { %v365_v13 = vmul.f32 %v349_v2, %v301_v12 }
 0x175   :  { %381 = vst.msk [vmem:[%s821_s3 + $0x78] sm:$0xff] %vm30_vm0, %v365_v13 }

// kernel: forward.17
= control target key start
LH: loop header
LB: loop body
LE: loop exit
PB: predicated region body
PF: predicated region fallthrough
CT: control target
= control target key end

     0   :  { %vm24_vm0 = vcmask 58368   ;;  %vm66_vm1 = vcmask 1043456   ;;  %v132_v7 = vmov 0.0   ;;  %vm133_vm2 = vmmov 0   ;;  %s182_s0 = inlined_call_operand.vmem [shape: f32[2,8], index: 0, kind: input, shape index: {}]   ;;  %s183_s3 = inlined_call_operand.vmem [shape: bf16[8,20], index: 3, kind: input, shape index: {}]   ;;  %s184_s1 = inlined_call_operand.vmem [shape: f32[1,8], index: 1, kind: input, shape index: {}]   ;;  %s185_s2 = inlined_call_operand.vmem [shape: f32[1,8], index: 2, kind: input, shape index: {}]   ;;  %s186_s4 = inlined_call_operand.vmem [shape: f32[1,20], index: 4, kind: input, shape index: {}]   ;;  %s187_s5 = inlined_call_operand.vmem [shape: f32[2,20], index: 5, kind: output, shape index: {}]  }
   0x1   :  { %v21_v0 = vld [vmem:[%s182_s0] sm:$0x3]  ;;  %122 = vmatprep.subr.bf16.mxu0 %v132_v7  ;;  %124 = vmatprep.mubr.msk.bf16.mxu0 %vm133_vm2, %v132_v7  ;;  %vm62_vm3 = vcmask 64512   ;;  %vm110_vm4 = vcmask 156672  }
   0x2   :  { %v25_v1 = vsel %vm24_vm0, %v21_v0, 0.0  ;;  %v54_v8 = vld [vmem:[%s183_s3] sm:$0xf] }
   0x3   :  { %26 = vadd.xlane.f32.xlu0 %v25_v1  ;;  %v68_v9 = vsel %vm66_vm1, %v54_v8, 0  ;;  %v116_v14 = vld [vmem:[%s184_s1] ss:$0 sm:$0xff] }
   0x4   :  { %123 = vmatpush3.bf16.msra.mxu0 %v68_v9  ;;  %v117_v16 = vld [vmem:[%s185_s2] ss:$0 sm:$0xff] }
   0x5   :  { %v118_v20 = vld [vmem:[%s186_s4] ss:$0 sm:$0xff] }
  0x90   :  { %v27_v2 = vpop.xlane.xlu0 %26 }
  0x91   :  { %v29_v3 = vmul.f32 0.125, %v27_v2 }
  0x93   :  { %v30_v4 = vsub.f32 %v21_v0, %v29_v3 }
  0x95   :  { %v31_v5 = vmul.f32 %v30_v4, %v30_v4 }
  0x97   :  { %v32_v6 = vsel %vm24_vm0, %v31_v5, 0.0 }
  0x98   :  { %33 = vadd.xlane.f32.xlu0 %v32_v6 }
 0x125   :  { %v34_v10 = vpop.xlane.xlu0 %33 }
 0x126   :  { %v35_v11 = vmul.f32 0.125, %v34_v10 }
 0x128   :  { %v36_v12 = vadd.f32 1e-05, %v35_v11 }
 0x12a   :  { %130 = vrsqrt.f32 %v36_v12 }
 0x134   :  { %v131_v13 = vpop.eup %130 }
 0x135   :  { %v38_v15 = vmul.f32 %v131_v13, %v30_v4 }
 0x137   :  { %v45_v17 = vmul.f32 %v116_v14, %v38_v15 }
 0x139   :  { %v52_v18 = vadd.f32 %v117_v16, %v45_v17 }
 0x13b   :  { %v53_v19 = vpack.c.bf16 %v52_v18, %v52_v18 }
 0x13d   :  { %125 = vmatmul.mubr.msk.bf16.vlgmr.msra.gmra.mrb[0].mxu0 %vm62_vm3, %v53_v19 }
 0x210   :  { %v104_v21 = vpop.f32.mrb[0].mxu0 }
 0x211   :  { %v105_v22 = vadd.f32 %v118_v20, %v104_v21  ;;  %v126_v23 = vpop.f32.mrb[1].mxu0 }
 0x212   :  { %v107_v24 = vpop.f32.mrb[2].mxu0 }
 0x213   :  { %111 = vst.msk [vmem:[%s187_s5] sm:$0x3] %vm110_vm4, %v105_v22  ;;  %v127_v25 = vpop.f32.mrb[3].mxu0 }

// kernel: forward.11
= control target key start
LH: loop header
LB: loop body
LE: loop exit
PB: predicated region body
PF: predicated region fallthrough
CT: control target
= control target key end

     0   :  { %vm58_vm0 = vcmask 64512   ;;  %vm624_vm1 = vcmask 1043456   ;;  %vm917_vm2 = vcmask 60416   ;;  %s1422_s24 = smov 120   ;;  %s1423_s16 = smov 112   ;;  %s2565_s0 = inlined_call_operand.vmem [shape: f32[256,8], index: 0, kind: input, shape index: {}]   ;;  %s2566_s3 = inlined_call_operand.vmem [shape: bf16[8,24], index: 3, kind: input, shape index: {}]   ;;  %s2567_s1 = inlined_call_operand.vmem [shape: f32[1,8], index: 1, kind: input, shape index: {}]   ;;  %s2568_s2 = inlined_call_operand.vmem [shape: f32[1,8], index: 2, kind: input, shape index: {}]   ;;  %s2569_s4 = inlined_call_operand.vmem [shape: f32[1,24], index: 4, kind: input, shape index: {}]   ;;  %s2570_s5 = inlined_call_operand.vmem [shape: bf16[256,8], index: 5, kind: output, shape index: {0}]   ;;  %s2571_s6 = inlined_call_operand.vmem [shape: bf16[256,8], index: 6, kind: output, shape index: {1}]   ;;  %s2572_s7 = inlined_call_operand.vmem [shape: bf16[256,8], index: 7, kind: output, shape index: {2}]  }
   0x1   :  { %v1467_v0 = vld [vmem:[%s2565_s0] sm:$0xff]  ;;  %v1477_v2 = vld [vmem:[%s2565_s0 + $0x8] sm:$0xff]  ;;  %v1495_v8 = vld [vmem:[%s2565_s0 + $0x10] sm:$0xff] }
   0x2   :  { %v1472_v1 = vld [vmem:[%s2565_s0 + $0x80] sm:$0xff]  ;;  %v59_v3 = vsel %vm58_vm0, %v1467_v0, 0.0  ;;  %v1486_v5 = vld [vmem:[%s2565_s0 + $0x88] sm:$0xff]  ;;  %v62_v6 = vsel %vm58_vm0, %v1477_v2, 0.0  ;;  %v1500_v9 = vld [vmem:[%s2565_s0 + $0x18] sm:$0xff]  ;;  %v65_v10 = vsel %vm58_vm0, %v1495_v8, 0.0 }
   0x3   :  { %v107_v4 = vsel %vm58_vm0, %v1472_v1, 0.0  ;;  %60 = vadd.xlane.f32.xlu0 %v59_v3  ;;  %v110_v7 = vsel %vm58_vm0, %v1486_v5, 0.0  ;;  %v68_v11 = vsel %vm58_vm0, %v1500_v9, 0.0  ;;  %v1509_v12 = vld [vmem:[%s2565_s0 + $0x90] sm:$0xff]  ;;  %v1514_v13 = vld [vmem:[%s2565_s0 + $0x98] sm:$0xff]  ;;  %v1523_v16 = vld [vmem:[%s2565_s0 + $0x20] sm:$0xff] }
   0x4   :  { %108 = vadd.xlane.f32.xlu1 %v107_v4  ;;  %v113_v14 = vsel %vm58_vm0, %v1509_v12, 0.0  ;;  %v116_v15 = vsel %vm58_vm0, %v1514_v13, 0.0  ;;  %v1528_v17 = vld [vmem:[%s2565_s0 + $0x28] sm:$0xff]  ;;  %v71_v18 = vsel %vm58_vm0, %v1523_v16, 0.0  ;;  %v1537_v20 = vld [vmem:[%s2565_s0 + $0xa0] sm:$0xff]  ;;  %v1551_v24 = vld [vmem:[%s2565_s0 + $0x30] sm:$0xff] }
   0x5   :  { %v74_v19 = vsel %vm58_vm0, %v1528_v17, 0.0  ;;  %v1542_v21 = vld [vmem:[%s2565_s0 + $0xa8] sm:$0xff]  ;;  %v119_v22 = vsel %vm58_vm0, %v1537_v20, 0.0  ;;  %v1556_v25 = vld [vmem:[%s2565_s0 + $0x38] sm:$0xff]  ;;  %v77_v26 = vsel %vm58_vm0, %v1551_v24, 0.0  ;;  %v1565_v28 = vld [vmem:[%s2565_s0 + $0xb0] sm:$0xff] }
   0x6   :  { %v122_v23 = vsel %vm58_vm0, %v1542_v21, 0.0  ;;  %v80_v27 = vsel %vm58_vm0, %v1556_v25, 0.0  ;;  %v1570_v29 = vld [vmem:[%s2565_s0 + $0xb8] sm:$0xff]  ;;  %v125_v30 = vsel %vm58_vm0, %v1565_v28, 0.0  ;;  %v1579_v32 = vld [vmem:[%s2565_s0 + $0x40] sm:$0xff]  ;;  %v1584_v33 = vld [vmem:[%s2565_s0 + $0x48] sm:$0xff] }
   0x7   :  { %63 = vadd.xlane.f32.xlu0 %v62_v6  ;;  %v128_v31 = vsel %vm58_vm0, %v1570_v29, 0.0  ;;  %v83_v34 = vsel %vm58_vm0, %v1579_v32, 0.0  ;;  %v86_v35 = vsel %vm58_vm0, %v1584_v33, 0.0  ;;  %v1593_v36 = vld [vmem:[%s2565_s0 + $0xc0] sm:$0xff]  ;;  %v1598_v37 = vld [vmem:[%s2565_s0 + $0xc8] sm:$0xff]  ;;  %v1607_v40 = vld [vmem:[%s2565_s0 + $0x50] sm:$0xff] }
   0x8   :  { %111 = vadd.xlane.f32.xlu1 %v110_v7  ;;  %v131_v38 = vsel %vm58_vm0, %v1593_v36, 0.0  ;;  %v134_v39 = vsel %vm58_vm0, %v1598_v37, 0.0  ;;  %v1612_v41 = vld [vmem:[%s2565_s0 + $0x58] sm:$0xff]  ;;  %v89_v42 = vsel %vm58_vm0, %v1607_v40, 0.0  ;;  %v1621_v44 = vld [vmem:[%s2565_s0 + $0xd0] sm:$0xff]  ;;  %v1635_v48 = vld [vmem:[%s2565_s0 + $0x60] sm:$0xff] }
   0x9   :  { %v92_v43 = vsel %vm58_vm0, %v1612_v41, 0.0  ;;  %v1626_v45 = vld [vmem:[%s2565_s0 + $0xd8] sm:$0xff]  ;;  %v137_v46 = vsel %vm58_vm0, %v1621_v44, 0.0  ;;  %v1640_v49 = vld [vmem:[%s2565_s0 + $0x68] sm:$0xff]  ;;  %v95_v50 = vsel %vm58_vm0, %v1635_v48, 0.0  ;;  %v1649_v52 = vld [vmem:[%s2565_s0 + $0xe0] sm:$0xff] }
   0xa   :  { %v140_v47 = vsel %vm58_vm0, %v1626_v45, 0.0  ;;  %v98_v51 = vsel %vm58_vm0, %v1640_v49, 0.0  ;;  %v1654_v53 = vld [vmem:[%s2565_s0 + $0xe8] sm:$0xff]  ;;  %v143_v54 = vsel %vm58_vm0, %v1649_v52, 0.0  ;;  %v1663_v56 = vld [vmem:[%s2565_s0 + $0x70] sm:$0xff]  ;;  %v1668_v57 = vld [vmem:[%s2565_s0 + $0x78] sm:$0xff] }
   0xb   :  { %66 = vadd.xlane.f32.xlu0 %v65_v10  ;;  %v146_v55 = vsel %vm58_vm0, %v1654_v53, 0.0  ;;  %v101_v58 = vsel %vm58_vm0, %v1663_v56, 0.0  ;;  %v104_v59 = vsel %vm58_vm0, %v1668_v57, 0.0  ;;  %v1677_v60 = vld [vmem:[%s2565_s0 + $0xf0] sm:$0xff]  ;;  %v1682_v61 = vld [vmem:[%s2565_s0 + $0xf8] sm:$0xff] }
   0xc   :  { %69 = vadd.xlane.f32.xlu1 %v68_v11  ;;  %v149_v62 = vsel %vm58_vm0, %v1677_v60, 0.0  ;;  %v152_v63 = vsel %vm58_vm0, %v1682_v61, 0.0 }
   0xf   :  { %114 = vadd.xlane.f32.xlu0 %v113_v14 }
  0x10   :  { %117 = vadd.xlane.f32.xlu1 %v116_v15 }
  0x13   :  { %72 = vadd.xlane.f32.xlu0 %v71_v18 }
  0x14   :  { %75 = vadd.xlane.f32.xlu1 %v74_v19 }
  0x17   :  { %120 = vadd.xlane.f32.xlu0 %v119_v22 }
  0x18   :  { %123 = vadd.xlane.f32.xlu1 %v122_v23 }
  0x1b   :  { %78 = vadd.xlane.f32.xlu0 %v77_v26 }
  0x1c   :  { %81 = vadd.xlane.f32.xlu1 %v80_v27 }
  0x1f   :  { %126 = vadd.xlane.f32.xlu0 %v125_v30 }
  0x20   :  { %129 = vadd.xlane.f32.xlu1 %v128_v31 }
  0x23   :  { %84 = vadd.xlane.f32.xlu0 %v83_v34 }
  0x24   :  { %87 = vadd.xlane.f32.xlu1 %v86_v35 }
  0x27   :  { %132 = vadd.xlane.f32.xlu0 %v131_v38 }
  0x28   :  { %135 = vadd.xlane.f32.xlu1 %v134_v39 }
  0x2b   :  { %90 = vadd.xlane.f32.xlu0 %v89_v42 }
  0x2c   :  { %93 = vadd.xlane.f32.xlu1 %v92_v43 }
  0x2f   :  { %138 = vadd.xlane.f32.xlu0 %v137_v46 }
  0x30   :  { %141 = vadd.xlane.f32.xlu1 %v140_v47 }
  0x33   :  { %96 = vadd.xlane.f32.xlu0 %v95_v50 }
  0x34   :  { %99 = vadd.xlane.f32.xlu1 %v98_v51 }
  0x37   :  { %144 = vadd.xlane.f32.xlu0 %v143_v54 }
  0x38   :  { %147 = vadd.xlane.f32.xlu1 %v146_v55 }
  0x3b   :  { %102 = vadd.xlane.f32.xlu0 %v101_v58 }
  0x3c   :  { %105 = vadd.xlane.f32.xlu1 %v104_v59 }
  0x3f   :  { %150 = vadd.xlane.f32.xlu0 %v149_v62 }
  0x40   :  { %153 = vadd.xlane.f32.xlu1 %v152_v63 }
  0x90   :  { %v61_v3 = vpop.xlane.xlu0 %60 }
  0x91   :  { %v109_v4 = vpop.xlane.xlu1 %108  ;;  %v156_v6 = vmul.f32 0.125, %v61_v3 }
  0x92   :  { %v172_v7 = vmul.f32 0.125, %v109_v4 }
  0x93   :  { %v1689_v10 = vsub.f32 %v1467_v0, %v156_v6 }
  0x94   :  { %v1692_v11 = vsub.f32 %v1472_v1, %v172_v7  ;;  %v64_v14 = vpop.xlane.xlu0 %63 }
  0x95   :  { %v112_v15 = vpop.xlane.xlu1 %111  ;;  %v157_v18 = vmul.f32 0.125, %v64_v14  ;;  %v220_v22 = vmul.f32 %v1689_v10, %v1689_v10 }
  0x96   :  { %v173_v19 = vmul.f32 0.125, %v112_v15  ;;  %v236_v23 = vmul.f32 %v1692_v11, %v1692_v11 }
  0x97   :  { %v1699_v26 = vsub.f32 %v1477_v2, %v157_v18  ;;  %v252_v0 = vsel %vm58_vm0, %v220_v22, 0.0 }
  0x98   :  { %v1702_v27 = vsub.f32 %v1486_v5, %v173_v19  ;;  %253 = vadd.xlane.f32.xlu0 %v252_v0  ;;  %v67_v1 = vpop.xlane.xlu0 %66  ;;  %v300_v31 = vsel %vm58_vm0, %v236_v23, 0.0 }
  0x99   :  { %v70_v30 = vpop.xlane.xlu1 %69  ;;  %v158_v34 = vmul.f32 0.125, %v67_v1  ;;  %v221_v38 = vmul.f32 %v1699_v26, %v1699_v26 }
  0x9a   :  { %v159_v35 = vmul.f32 0.125, %v70_v30  ;;  %v237_v39 = vmul.f32 %v1702_v27, %v1702_v27 }
  0x9b   :  { %v1711_v2 = vsub.f32 %v1495_v8, %v158_v34  ;;  %v255_v42 = vsel %vm58_vm0, %v221_v38, 0.0 }
  0x9c   :  { %v1714_v5 = vsub.f32 %v1500_v9, %v159_v35  ;;  %301 = vadd.xlane.f32.xlu0 %v300_v31  ;;  %256 = vadd.xlane.f32.xlu1 %v255_v42  ;;  %v115_v43 = vpop.xlane.xlu0 %114  ;;  %v303_v47 = vsel %vm58_vm0, %v237_v39, 0.0 }
  0x9d   :  { %v118_v46 = vpop.xlane.xlu1 %117  ;;  %v174_v50 = vmul.f32 0.125, %v115_v43  ;;  %v222_v54 = vmul.f32 %v1711_v2, %v1711_v2 }
  0x9e   :  { %v175_v51 = vmul.f32 0.125, %v118_v46  ;;  %v223_v8 = vmul.f32 %v1714_v5, %v1714_v5 }
  0x9f   :  { %v1723_v55 = vsub.f32 %v1509_v12, %v174_v50  ;;  %v258_v58 = vsel %vm58_vm0, %v222_v54, 0.0 }
  0xa0   :  { %v1726_v9 = vsub.f32 %v1514_v13, %v175_v51  ;;  %304 = vadd.xlane.f32.xlu1 %v303_v47  ;;  %259 = vadd.xlane.f32.xlu0 %v258_v58  ;;  %v73_v59 = vpop.xlane.xlu0 %72  ;;  %v261_v63 = vsel %vm58_vm0, %v223_v8, 0.0 }
  0xa1   :  { %v76_v62 = vpop.xlane.xlu1 %75  ;;  %v160_v3 = vmul.f32 0.125, %v73_v59  ;;  %v238_v6 = vmul.f32 %v1723_v55, %v1723_v55 }
  0xa2   :  { %v161_v4 = vmul.f32 0.125, %v76_v62  ;;  %v239_v12 = vmul.f32 %v1726_v9, %v1726_v9 }
  0xa3   :  { %v1735_v7 = vsub.f32 %v1523_v16, %v160_v3  ;;  %v306_v14 = vsel %vm58_vm0, %v238_v6, 0.0 }
  0xa4   :  { %v1738_v13 = vsub.f32 %v1528_v17, %v161_v4  ;;  %262 = vadd.xlane.f32.xlu1 %v261_v63  ;;  %307 = vadd.xlane.f32.xlu0 %v306_v14  ;;  %v121_v15 = vpop.xlane.xlu0 %120  ;;  %v309_v19 = vsel %vm58_vm0, %v239_v12, 0.0 }
  0xa5   :  { %v124_v18 = vpop.xlane.xlu1 %123  ;;  %v176_v22 = vmul.f32 0.125, %v121_v15  ;;  %v224_v0 = vmul.f32 %v1735_v7, %v1735_v7 }
  0xa6   :  { %v177_v23 = vmul.f32 0.125, %v124_v18  ;;  %v225_v16 = vmul.f32 %v1738_v13, %v1738_v13 }
  0xa7   :  { %v1747_v1 = vsub.f32 %v1537_v20, %v176_v22  ;;  %v264_v30 = vsel %vm58_vm0, %v224_v0, 0.0 }
  0xa8   :  { %v1750_v17 = vsub.f32 %v1542_v21, %v177_v23  ;;  %310 = vadd.xlane.f32.xlu1 %v309_v19  ;;  %265 = vadd.xlane.f32.xlu0 %v264_v30  ;;  %v79_v31 = vpop.xlane.xlu0 %78  ;;  %v267_v35 = vsel %vm58_vm0, %v225_v16, 0.0 }
  0xa9   :  { %v82_v34 = vpop.xlane.xlu1 %81  ;;  %v162_v38 = vmul.f32 0.125, %v79_v31  ;;  %v240_v42 = vmul.f32 %v1747_v1, %v1747_v1 }
  0xaa   :  { %v163_v39 = vmul.f32 0.125, %v82_v34  ;;  %v241_v20 = vmul.f32 %v1750_v17, %v1750_v17 }
  0xab   :  { %v1759_v43 = vsub.f32 %v1551_v24, %v162_v38  ;;  %v312_v46 = vsel %vm58_vm0, %v240_v42, 0.0 }
  0xac   :  { %v1762_v21 = vsub.f32 %v1556_v25, %v163_v39  ;;  %268 = vadd.xlane.f32.xlu1 %v267_v35  ;;  %313 = vadd.xlane.f32.xlu0 %v312_v46  ;;  %v127_v47 = vpop.xlane.xlu0 %126  ;;  %v315_v51 = vsel %vm58_vm0, %v241_v20, 0.0 }
  0xad   :  { %v130_v50 = vpop.xlane.xlu1 %129  ;;  %v178_v54 = vmul.f32 0.125, %v127_v47  ;;  %v226_v58 = vmul.f32 %v1759_v43, %v1759_v43 }
  0xae   :  { %v179_v8 = vmul.f32 0.125, %v130_v50  ;;  %v227_v24 = vmul.f32 %v1762_v21, %v1762_v21 }
  0xaf   :  { %v1771_v59 = vsub.f32 %v1565_v28, %v178_v54  ;;  %v270_v62 = vsel %vm58_vm0, %v226_v58, 0.0 }
  0xb0   :  { %v1774_v25 = vsub.f32 %v1570_v29, %v179_v8  ;;  %316 = vadd.xlane.f32.xlu1 %v315_v51  ;;  %271 = vadd.xlane.f32.xlu0 %v270_v62  ;;  %v85_v63 = vpop.xlane.xlu0 %84  ;;  %v273_v4 = vsel %vm58_vm0, %v227_v24, 0.0 }
  0xb1   :  { %v88_v3 = vpop.xlane.xlu1 %87  ;;  %v164_v6 = vmul.f32 0.125, %v85_v63  ;;  %v242_v14 = vmul.f32 %v1771_v59, %v1771_v59 }
  0xb2   :  { %v165_v12 = vmul.f32 0.125, %v88_v3  ;;  %v243_v28 = vmul.f32 %v1774_v25, %v1774_v25 }
  0xb3   :  { %v1783_v15 = vsub.f32 %v1579_v32, %v164_v6  ;;  %v318_v18 = vsel %vm58_vm0, %v242_v14, 0.0 }
  0xb4   :  { %v1786_v29 = vsub.f32 %v1584_v33, %v165_v12  ;;  %274 = vadd.xlane.f32.xlu1 %v273_v4  ;;  %319 = vadd.xlane.f32.xlu0 %v318_v18  ;;  %v133_v19 = vpop.xlane.xlu0 %132  ;;  %v321_v23 = vsel %vm58_vm0, %v243_v28, 0.0 }
  0xb5   :  { %v136_v22 = vpop.xlane.xlu1 %135  ;;  %v180_v0 = vmul.f32 0.125, %v133_v19  ;;  %v228_v30 = vmul.f32 %v1783_v15, %v1783_v15 }
  0xb6   :  { %v181_v16 = vmul.f32 0.125, %v136_v22  ;;  %v229_v32 = vmul.f32 %v1786_v29, %v1786_v29 }
  0xb7   :  { %v1795_v31 = vsub.f32 %v1593_v36, %v180_v0  ;;  %v276_v34 = vsel %vm58_vm0, %v228_v30, 0.0 }
  0xb8   :  { %v1798_v33 = vsub.f32 %v1598_v37, %v181_v16  ;;  %322 = vadd.xlane.f32.xlu1 %v321_v23  ;;  %277 = vadd.xlane.f32.xlu0 %v276_v34  ;;  %v91_v35 = vpop.xlane.xlu0 %90  ;;  %v279_v39 = vsel %vm58_vm0, %v229_v32, 0.0 }
  0xb9   :  { %v94_v38 = vpop.xlane.xlu1 %93  ;;  %v166_v42 = vmul.f32 0.125, %v91_v35  ;;  %v244_v46 = vmul.f32 %v1795_v31, %v1795_v31 }
  0xba   :  { %v167_v20 = vmul.f32 0.125, %v94_v38  ;;  %v245_v36 = vmul.f32 %v1798_v33, %v1798_v33 }
  0xbb   :  { %v1807_v47 = vsub.f32 %v1607_v40, %v166_v42  ;;  %v324_v50 = vsel %vm58_vm0, %v244_v46, 0.0 }
  0xbc   :  { %v1810_v37 = vsub.f32 %v1612_v41, %v167_v20  ;;  %280 = vadd.xlane.f32.xlu1 %v279_v39  ;;  %325 = vadd.xlane.f32.xlu0 %v324_v50  ;;  %v139_v51 = vpop.xlane.xlu0 %138  ;;  %v327_v8 = vsel %vm58_vm0, %v245_v36, 0.0 }
  0xbd   :  { %v142_v54 = vpop.xlane.xlu1 %141  ;;  %v182_v58 = vmul.f32 0.125, %v139_v51  ;;  %v230_v62 = vmul.f32 %v1807_v47, %v1807_v47 }
  0xbe   :  { %v183_v24 = vmul.f32 0.125, %v142_v54  ;;  %v231_v40 = vmul.f32 %v1810_v37, %v1810_v37 }
  0xbf   :  { %v1819_v63 = vsub.f32 %v1621_v44, %v182_v58  ;;  %v282_v3 = vsel %vm58_vm0, %v230_v62, 0.0 }
  0xc0   :  { %v1822_v41 = vsub.f32 %v1626_v45, %v183_v24  ;;  %328 = vadd.xlane.f32.xlu1 %v327_v8  ;;  %283 = vadd.xlane.f32.xlu0 %v282_v3  ;;  %v97_v4 = vpop.xlane.xlu0 %96  ;;  %v285_v12 = vsel %vm58_vm0, %v231_v40, 0.0 }
  0xc1   :  { %v100_v6 = vpop.xlane.xlu1 %99  ;;  %v168_v14 = vmul.f32 0.125, %v97_v4  ;;  %v246_v18 = vmul.f32 %v1819_v63, %v1819_v63 }
  0xc2   :  { %v169_v28 = vmul.f32 0.125, %v100_v6  ;;  %v247_v44 = vmul.f32 %v1822_v41, %v1822_v41 }
  0xc3   :  { %v1831_v19 = vsub.f32 %v1635_v48, %v168_v14  ;;  %v330_v22 = vsel %vm58_vm0, %v246_v18, 0.0 }
  0xc4   :  { %v1834_v45 = vsub.f32 %v1640_v49, %v169_v28  ;;  %286 = vadd.xlane.f32.xlu1 %v285_v12  ;;  %331 = vadd.xlane.f32.xlu0 %v330_v22  ;;  %v145_v23 = vpop.xlane.xlu0 %144  ;;  %v333_v16 = vsel %vm58_vm0, %v247_v44, 0.0  ;;  %v568_v49 = vld [vmem:[%s2566_s3] sm:$0xf] }
  0xc5   :  { %v148_v0 = vpop.xlane.xlu1 %147  ;;  %v184_v30 = vmul.f32 0.125, %v145_v23  ;;  %v232_v34 = vmul.f32 %v1831_v19, %v1831_v19  ;;  %1354 = vmatprep.subr.msk.bf16.mxu0 %vm624_vm1, %v568_v49  ;;  %1355 = vmatprep.subr.msk.bf16.mxu1 %vm624_vm1, %v568_v49  ;;  %v626_v36 = vsel %vm624_vm1, %v568_v49, 0 }
  0xc6   :  { %v185_v32 = vmul.f32 0.125, %v148_v0  ;;  %v233_v48 = vmul.f32 %v1834_v45, %v1834_v45  ;;  %1319 = vmatpush3.bf16.msra.mxu0 %v626_v36  ;;  %1353 = vmatpush3.bf16.msra.mxu1 %v626_v36 }
  0xc7   :  { %v1846_v35 = vsub.f32 %v1649_v52, %v184_v30  ;;  %v288_v39 = vsel %vm58_vm0, %v232_v34, 0.0 }
  0xc8   :  { %v1849_v38 = vsub.f32 %v1654_v53, %v185_v32  ;;  %334 = vadd.xlane.f32.xlu1 %v333_v16  ;;  %289 = vadd.xlane.f32.xlu0 %v288_v39  ;;  %v103_v42 = vpop.xlane.xlu0 %102  ;;  %v291_v46 = vsel %vm58_vm0, %v233_v48, 0.0 }
  0xc9   :  { %v106_v20 = vpop.xlane.xlu1 %105  ;;  %v170_v50 = vmul.f32 0.125, %v103_v42  ;;  %v248_v52 = vmul.f32 %v1846_v35, %v1846_v35 }
  0xca   :  { %v171_v51 = vmul.f32 0.125, %v106_v20  ;;  %v249_v53 = vmul.f32 %v1849_v38, %v1849_v38 }
  0xcb   :  { %v1858_v54 = vsub.f32 %v1663_v56, %v170_v50  ;;  %v336_v58 = vsel %vm58_vm0, %v248_v52, 0.0 }
  0xcc   :  { %v1861_v8 = vsub.f32 %v1668_v57, %v171_v51  ;;  %292 = vadd.xlane.f32.xlu1 %v291_v46  ;;  %337 = vadd.xlane.f32.xlu0 %v336_v58  ;;  %v151_v24 = vpop.xlane.xlu0 %150  ;;  %v339_v40 = vsel %vm58_vm0, %v249_v53, 0.0 }
  0xcd   :  { %v154_v62 = vpop.xlane.xlu1 %153  ;;  %v186_v3 = vmul.f32 0.125, %v151_v24  ;;  %v234_v6 = vmul.f32 %v1858_v54, %v1858_v54 }
  0xce   :  { %v187_v4 = vmul.f32 0.125, %v154_v62  ;;  %v235_v56 = vmul.f32 %v1861_v8, %v1861_v8 }
  0xcf   :  { %v1870_v12 = vsub.f32 %v1677_v60, %v186_v3  ;;  %v294_v14 = vsel %vm58_vm0, %v234_v6, 0.0 }
  0xd0   :  { %v1873_v57 = vsub.f32 %v1682_v61, %v187_v4  ;;  %340 = vadd.xlane.f32.xlu1 %v339_v40  ;;  %295 = vadd.xlane.f32.xlu0 %v294_v14  ;;  %v297_v28 = vsel %vm58_vm0, %v235_v56, 0.0 }
  0xd1   :  { %v250_v18 = vmul.f32 %v1870_v12, %v1870_v12 }
  0xd2   :  { %v251_v44 = vmul.f32 %v1873_v57, %v1873_v57 }
  0xd3   :  { %v342_v22 = vsel %vm58_vm0, %v250_v18, 0.0 }
  0xd4   :  { %298 = vadd.xlane.f32.xlu1 %v297_v28  ;;  %343 = vadd.xlane.f32.xlu0 %v342_v22  ;;  %v345_v60 = vsel %vm58_vm0, %v251_v44, 0.0  ;;  %v1887_v28 = vld [vmem:[%s2567_s1] ss:$0 sm:$0xff] }
  0xd8   :  { %346 = vadd.xlane.f32.xlu1 %v345_v60 }
 0x125   :  { %v254_v61 = vpop.xlane.xlu0 %253 }
 0x126   :  { %v348_v23 = vmul.f32 0.125, %v254_v61 }
 0x128   :  { %v380_v0 = vadd.f32 1e-05, %v348_v23 }
 0x129   :  { %v257_v16 = vpop.xlane.xlu1 %256  ;;  %v302_v30 = vpop.xlane.xlu0 %301 }
 0x12a   :  { %1358 = vrsqrt.f32 %v380_v0  ;;  %v349_v32 = vmul.f32 0.125, %v257_v16  ;;  %v364_v34 = vmul.f32 0.125, %v302_v30 }
 0x12c   :  { %v381_v48 = vadd.f32 1e-05, %v349_v32  ;;  %v396_v49 = vadd.f32 1e-05, %v364_v34  ;;  %v1894_v32 = vld [vmem:[%s2568_s2] ss:$0 sm:$0xff] }
 0x12d   :  { %v305_v39 = vpop.xlane.xlu1 %304  ;;  %v260_v42 = vpop.xlane.xlu0 %259 }
 0x12e   :  { %1360 = vrsqrt.f32 %v381_v48  ;;  %v365_v20 = vmul.f32 0.125, %v305_v39  ;;  %v350_v46 = vmul.f32 0.125, %v260_v42 }
 0x12f   :  { %1362 = vrsqrt.f32 %v396_v49 }
 0x130   :  { %v397_v36 = vadd.f32 1e-05, %v365_v20  ;;  %v382_v50 = vadd.f32 1e-05, %v350_v46 }
 0x131   :  { %v263_v51 = vpop.xlane.xlu1 %262  ;;  %v308_v52 = vpop.xlane.xlu0 %307 }
 0x132   :  { %1364 = vrsqrt.f32 %v397_v36  ;;  %v351_v53 = vmul.f32 0.125, %v263_v51  ;;  %v366_v58 = vmul.f32 0.125, %v308_v52 }
 0x133   :  { %1366 = vrsqrt.f32 %v382_v50 }
 0x134   :  { %v1359_v24 = vpop.eup %1358  ;;  %v383_v62 = vadd.f32 1e-05, %v351_v53  ;;  %v398_v40 = vadd.f32 1e-05, %v366_v58 }
 0x135   :  { %v311_v3 = vpop.xlane.xlu1 %310  ;;  %v266_v4 = vpop.xlane.xlu0 %265  ;;  %v444_v6 = vmul.f32 %v1359_v24, %v1689_v10 }
 0x136   :  { %1368 = vrsqrt.f32 %v383_v62  ;;  %v367_v56 = vmul.f32 0.125, %v311_v3  ;;  %v352_v14 = vmul.f32 0.125, %v266_v4 }
 0x137   :  { %1370 = vrsqrt.f32 %v398_v40  ;;  %v482_v16 = vmul.f32 %v1887_v28, %v444_v6 }
 0x138   :  { %v1361_v18 = vpop.eup %1360  ;;  %v399_v44 = vadd.f32 1e-05, %v367_v56  ;;  %v384_v22 = vadd.f32 1e-05, %v352_v14 }
 0x139   :  { %v1363_v60 = vpop.eup %1362  ;;  %v269_v61 = vpop.xlane.xlu1 %268  ;;  %v445_v0 = vmul.f32 %v1361_v18, %v1699_v26  ;;  %v520_v36 = vadd.f32 %v1894_v32, %v482_v16 }
 0x13a   :  { %v314_v23 = vpop.xlane.xlu0 %313  ;;  %1372 = vrsqrt.f32 %v399_v44  ;;  %v353_v10 = vmul.f32 0.125, %v269_v61  ;;  %v460_v34 = vmul.f32 %v1363_v60, %v1692_v11 }
 0x13b   :  { %v368_v30 = vmul.f32 0.125, %v314_v23  ;;  %1374 = vrsqrt.f32 %v384_v22  ;;  %v483_v48 = vmul.f32 %v1887_v28, %v445_v0 }
 0x13c   :  { %v1365_v49 = vpop.eup %1364  ;;  %v385_v39 = vadd.f32 1e-05, %v353_v10  ;;  %v498_v52 = vmul.f32 %v1887_v28, %v460_v34 }
 0x13d   :  { %v400_v42 = vadd.f32 1e-05, %v368_v30  ;;  %v1367_v20 = vpop.eup %1366  ;;  %v317_v26 = vpop.xlane.xlu1 %316  ;;  %v521_v50 = vadd.f32 %v1894_v32, %v483_v48  ;;  %v461_v51 = vmul.f32 %v1365_v49, %v1702_v27 }
 0x13e   :  { %v272_v46 = vpop.xlane.xlu0 %271  ;;  %v446_v53 = vmul.f32 %v1367_v20, %v1711_v2  ;;  %1376 = vrsqrt.f32 %v385_v39  ;;  %v369_v11 = vmul.f32 0.125, %v317_v26  ;;  %v536_v18 = vadd.f32 %v1894_v32, %v498_v52 }
 0x13f   :  { %v354_v58 = vmul.f32 0.125, %v272_v46  ;;  %1378 = vrsqrt.f32 %v400_v42  ;;  %v552_v24 = vpack.c.bf16 %v521_v50, %v520_v36  ;;  %v499_v62 = vmul.f32 %v1887_v28, %v461_v51 }
 0x140   :  { %v1369_v40 = vpop.eup %1368  ;;  %v401_v3 = vadd.f32 1e-05, %v369_v11  ;;  %v484_v44 = vmul.f32 %v1887_v28, %v446_v53 }
 0x141   :  { %v386_v4 = vadd.f32 1e-05, %v354_v58  ;;  %v1371_v6 = vpop.eup %1370  ;;  %v447_v56 = vmul.f32 %v1369_v40, %v1714_v5  ;;  %v275_v14 = vpop.xlane.xlu1 %274  ;;  %1320 = vmatprep.mubr.msk.bf16.mxu0 %vm58_vm0, %v552_v24  ;;  %v537_v2 = vadd.f32 %v1894_v32, %v499_v62 }
 0x142   :  { %v320_v27 = vpop.xlane.xlu0 %319  ;;  %v462_v22 = vmul.f32 %v1371_v6, %v1723_v55  ;;  %1380 = vrsqrt.f32 %v401_v3  ;;  %v355_v60 = vmul.f32 0.125, %v275_v14  ;;  %v522_v39 = vadd.f32 %v1894_v32, %v484_v44 }
 0x143   :  { %v370_v61 = vmul.f32 0.125, %v320_v27  ;;  %1382 = vrsqrt.f32 %v386_v4  ;;  %v560_v23 = vpack.c.bf16 %v537_v2, %v536_v18  ;;  %v485_v0 = vmul.f32 %v1887_v28, %v447_v56 }
 0x144   :  { %v1373_v5 = vpop.eup %1372  ;;  %v387_v16 = vadd.f32 1e-05, %v355_v60  ;;  %v500_v42 = vmul.f32 %v1887_v28, %v462_v22 }
 0x145   :  { %v402_v10 = vadd.f32 1e-05, %v370_v61  ;;  %v1375_v30 = vpop.eup %1374  ;;  %v463_v34 = vmul.f32 %v1373_v5, %v1726_v9  ;;  %v323_v48 = vpop.xlane.xlu1 %322  ;;  %1336 = vmatprep.mubr.msk.bf16.mxu1 %vm58_vm0, %v560_v23  ;;  %v523_v55 = vadd.f32 %v1894_v32, %v485_v0 }
 0x146   :  { %v278_v49 = vpop.xlane.xlu0 %277  ;;  %v448_v20 = vmul.f32 %v1375_v30, %v1735_v7  ;;  %1384 = vrsqrt.f32 %v387_v16  ;;  %v371_v26 = vmul.f32 0.125, %v323_v48  ;;  %v538_v62 = vadd.f32 %v1894_v32, %v500_v42 }
 0x147   :  { %v356_v46 = vmul.f32 0.125, %v278_v49  ;;  %1386 = vrsqrt.f32 %v402_v10  ;;  %v553_v36 = vpack.c.bf16 %v523_v55, %v522_v39  ;;  %v501_v50 = vmul.f32 %v1887_v28, %v463_v34 }
 0x148   :  { %v1377_v9 = vpop.eup %1376  ;;  %v403_v51 = vadd.f32 1e-05, %v371_v26  ;;  %v486_v40 = vmul.f32 %v1887_v28, %v448_v20 }
 0x149   :  { %v388_v52 = vadd.f32 1e-05, %v356_v46  ;;  %v1379_v53 = vpop.eup %1378  ;;  %v449_v11 = vmul.f32 %v1377_v9, %v1738_v13  ;;  %v281_v58 = vpop.xlane.xlu1 %280  ;;  %1321 = vmatmul.mubr.msk.bf16.vlgmr.msra.gmra.mrb[0].mxu0 %vm58_vm0, %v553_v36  ;;  %v539_v7 = vadd.f32 %v1894_v32, %v501_v50 }
 0x14a   :  { %v326_v24 = vpop.xlane.xlu0 %325  ;;  %v464_v3 = vmul.f32 %v1379_v53, %v1747_v1  ;;  %1388 = vrsqrt.f32 %v403_v51  ;;  %v357_v4 = vmul.f32 0.125, %v281_v58  ;;  %v524_v61 = vadd.f32 %v1894_v32, %v486_v40 }
 0x14b   :  { %v372_v6 = vmul.f32 0.125, %v326_v24  ;;  %1390 = vrsqrt.f32 %v388_v52  ;;  %v561_v56 = vpack.c.bf16 %v539_v7, %v538_v62  ;;  %v487_v14 = vmul.f32 %v1887_v28, %v449_v11 }
 0x14c   :  { %v1381_v13 = vpop.eup %1380  ;;  %v389_v27 = vadd.f32 1e-05, %v357_v4  ;;  %v502_v23 = vmul.f32 %v1887_v28, %v464_v3 }
 0x14d   :  { %v404_v18 = vadd.f32 1e-05, %v372_v6  ;;  %v1383_v2 = vpop.eup %1382  ;;  %v465_v44 = vmul.f32 %v1381_v13, %v1750_v17  ;;  %v329_v22 = vpop.xlane.xlu1 %328  ;;  %1337 = vmatmul.mubr.msk.bf16.vlgmr.msra.gmra.mrb[0].mxu1 %vm58_vm0, %v561_v56  ;;  %v525_v1 = vadd.f32 %v1894_v32, %v487_v14 }
 0x14e   :  { %v284_v60 = vpop.xlane.xlu0 %283  ;;  %v450_v0 = vmul.f32 %v1383_v2, %v1759_v43  ;;  %1392 = vrsqrt.f32 %v389_v27  ;;  %v373_v5 = vmul.f32 0.125, %v329_v22  ;;  %v540_v20 = vadd.f32 %v1894_v32, %v502_v23 }
 0x14f   :  { %v358_v16 = vmul.f32 0.125, %v284_v60  ;;  %1394 = vrsqrt.f32 %v404_v18  ;;  %v554_v10 = vpack.c.bf16 %v525_v1, %v524_v61  ;;  %v503_v30 = vmul.f32 %v1887_v28, %v465_v44 }
 0x150   :  { %v1385_v17 = vpop.eup %1384  ;;  %v405_v34 = vadd.f32 1e-05, %v373_v5  ;;  %v488_v26 = vmul.f32 %v1887_v28, %v450_v0 }
 0x151   :  { %v390_v48 = vadd.f32 1e-05, %v358_v16  ;;  %v1387_v49 = vpop.eup %1386  ;;  %v451_v39 = vmul.f32 %v1385_v17, %v1762_v21  ;;  %v287_v55 = vpop.xlane.xlu1 %286  ;;  %1324 = vmatprep.mubr.msk.bf16.mxu0 %vm58_vm0, %v554_v10  ;;  %v541_v43 = vadd.f32 %v1894_v32, %v503_v30 }
 0x152   :  { %v332_v42 = vpop.xlane.xlu0 %331  ;;  %v466_v46 = vmul.f32 %v1387_v49, %v1771_v59  ;;  %1396 = vrsqrt.f32 %v405_v34  ;;  %v359_v36 = vmul.f32 0.125, %v287_v55  ;;  %v526_v7 = vadd.f32 %v1894_v32, %v488_v26 }
 0x153   :  { %v374_v50 = vmul.f32 0.125, %v332_v42  ;;  %1398 = vrsqrt.f32 %v390_v48  ;;  %v562_v9 = vpack.c.bf16 %v541_v43, %v540_v20  ;;  %v489_v51 = vmul.f32 %v1887_v28, %v451_v39 }
 0x154   :  { %v1389_v21 = vpop.eup %1388  ;;  %v391_v52 = vadd.f32 1e-05, %v359_v36  ;;  %v504_v40 = vmul.f32 %v1887_v28, %v466_v46 }
 0x155   :  { %v406_v53 = vadd.f32 1e-05, %v374_v50  ;;  %v1391_v11 = vpop.eup %1390  ;;  %v467_v58 = vmul.f32 %v1389_v21, %v1774_v25  ;;  %v335_v24 = vpop.xlane.xlu1 %334  ;;  %1340 = vmatprep.mubr.msk.bf16.mxu1 %vm58_vm0, %v562_v9  ;;  %v527_v59 = vadd.f32 %v1894_v32, %v489_v51 }
 0x156   :  { %v290_v62 = vpop.xlane.xlu0 %289  ;;  %v452_v3 = vmul.f32 %v1391_v11, %v1783_v15  ;;  %1400 = vrsqrt.f32 %v391_v52  ;;  %v375_v4 = vmul.f32 0.125, %v335_v24  ;;  %v542_v60 = vadd.f32 %v1894_v32, %v504_v40 }
 0x157   :  { %v360_v6 = vmul.f32 0.125, %v290_v62  ;;  %1402 = vrsqrt.f32 %v406_v53  ;;  %v555_v56 = vpack.c.bf16 %v527_v59, %v526_v7  ;;  %v505_v14 = vmul.f32 %v1887_v28, %v467_v58 }
 0x158   :  { %v1393_v25 = vpop.eup %1392  ;;  %v407_v13 = vadd.f32 1e-05, %v375_v4  ;;  %v490_v61 = vmul.f32 %v1887_v28, %v452_v3 }
 0x159   :  { %v392_v27 = vadd.f32 1e-05, %v360_v6  ;;  %v1395_v18 = vpop.eup %1394  ;;  %v453_v2 = vmul.f32 %v1393_v25, %v1786_v29  ;;  %v293_v44 = vpop.xlane.xlu1 %292  ;;  %1325 = vmatmul.mubr.msk.bf16.gmra.mrb[4].mxu0 %vm58_vm0, %v555_v56  ;;  %v543_v15 = vadd.f32 %v1894_v32, %v505_v14 }
 0x15a   :  { %v338_v22 = vpop.xlane.xlu0 %337  ;;  %v468_v1 = vmul.f32 %v1395_v18, %v1795_v31  ;;  %1404 = vrsqrt.f32 %v407_v13  ;;  %v361_v23 = vmul.f32 0.125, %v293_v44  ;;  %v528_v39 = vadd.f32 %v1894_v32, %v490_v61 }
 0x15b   :  { %v376_v0 = vmul.f32 0.125, %v338_v22  ;;  %1406 = vrsqrt.f32 %v392_v27  ;;  %v563_v5 = vpack.c.bf16 %v543_v15, %v542_v60  ;;  %v491_v16 = vmul.f32 %v1887_v28, %v453_v2 }
 0x15c   :  { %v1397_v29 = vpop.eup %1396  ;;  %v393_v10 = vadd.f32 1e-05, %v361_v23  ;;  %v506_v55 = vmul.f32 %v1887_v28, %v468_v1 }
 0x15d   :  { %v408_v30 = vadd.f32 1e-05, %v376_v0  ;;  %v1399_v17 = vpop.eup %1398  ;;  %v469_v34 = vmul.f32 %v1397_v29, %v1798_v33  ;;  %v341_v48 = vpop.xlane.xlu1 %340  ;;  %1341 = vmatmul.mubr.msk.bf16.gmra.mrb[4].mxu1 %vm58_vm0, %v563_v5  ;;  %v529_v31 = vadd.f32 %v1894_v32, %v491_v16 }
 0x15e   :  { %v296_v49 = vpop.xlane.xlu0 %295  ;;  %v454_v42 = vmul.f32 %v1399_v17, %v1807_v47  ;;  %1408 = vrsqrt.f32 %v393_v10  ;;  %v377_v20 = vmul.f32 0.125, %v341_v48  ;;  %v544_v53 = vadd.f32 %v1894_v32, %v506_v55 }
 0x15f   :  { %v362_v43 = vmul.f32 0.125, %v296_v49  ;;  %1410 = vrsqrt.f32 %v408_v30  ;;  %v556_v26 = vpack.c.bf16 %v529_v31, %v528_v39  ;;  %v507_v46 = vmul.f32 %v1887_v28, %v469_v34 }
 0x160   :  { %v1401_v33 = vpop.eup %1400  ;;  %v409_v36 = vadd.f32 1e-05, %v377_v20  ;;  %v492_v11 = vmul.f32 %v1887_v28, %v454_v42 }
 0x161   :  { %v394_v50 = vadd.f32 1e-05, %v362_v43  ;;  %v1403_v9 = vpop.eup %1402  ;;  %v455_v51 = vmul.f32 %v1401_v33, %v1810_v37  ;;  %v299_v21 = vpop.xlane.xlu1 %298  ;;  %1328 = vmatprep.mubr.msk.bf16.mxu0 %vm58_vm0, %v556_v26  ;;  %v545_v47 = vadd.f32 %v1894_v32, %v507_v46 }
 0x162   :  { %v344_v52 = vpop.xlane.xlu0 %343  ;;  %v470_v58 = vmul.f32 %v1403_v9, %v1819_v63  ;;  %1412 = vrsqrt.f32 %v409_v36  ;;  %v363_v24 = vmul.f32 0.125, %v299_v21  ;;  %v530_v14 = vadd.f32 %v1894_v32, %v492_v11 }
 0x163   :  { %v378_v62 = vmul.f32 0.125, %v344_v52  ;;  %1414 = vrsqrt.f32 %v394_v50  ;;  %v564_v7 = vpack.c.bf16 %v545_v47, %v544_v53  ;;  %v493_v59 = vmul.f32 %v1887_v28, %v455_v51 }
 0x164   :  { %v1405_v37 = vpop.eup %1404  ;;  %v395_v40 = vadd.f32 1e-05, %v363_v24  ;;  %v508_v25 = vmul.f32 %v1887_v28, %v470_v58 }
 0x165   :  { %v410_v3 = vadd.f32 1e-05, %v378_v62  ;;  %v1407_v4 = vpop.eup %1406  ;;  %v471_v6 = vmul.f32 %v1405_v37, %v1822_v41  ;;  %v347_v56 = vpop.xlane.xlu1 %346  ;;  %1344 = vmatprep.mubr.msk.bf16.mxu1 %vm58_vm0, %v564_v7  ;;  %v531_v63 = vadd.f32 %v1894_v32, %v493_v59 }
 0x166   :  { %v456_v13 = vmul.f32 %v1407_v4, %v1831_v19  ;;  %1416 = vrsqrt.f32 %v395_v40  ;;  %v379_v27 = vmul.f32 0.125, %v347_v56  ;;  %v546_v15 = vadd.f32 %v1894_v32, %v508_v25 }
 0x167   :  { %1418 = vrsqrt.f32 %v410_v3  ;;  %v557_v18 = vpack.c.bf16 %v531_v63, %v530_v14  ;;  %v509_v2 = vmul.f32 %v1887_v28, %v471_v6 }
 0x168   :  { %v1409_v44 = vpop.eup %1408  ;;  %v411_v22 = vadd.f32 1e-05, %v379_v27  ;;  %v494_v1 = vmul.f32 %v1887_v28, %v456_v13 }
 0x169   :  { %v1411_v41 = vpop.eup %1410  ;;  %v457_v60 = vmul.f32 %v1409_v44, %v1834_v45  ;;  %1329 = vmatmul.mubr.msk.bf16.gmra.mrb[8].mxu0 %vm58_vm0, %v557_v18  ;;  %v547_v61 = vadd.f32 %v1894_v32, %v509_v2 }
 0x16a   :  { %v472_v19 = vmul.f32 %v1411_v41, %v1846_v35  ;;  %1420 = vrsqrt.f32 %v411_v22  ;;  %v532_v45 = vadd.f32 %v1894_v32, %v494_v1 }
 0x16b   :  { %v565_v23 = vpack.c.bf16 %v547_v61, %v546_v15  ;;  %v495_v0 = vmul.f32 %v1887_v28, %v457_v60 }
 0x16c   :  { %v1413_v5 = vpop.eup %1412  ;;  %v510_v30 = vmul.f32 %v1887_v28, %v472_v19 }
 0x16d   :  { %v1415_v16 = vpop.eup %1414  ;;  %v473_v29 = vmul.f32 %v1413_v5, %v1849_v38  ;;  %1345 = vmatmul.mubr.msk.bf16.gmra.mrb[8].mxu1 %vm58_vm0, %v565_v23  ;;  %v533_v10 = vadd.f32 %v1894_v32, %v495_v0 }
 0x16e   :  { %v458_v17 = vmul.f32 %v1415_v16, %v1858_v54  ;;  %v548_v38 = vadd.f32 %v1894_v32, %v510_v30 }
 0x16f   :  { %v558_v34 = vpack.c.bf16 %v533_v10, %v532_v45  ;;  %v511_v35 = vmul.f32 %v1887_v28, %v473_v29 }
 0x170   :  { %v1417_v48 = vpop.eup %1416  ;;  %v496_v55 = vmul.f32 %v1887_v28, %v458_v17 }
 0x171   :  { %v1419_v49 = vpop.eup %1418  ;;  %v459_v39 = vmul.f32 %v1417_v48, %v1861_v8  ;;  %1332 = vmatprep.mubr.msk.bf16.mxu0 %vm58_vm0, %v558_v34  ;;  %v549_v31 = vadd.f32 %v1894_v32, %v511_v35 }
 0x172   :  { %v474_v42 = vmul.f32 %v1419_v49, %v1870_v12  ;;  %v534_v8 = vadd.f32 %v1894_v32, %v496_v55 }
 0x173   :  { %v566_v20 = vpack.c.bf16 %v549_v31, %v548_v38  ;;  %v497_v54 = vmul.f32 %v1887_v28, %v459_v39 }
 0x174   :  { %v1421_v43 = vpop.eup %1420  ;;  %v512_v33 = vmul.f32 %v1887_v28, %v474_v42 }
 0x175   :  { %v475_v26 = vmul.f32 %v1421_v43, %v1873_v57  ;;  %1348 = vmatprep.mubr.msk.bf16.mxu1 %vm58_vm0, %v566_v20  ;;  %v535_v46 = vadd.f32 %v1894_v32, %v497_v54  ;;  %v2008_v57 = vld [vmem:[%s2569_s4] ss:$0 sm:$0xff] }
 0x176   :  { %v550_v12 = vadd.f32 %v1894_v32, %v512_v33 }
 0x177   :  { %v559_v36 = vpack.c.bf16 %v535_v46, %v534_v8  ;;  %v513_v50 = vmul.f32 %v1887_v28, %v475_v26 }
 0x179   :  { %1333 = vmatmul.mubr.msk.bf16.gmra.mrb[12].mxu0 %vm58_vm0, %v559_v36  ;;  %v551_v9 = vadd.f32 %v1894_v32, %v513_v50 }
 0x17b   :  { %v567_v51 = vpack.c.bf16 %v551_v9, %v550_v12 }
 0x17d   :  { %1349 = vmatmul.mubr.msk.bf16.gmra.mrb[12].mxu1 %vm58_vm0, %v567_v51 }
 0x21c   :  { %v1322_v21 = vpop.f32.mrb[0].mxu0 }
 0x21d   :  { %v671_v52 = vadd.f32 %v1322_v21, %v2008_v57  ;;  %v662_v53 = vpop.f32.mrb[1].mxu0 }
 0x21e   :  { %v663_v28 = vadd.f32 %v2008_v57, %v662_v53  ;;  %v1323_v47 = vpop.f32.mrb[2].mxu0 }
 0x21f   :  { %v1271_v11 = vpack.c.bf16 %v671_v52, %v671_v52  ;;  %v674_v58 = vadd.f32 %v1323_v47, %v2008_v57  ;;  %v665_v32 = vpop.f32.mrb[3].mxu0 }
 0x220   :  { %v2013_v24 = vpack.c.bf16 %v663_v28, %v663_v28  ;;  %v666_v62 = vadd.f32 %v2008_v57, %v665_v32  ;;  %v1338_v7 = vpop.f32.mrb[0].mxu1 }
 0x221   :  { %920 = vst.msk [vmem:[%s2570_s5 + $0x8] sm:$0xf] %vm917_vm2, %v1271_v11  ;;  %v1272_v59 = vpack.c.bf16 %v674_v58, %v674_v58  ;;  %v735_v37 = vadd.f32 %v1338_v7, %v2008_v57  ;;  %954 = vrot.lane.b32.xlu1 %v1271_v11, %s1422_s24  ;;  %v726_v40 = vpop.f32.mrb[1].mxu1 }
 0x222   :  { %918 = vst.msk [vmem:[%s2570_s5] sm:$0xf] %vm917_vm2, %v2013_v24  ;;  %v2027_v3 = vpack.c.bf16 %v666_v62, %v666_v62  ;;  %v727_v4 = vadd.f32 %v2008_v57, %v726_v40  ;;  %v1339_v6 = vpop.f32.mrb[2].mxu1 }
 0x223   :  { %921 = vst.msk [vmem:[%s2570_s5 + $0xc] sm:$0xf] %vm917_vm2, %v1272_v59  ;;  %v1287_v56 = vpack.c.bf16 %v735_v37, %v735_v37  ;;  %v738_v14 = vadd.f32 %v1339_v6, %v2008_v57  ;;  %v729_v63 = vpop.f32.mrb[3].mxu1 }
 0x224   :  { %919 = vst.msk [vmem:[%s2570_s5 + $0x4] sm:$0xf] %vm917_vm2, %v2027_v3  ;;  %v1285_v25 = vpack.c.bf16 %v727_v4, %v727_v4  ;;  %v730_v13 = vadd.f32 %v2008_v57, %v729_v63 }
 0x225   :  { %936 = vst.msk [vmem:[%s2570_s5 + $0x48] sm:$0xf] %vm917_vm2, %v1287_v56  ;;  %v1288_v27 = vpack.c.bf16 %v738_v14, %v738_v14  ;;  %956 = vrot.lane.b32.xlu1 %v1272_v59, %s1422_s24  ;;  %986 = vrot.lane.b32.xlu0 %v1287_v56, %s1422_s24 }
 0x226   :  { %934 = vst.msk [vmem:[%s2570_s5 + $0x40] sm:$0xf] %vm917_vm2, %v1285_v25  ;;  %v1286_v18 = vpack.c.bf16 %v730_v13, %v730_v13 }
 0x227   :  { %937 = vst.msk [vmem:[%s2570_s5 + $0x4c] sm:$0xf] %vm917_vm2, %v1288_v27 }
 0x228   :  { %935 = vst.msk [vmem:[%s2570_s5 + $0x44] sm:$0xf] %vm917_vm2, %v1286_v18 }
 0x229   :  { %1082 = vrot.lane.b32.xlu0 %v1271_v11, %s1423_s16  ;;  %988 = vrot.lane.b32.xlu1 %v1288_v27, %s1422_s24 }
 0x22c   :  { %v1326_v2 = vpop.f32.mrb[4].mxu0 }
 0x22d   :  { %v687_v44 = vadd.f32 %v1326_v2, %v2008_v57  ;;  %1114 = vrot.lane.b32.xlu0 %v1287_v56, %s1423_s16  ;;  %1084 = vrot.lane.b32.xlu1 %v1272_v59, %s1423_s16  ;;  %v678_v22 = vpop.f32.mrb[5].mxu0 }
 0x22e   :  { %v679_v41 = vadd.f32 %v2008_v57, %v678_v22  ;;  %v1327_v60 = vpop.f32.mrb[6].mxu0 }
 0x22f   :  { %v2065_v15 = vpack.c.bf16 %v687_v44, %v687_v44  ;;  %v690_v61 = vadd.f32 %v1327_v60, %v2008_v57  ;;  %v681_v1 = vpop.f32.mrb[7].mxu0 }
 0x230   :  { %v2068_v19 = vpack.c.bf16 %v679_v41, %v679_v41  ;;  %v682_v23 = vadd.f32 %v2008_v57, %v681_v1  ;;  %v1342_v0 = vpop.f32.mrb[4].mxu1 }
 0x231   :  { %924 = vst.msk [vmem:[%s2570_s5 + $0x18] sm:$0xf] %vm917_vm2, %v2065_v15  ;;  %v2076_v5 = vpack.c.bf16 %v690_v61, %v690_v61  ;;  %v751_v16 = vadd.f32 %v1342_v0, %v2008_v57  ;;  %950 = vrot.lane.b32.xlu0 %v2013_v24, %s1422_s24  ;;  %1116 = vrot.lane.b32.xlu1 %v1288_v27, %s1423_s16  ;;  %v742_v29 = vpop.f32.mrb[5].mxu1 }
 0x232   :  { %922 = vst.msk [vmem:[%s2570_s5 + $0x10] sm:$0xf] %vm917_vm2, %v2068_v19  ;;  %v2087_v45 = vpack.c.bf16 %v682_v23, %v682_v23  ;;  %v743_v10 = vadd.f32 %v2008_v57, %v742_v29  ;;  %v1343_v30 = vpop.f32.mrb[6].mxu1 }
 0x233   :  { %925 = vst.msk [vmem:[%s2570_s5 + $0x1c] sm:$0xf] %vm917_vm2, %v2076_v5  ;;  %v1291_v17 = vpack.c.bf16 %v751_v16, %v751_v16  ;;  %v754_v34 = vadd.f32 %v1343_v30, %v2008_v57  ;;  %v745_v35 = vpop.f32.mrb[7].mxu1 }
 0x234   :  { %923 = vst.msk [vmem:[%s2570_s5 + $0x14] sm:$0xf] %vm917_vm2, %v2087_v45  ;;  %v2101_v48 = vpack.c.bf16 %v743_v10, %v743_v10  ;;  %v746_v49 = vadd.f32 %v2008_v57, %v745_v35 }
 0x235   :  { %940 = vst.msk [vmem:[%s2570_s5 + $0x58] sm:$0xf] %vm917_vm2, %v1291_v17  ;;  %v2108_v39 = vpack.c.bf16 %v754_v34, %v754_v34  ;;  %952 = vrot.lane.b32.xlu1 %v2027_v3, %s1422_s24  ;;  %982 = vrot.lane.b32.xlu0 %v1285_v25, %s1422_s24 }
 0x236   :  { %938 = vst.msk [vmem:[%s2570_s5 + $0x50] sm:$0xf] %vm917_vm2, %v2101_v48  ;;  %v2118_v38 = vpack.c.bf16 %v746_v49, %v746_v49 }
 0x237   :  { %941 = vst.msk [vmem:[%s2570_s5 + $0x5c] sm:$0xf] %vm917_vm2, %v2108_v39 }
 0x238   :  { %939 = vst.msk [vmem:[%s2570_s5 + $0x54] sm:$0xf] %vm917_vm2, %v2118_v38 }
 0x239   :  { %984 = vrot.lane.b32.xlu1 %v1286_v18, %s1422_s24  ;;  %1078 = vrot.lane.b32.xlu0 %v2013_v24, %s1423_s16 }
 0x23c   :  { %v1330_v31 = vpop.f32.mrb[8].mxu0 }
 0x23d   :  { %v703_v55 = vadd.f32 %v1330_v31, %v2008_v57  ;;  %1080 = vrot.lane.b32.xlu1 %v2027_v3, %s1423_s16  ;;  %1110 = vrot.lane.b32.xlu0 %v1285_v25, %s1423_s16  ;;  %v694_v42 = vpop.f32.mrb[9].mxu0 }
 0x23e   :  { %v695_v20 = vadd.f32 %v2008_v57, %v694_v42  ;;  %v1331_v54 = vpop.f32.mrb[10].mxu0 }
 0x23f   :  { %v2138_v43 = vpack.c.bf16 %v703_v55, %v703_v55  ;;  %v706_v26 = vadd.f32 %v1331_v54, %v2008_v57  ;;  %v697_v8 = vpop.f32.mrb[11].mxu0 }
 0x240   :  { %v2141_v46 = vpack.c.bf16 %v695_v20, %v695_v20  ;;  %v698_v33 = vadd.f32 %v2008_v57, %v697_v8  ;;  %v1346_v36 = vpop.f32.mrb[8].mxu1 }
 0x241   :  { %928 = vst.msk [vmem:[%s2570_s5 + $0x28] sm:$0xf] %vm917_vm2, %v2138_v43  ;;  %v2149_v50 = vpack.c.bf16 %v706_v26, %v706_v26  ;;  %v767_v12 = vadd.f32 %v1346_v36, %v2008_v57  ;;  %1112 = vrot.lane.b32.xlu1 %v1286_v18, %s1423_s16  ;;  %962 = vrot.lane.b32.xlu0 %v2065_v15, %s1422_s24  ;;  %v758_v9 = vpop.f32.mrb[9].mxu1 }
 0x242   :  { %926 = vst.msk [vmem:[%s2570_s5 + $0x20] sm:$0xf] %vm917_vm2, %v2141_v46  ;;  %v2160_v51 = vpack.c.bf16 %v698_v33, %v698_v33  ;;  %v759_v21 = vadd.f32 %v2008_v57, %v758_v9  ;;  %v1347_v52 = vpop.f32.mrb[10].mxu1 }
 0x243   :  { %929 = vst.msk [vmem:[%s2570_s5 + $0x2c] sm:$0xf] %vm917_vm2, %v2149_v50  ;;  %v2168_v53 = vpack.c.bf16 %v767_v12, %v767_v12  ;;  %v770_v28 = vadd.f32 %v1347_v52, %v2008_v57  ;;  %v761_v47 = vpop.f32.mrb[11].mxu1 }
 0x244   :  { %927 = vst.msk [vmem:[%s2570_s5 + $0x24] sm:$0xf] %vm917_vm2, %v2160_v51  ;;  %v2176_v11 = vpack.c.bf16 %v759_v21, %v759_v21  ;;  %v762_v58 = vadd.f32 %v2008_v57, %v761_v47 }
 0x245   :  { %944 = vst.msk [vmem:[%s2570_s5 + $0x68] sm:$0xf] %vm917_vm2, %v2168_v53  ;;  %v1296_v32 = vpack.c.bf16 %v770_v28, %v770_v28  ;;  %964 = vrot.lane.b32.xlu1 %v2076_v5, %s1422_s24  ;;  %994 = vrot.lane.b32.xlu0 %v1291_v17, %s1422_s24 }
 0x246   :  { %942 = vst.msk [vmem:[%s2570_s5 + $0x60] sm:$0xf] %vm917_vm2, %v2176_v11  ;;  %v1294_v24 = vpack.c.bf16 %v762_v58, %v762_v58 }
 0x247   :  { %945 = vst.msk [vmem:[%s2570_s5 + $0x6c] sm:$0xf] %vm917_vm2, %v1296_v32 }
 0x248   :  { %943 = vst.msk [vmem:[%s2570_s5 + $0x64] sm:$0xf] %vm917_vm2, %v1294_v24 }
 0x249   :  { %1090 = vrot.lane.b32.xlu0 %v2065_v15, %s1423_s16  ;;  %996 = vrot.lane.b32.xlu1 %v2108_v39, %s1422_s24 }
 0x24c   :  { %v1334_v62 = vpop.f32.mrb[12].mxu0 }
 0x24d   :  { %v719_v7 = vadd.f32 %v1334_v62, %v2008_v57  ;;  %1122 = vrot.lane.b32.xlu0 %v1291_v17, %s1423_s16  ;;  %1092 = vrot.lane.b32.xlu1 %v2076_v5, %s1423_s16  ;;  %v710_v59 = vpop.f32.mrb[13].mxu0 }
 0x24e   :  { %v711_v37 = vadd.f32 %v2008_v57, %v710_v59  ;;  %v1335_v40 = vpop.f32.mrb[14].mxu0 }
 0x24f   :  { %v1283_v3 = vpack.c.bf16 %v719_v7, %v719_v7  ;;  %v722_v4 = vadd.f32 %v1335_v40, %v2008_v57  ;;  %v713_v6 = vpop.f32.mrb[15].mxu0 }
 0x250   :  { %v1281_v56 = vpack.c.bf16 %v711_v37, %v711_v37  ;;  %v714_v14 = vadd.f32 %v2008_v57, %v713_v6  ;;  %v1350_v63 = vpop.f32.mrb[12].mxu1 }
 0x251   :  { %932 = vst.msk [vmem:[%s2570_s5 + $0x38] sm:$0xf] %vm917_vm2, %v1283_v3  ;;  %v1284_v25 = vpack.c.bf16 %v722_v4, %v722_v4  ;;  %v783_v13 = vadd.f32 %v1350_v63, %v2008_v57  ;;  %958 = vrot.lane.b32.xlu0 %v2068_v19, %s1422_s24  ;;  %1124 = vrot.lane.b32.xlu1 %v2108_v39, %s1423_s16  ;;  %v774_v27 = vpop.f32.mrb[13].mxu1 }
 0x252   :  { %930 = vst.msk [vmem:[%s2570_s5 + $0x30] sm:$0xf] %vm917_vm2, %v1281_v56  ;;  %v1282_v18 = vpack.c.bf16 %v714_v14, %v714_v14  ;;  %v775_v2 = vadd.f32 %v2008_v57, %v774_v27  ;;  %v1351_v44 = vpop.f32.mrb[14].mxu1 }
 0x253   :  { %933 = vst.msk [vmem:[%s2570_s5 + $0x3c] sm:$0xf] %vm917_vm2, %v1284_v25  ;;  %v1299_v22 = vpack.c.bf16 %v783_v13, %v783_v13  ;;  %v786_v41 = vadd.f32 %v1351_v44, %v2008_v57  ;;  %v777_v60 = vpop.f32.mrb[15].mxu1 }
 0x254   :  { %931 = vst.msk [vmem:[%s2570_s5 + $0x34] sm:$0xf] %vm917_vm2, %v1282_v18  ;;  %v1297_v15 = vpack.c.bf16 %v775_v2, %v775_v2  ;;  %v778_v61 = vadd.f32 %v2008_v57, %v777_v60 }
 0x255   :  { %948 = vst.msk [vmem:[%s2570_s5 + $0x78] sm:$0xf] %vm917_vm2, %v1299_v22  ;;  %v1300_v1 = vpack.c.bf16 %v786_v41, %v786_v41  ;;  %960 = vrot.lane.b32.xlu1 %v2087_v45, %s1422_s24  ;;  %990 = vrot.lane.b32.xlu0 %v2101_v48, %s1422_s24 }
 0x256   :  { %946 = vst.msk [vmem:[%s2570_s5 + $0x70] sm:$0xf] %vm917_vm2, %v1297_v15  ;;  %v1298_v23 = vpack.c.bf16 %v778_v61, %v778_v61 }
 0x257   :  { %949 = vst.msk [vmem:[%s2570_s5 + $0x7c] sm:$0xf] %vm917_vm2, %v1300_v1 }
 0x258   :  { %947 = vst.msk [vmem:[%s2570_s5 + $0x74] sm:$0xf] %vm917_vm2, %v1298_v23 }
 0x259   :  { %992 = vrot.lane.b32.xlu1 %v2118_v38, %s1422_s24  ;;  %1086 = vrot.lane.b32.xlu0 %v2068_v19, %s1423_s16 }
 0x25d   :  { %1088 = vrot.lane.b32.xlu1 %v2087_v45, %s1423_s16  ;;  %1118 = vrot.lane.b32.xlu0 %v2101_v48, %s1423_s16 }
 0x261   :  { %1120 = vrot.lane.b32.xlu1 %v2118_v38, %s1423_s16  ;;  %970 = vrot.lane.b32.xlu0 %v2138_v43, %s1422_s24 }
 0x265   :  { %972 = vrot.lane.b32.xlu1 %v2149_v50, %s1422_s24  ;;  %1002 = vrot.lane.b32.xlu0 %v2168_v53, %s1422_s24 }
 0x269   :  { %1098 = vrot.lane.b32.xlu0 %v2138_v43, %s1423_s16  ;;  %1004 = vrot.lane.b32.xlu1 %v1296_v32, %s1422_s24 }
 0x26d   :  { %1130 = vrot.lane.b32.xlu0 %v2168_v53, %s1423_s16  ;;  %1100 = vrot.lane.b32.xlu1 %v2149_v50, %s1423_s16 }
 0x271   :  { %966 = vrot.lane.b32.xlu0 %v2141_v46, %s1422_s24  ;;  %1132 = vrot.lane.b32.xlu1 %v1296_v32, %s1423_s16 }
 0x275   :  { %968 = vrot.lane.b32.xlu1 %v2160_v51, %s1422_s24  ;;  %998 = vrot.lane.b32.xlu0 %v2176_v11, %s1422_s24 }
 0x279   :  { %1000 = vrot.lane.b32.xlu1 %v1294_v24, %s1422_s24  ;;  %1094 = vrot.lane.b32.xlu0 %v2141_v46, %s1423_s16 }
 0x27d   :  { %1096 = vrot.lane.b32.xlu1 %v2160_v51, %s1423_s16  ;;  %1126 = vrot.lane.b32.xlu0 %v2176_v11, %s1423_s16 }
 0x281   :  { %1128 = vrot.lane.b32.xlu1 %v1294_v24, %s1423_s16  ;;  %978 = vrot.lane.b32.xlu0 %v1283_v3, %s1422_s24 }
 0x285   :  { %980 = vrot.lane.b32.xlu1 %v1284_v25, %s1422_s24  ;;  %1010 = vrot.lane.b32.xlu0 %v1299_v22, %s1422_s24 }
 0x289   :  { %1106 = vrot.lane.b32.xlu0 %v1283_v3, %s1423_s16  ;;  %1012 = vrot.lane.b32.xlu1 %v1300_v1, %s1422_s24 }
 0x28d   :  { %974 = vrot.lane.b32.xlu0 %v1281_v56, %s1422_s24  ;;  %1108 = vrot.lane.b32.xlu1 %v1284_v25, %s1423_s16 }
 0x291   :  { %976 = vrot.lane.b32.xlu1 %v1282_v18, %s1422_s24  ;;  %1006 = vrot.lane.b32.xlu0 %v1297_v15, %s1422_s24 }
 0x293   :  { %v955_v57 = vpop.permute.xlu1 %954 }
 0x294   :  { %1048 = vst.msk [vmem:[%s2571_s6 + $0x8] sm:$0xf] %vm917_vm2, %v955_v57 }
 0x295   :  { %1008 = vrot.lane.b32.xlu1 %v1298_v23, %s1422_s24  ;;  %1102 = vrot.lane.b32.xlu0 %v1281_v56, %s1423_s16 }
 0x297   :  { %v957_v19 = vpop.permute.xlu1 %956  ;;  %v987_v0 = vpop.permute.xlu0 %986 }
 0x298   :  { %1049 = vst.msk [vmem:[%s2571_s6 + $0xc] sm:$0xf] %vm917_vm2, %v957_v19  ;;  %1064 = vst.msk [vmem:[%s2571_s6 + $0x48] sm:$0xf] %vm917_vm2, %v987_v0 }
 0x299   :  { %1104 = vrot.lane.b32.xlu1 %v1282_v18, %s1423_s16  ;;  %1134 = vrot.lane.b32.xlu0 %v1297_v15, %s1423_s16 }
 0x29b   :  { %v989_v5 = vpop.permute.xlu1 %988  ;;  %v1083_v16 = vpop.permute.xlu0 %1082 }
 0x29c   :  { %1065 = vst.msk [vmem:[%s2571_s6 + $0x4c] sm:$0xf] %vm917_vm2, %v989_v5  ;;  %1176 = vst.msk [vmem:[%s2572_s7 + $0x8] sm:$0xf] %vm917_vm2, %v1083_v16 }
 0x29d   :  { %1136 = vrot.lane.b32.xlu1 %v1298_v23, %s1423_s16  ;;  %1138 = vrot.lane.b32.xlu0 %v1299_v22, %s1423_s16 }
 0x29f   :  { %v1085_v29 = vpop.permute.xlu1 %1084  ;;  %v1115_v45 = vpop.permute.xlu0 %1114 }
 0x2a0   :  { %1177 = vst.msk [vmem:[%s2572_s7 + $0xc] sm:$0xf] %vm917_vm2, %v1085_v29  ;;  %1192 = vst.msk [vmem:[%s2572_s7 + $0x48] sm:$0xf] %vm917_vm2, %v1115_v45 }
 0x2a1   :  { %1140 = vrot.lane.b32.xlu1 %v1300_v1, %s1423_s16 }
 0x2a3   :  { %v1117_v10 = vpop.permute.xlu1 %1116  ;;  %v951_v30 = vpop.permute.xlu0 %950 }
 0x2a4   :  { %1193 = vst.msk [vmem:[%s2572_s7 + $0x4c] sm:$0xf] %vm917_vm2, %v1117_v10  ;;  %1046 = vst.msk [vmem:[%s2571_s6] sm:$0xf] %vm917_vm2, %v951_v30 }
 0x2a7   :  { %v953_v17 = vpop.permute.xlu1 %952  ;;  %v983_v34 = vpop.permute.xlu0 %982 }
 0x2a8   :  { %1047 = vst.msk [vmem:[%s2571_s6 + $0x4] sm:$0xf] %vm917_vm2, %v953_v17  ;;  %1062 = vst.msk [vmem:[%s2571_s6 + $0x40] sm:$0xf] %vm917_vm2, %v983_v34 }
 0x2ab   :  { %v985_v35 = vpop.permute.xlu1 %984  ;;  %v1079_v48 = vpop.permute.xlu0 %1078 }
 0x2ac   :  { %1063 = vst.msk [vmem:[%s2571_s6 + $0x44] sm:$0xf] %vm917_vm2, %v985_v35  ;;  %1174 = vst.msk [vmem:[%s2572_s7] sm:$0xf] %vm917_vm2, %v1079_v48 }
 0x2af   :  { %v1081_v49 = vpop.permute.xlu1 %1080  ;;  %v1111_v39 = vpop.permute.xlu0 %1110 }
 0x2b0   :  { %1175 = vst.msk [vmem:[%s2572_s7 + $0x4] sm:$0xf] %vm917_vm2, %v1081_v49  ;;  %1190 = vst.msk [vmem:[%s2572_s7 + $0x40] sm:$0xf] %vm917_vm2, %v1111_v39 }
 0x2b3   :  { %v1113_v38 = vpop.permute.xlu1 %1112  ;;  %v963_v31 = vpop.permute.xlu0 %962 }
 0x2b4   :  { %1191 = vst.msk [vmem:[%s2572_s7 + $0x44] sm:$0xf] %vm917_vm2, %v1113_v38  ;;  %1052 = vst.msk [vmem:[%s2571_s6 + $0x18] sm:$0xf] %vm917_vm2, %v963_v31 }
 0x2b7   :  { %v965_v55 = vpop.permute.xlu1 %964  ;;  %v995_v42 = vpop.permute.xlu0 %994 }
 0x2b8   :  { %1053 = vst.msk [vmem:[%s2571_s6 + $0x1c] sm:$0xf] %vm917_vm2, %v965_v55  ;;  %1068 = vst.msk [vmem:[%s2571_s6 + $0x58] sm:$0xf] %vm917_vm2, %v995_v42 }
 0x2bb   :  { %v997_v20 = vpop.permute.xlu1 %996  ;;  %v1091_v54 = vpop.permute.xlu0 %1090 }
 0x2bc   :  { %1069 = vst.msk [vmem:[%s2571_s6 + $0x5c] sm:$0xf] %vm917_vm2, %v997_v20  ;;  %1180 = vst.msk [vmem:[%s2572_s7 + $0x18] sm:$0xf] %vm917_vm2, %v1091_v54 }
 0x2bf   :  { %v1093_v43 = vpop.permute.xlu1 %1092  ;;  %v1123_v26 = vpop.permute.xlu0 %1122 }
 0x2c0   :  { %1181 = vst.msk [vmem:[%s2572_s7 + $0x1c] sm:$0xf] %vm917_vm2, %v1093_v43  ;;  %1196 = vst.msk [vmem:[%s2572_s7 + $0x58] sm:$0xf] %vm917_vm2, %v1123_v26 }
 0x2c3   :  { %v1125_v8 = vpop.permute.xlu1 %1124  ;;  %v959_v46 = vpop.permute.xlu0 %958 }
 0x2c4   :  { %1197 = vst.msk [vmem:[%s2572_s7 + $0x5c] sm:$0xf] %vm917_vm2, %v1125_v8  ;;  %1050 = vst.msk [vmem:[%s2571_s6 + $0x10] sm:$0xf] %vm917_vm2, %v959_v46 }
 0x2c7   :  { %v961_v33 = vpop.permute.xlu1 %960  ;;  %v991_v36 = vpop.permute.xlu0 %990 }
 0x2c8   :  { %1051 = vst.msk [vmem:[%s2571_s6 + $0x14] sm:$0xf] %vm917_vm2, %v961_v33  ;;  %1066 = vst.msk [vmem:[%s2571_s6 + $0x50] sm:$0xf] %vm917_vm2, %v991_v36 }
 0x2cb   :  { %v993_v50 = vpop.permute.xlu1 %992  ;;  %v1087_v12 = vpop.permute.xlu0 %1086 }
 0x2cc   :  { %1067 = vst.msk [vmem:[%s2571_s6 + $0x54] sm:$0xf] %vm917_vm2, %v993_v50  ;;  %1178 = vst.msk [vmem:[%s2572_s7 + $0x10] sm:$0xf] %vm917_vm2, %v1087_v12 }
 0x2cf   :  { %v1089_v9 = vpop.permute.xlu1 %1088  ;;  %v1119_v51 = vpop.permute.xlu0 %1118 }
 0x2d0   :  { %1179 = vst.msk [vmem:[%s2572_s7 + $0x14] sm:$0xf] %vm917_vm2, %v1089_v9  ;;  %1194 = vst.msk [vmem:[%s2572_s7 + $0x50] sm:$0xf] %vm917_vm2, %v1119_v51 }
 0x2d3   :  { %v1121_v21 = vpop.permute.xlu1 %1120  ;;  %v971_v52 = vpop.permute.xlu0 %970 }
 0x2d4   :  { %1195 = vst.msk [vmem:[%s2572_s7 + $0x54] sm:$0xf] %vm917_vm2, %v1121_v21  ;;  %1056 = vst.msk [vmem:[%s2571_s6 + $0x28] sm:$0xf] %vm917_vm2, %v971_v52 }
 0x2d7   :  { %v973_v53 = vpop.permute.xlu1 %972  ;;  %v1003_v28 = vpop.permute.xlu0 %1002 }
 0x2d8   :  { %1057 = vst.msk [vmem:[%s2571_s6 + $0x2c] sm:$0xf] %vm917_vm2, %v973_v53  ;;  %1072 = vst.msk [vmem:[%s2571_s6 + $0x68] sm:$0xf] %vm917_vm2, %v1003_v28 }
 0x2db   :  { %v1005_v47 = vpop.permute.xlu1 %1004  ;;  %v1099_v11 = vpop.permute.xlu0 %1098 }
 0x2dc   :  { %1073 = vst.msk [vmem:[%s2571_s6 + $0x6c] sm:$0xf] %vm917_vm2, %v1005_v47  ;;  %1184 = vst.msk [vmem:[%s2572_s7 + $0x28] sm:$0xf] %vm917_vm2, %v1099_v11 }
 0x2df   :  { %v1101_v58 = vpop.permute.xlu1 %1100  ;;  %v1131_v32 = vpop.permute.xlu0 %1130 }
 0x2e0   :  { %1185 = vst.msk [vmem:[%s2572_s7 + $0x2c] sm:$0xf] %vm917_vm2, %v1101_v58  ;;  %1200 = vst.msk [vmem:[%s2572_s7 + $0x68] sm:$0xf] %vm917_vm2, %v1131_v32 }
 0x2e3   :  { %v1133_v24 = vpop.permute.xlu1 %1132  ;;  %v967_v62 = vpop.permute.xlu0 %966 }
 0x2e4   :  { %1201 = vst.msk [vmem:[%s2572_s7 + $0x6c] sm:$0xf] %vm917_vm2, %v1133_v24  ;;  %1054 = vst.msk [vmem:[%s2571_s6 + $0x20] sm:$0xf] %vm917_vm2, %v967_v62 }
 0x2e7   :  { %v969_v7 = vpop.permute.xlu1 %968  ;;  %v999_v59 = vpop.permute.xlu0 %998 }
 0x2e8   :  { %1055 = vst.msk [vmem:[%s2571_s6 + $0x24] sm:$0xf] %vm917_vm2, %v969_v7  ;;  %1070 = vst.msk [vmem:[%s2571_s6 + $0x60] sm:$0xf] %vm917_vm2, %v999_v59 }
 0x2eb   :  { %v1001_v37 = vpop.permute.xlu1 %1000  ;;  %v1095_v40 = vpop.permute.xlu0 %1094 }
 0x2ec   :  { %1071 = vst.msk [vmem:[%s2571_s6 + $0x64] sm:$0xf] %vm917_vm2, %v1001_v37  ;;  %1182 = vst.msk [vmem:[%s2572_s7 + $0x20] sm:$0xf] %vm917_vm2, %v1095_v40 }
 0x2ef   :  { %v1097_v3 = vpop.permute.xlu1 %1096  ;;  %v1127_v4 = vpop.permute.xlu0 %1126 }
 0x2f0   :  { %1183 = vst.msk [vmem:[%s2572_s7 + $0x24] sm:$0xf] %vm917_vm2, %v1097_v3  ;;  %1198 = vst.msk [vmem:[%s2572_s7 + $0x60] sm:$0xf] %vm917_vm2, %v1127_v4 }
 0x2f3   :  { %v1129_v6 = vpop.permute.xlu1 %1128  ;;  %v979_v56 = vpop.permute.xlu0 %978 }
 0x2f4   :  { %1199 = vst.msk [vmem:[%s2572_s7 + $0x64] sm:$0xf] %vm917_vm2, %v1129_v6  ;;  %1060 = vst.msk [vmem:[%s2571_s6 + $0x38] sm:$0xf] %vm917_vm2, %v979_v56 }
 0x2f7   :  { %v981_v14 = vpop.permute.xlu1 %980  ;;  %v1011_v63 = vpop.permute.xlu0 %1010 }
 0x2f8   :  { %1061 = vst.msk [vmem:[%s2571_s6 + $0x3c] sm:$0xf] %vm917_vm2, %v981_v14  ;;  %1076 = vst.msk [vmem:[%s2571_s6 + $0x78] sm:$0xf] %vm917_vm2, %v1011_v63 }
 0x2fb   :  { %v1013_v25 = vpop.permute.xlu1 %1012  ;;  %v1107_v13 = vpop.permute.xlu0 %1106 }
 0x2fc   :  { %1077 = vst.msk [vmem:[%s2571_s6 + $0x7c] sm:$0xf] %vm917_vm2, %v1013_v25  ;;  %1188 = vst.msk [vmem:[%s2572_s7 + $0x38] sm:$0xf] %vm917_vm2, %v1107_v13 }
 0x2ff   :  { %v1109_v27 = vpop.permute.xlu1 %1108  ;;  %v975_v18 = vpop.permute.xlu0 %974 }
 0x300   :  { %1189 = vst.msk [vmem:[%s2572_s7 + $0x3c] sm:$0xf] %vm917_vm2, %v1109_v27  ;;  %1058 = vst.msk [vmem:[%s2571_s6 + $0x30] sm:$0xf] %vm917_vm2, %v975_v18 }
 0x303   :  { %v977_v2 = vpop.permute.xlu1 %976  ;;  %v1007_v44 = vpop.permute.xlu0 %1006 }
 0x304   :  { %1059 = vst.msk [vmem:[%s2571_s6 + $0x34] sm:$0xf] %vm917_vm2, %v977_v2  ;;  %1074 = vst.msk [vmem:[%s2571_s6 + $0x70] sm:$0xf] %vm917_vm2, %v1007_v44 }
 0x307   :  { %v1009_v22 = vpop.permute.xlu1 %1008  ;;  %v1103_v41 = vpop.permute.xlu0 %1102 }
 0x308   :  { %1075 = vst.msk [vmem:[%s2571_s6 + $0x74] sm:$0xf] %vm917_vm2, %v1009_v22  ;;  %1186 = vst.msk [vmem:[%s2572_s7 + $0x30] sm:$0xf] %vm917_vm2, %v1103_v41 }
 0x30b   :  { %v1105_v60 = vpop.permute.xlu1 %1104  ;;  %v1135_v15 = vpop.permute.xlu0 %1134 }
 0x30c   :  { %1187 = vst.msk [vmem:[%s2572_s7 + $0x34] sm:$0xf] %vm917_vm2, %v1105_v60  ;;  %1202 = vst.msk [vmem:[%s2572_s7 + $0x70] sm:$0xf] %vm917_vm2, %v1135_v15 }
 0x30f   :  { %v1137_v61 = vpop.permute.xlu1 %1136  ;;  %v1139_v1 = vpop.permute.xlu0 %1138 }
 0x310   :  { %1203 = vst.msk [vmem:[%s2572_s7 + $0x74] sm:$0xf] %vm917_vm2, %v1137_v61  ;;  %1204 = vst.msk [vmem:[%s2572_s7 + $0x78] sm:$0xf] %vm917_vm2, %v1139_v1 }
 0x313   :  { %v1141_v23 = vpop.permute.xlu1 %1140 }
 0x314   :  { %1205 = vst.msk [vmem:[%s2572_s7 + $0x7c] sm:$0xf] %vm917_vm2, %v1141_v23 }

// kernel: forward.12
= control target key start
LH: loop header
LB: loop body
LE: loop exit
PB: predicated region body
PF: predicated region fallthrough
CT: control target
= control target key end

     0   :  { %s2293_s21 = smov 0   ;;  %s2295_s22 = smov 0   ;;  %s2879_s0 = inlined_call_operand.vmem [shape: f32[2,128,8], index: 0, kind: input, shape index: {}, may-alias: {0,6}]   ;;  %s2880_s1 = inlined_call_operand.vmem [shape: bf16[2,128,8], index: 1, kind: input, shape index: {}]   ;;  %s2881_s2 = inlined_call_operand.vmem [shape: bf16[2,128,8], index: 2, kind: input, shape index: {}]   ;;  %s2882_s3 = inlined_call_operand.vmem [shape: bf16[2,128,8], index: 3, kind: input, shape index: {}]   ;;  %s2883_s4 = inlined_call_operand.vmem [shape: bf16[8,8], index: 4, kind: input, shape index: {}]   ;;  %s2884_s5 = inlined_call_operand.vmem [shape: f32[1,8], index: 5, kind: input, shape index: {}]   ;;  %s2885_s6 = inlined_call_operand.vmem [shape: f32[2,128,8], index: 6, kind: output, shape index: {}, may-alias: {0,6}]  }
   0x1   :  { %s2297_s23 = smov 0  }
   0x2 LB: > { %s35_s24 = sadd.s32 1, %s2249_s22  ;;  %p1891_p0 = scmp.ge.s32.totalorder %s2253_s23, 1  ;;  %s2253_s23 = sphi %s2297_s23, %s16_s23   ;;  %s2249_s22 = sphi %s2295_s22, %s2901_s22   ;;  %s2245_s21 = sphi %s2293_s21, %s2900_s21  }
   0x3   : > { %p37_p1 = scmp.ge.s32.totalorder %s35_s24, 2  ;;  %p291_p2 = scmp.lt.s32.totalorder %s2253_s23, 3 }
   0x5   : > { %s2903_s24 = smov (%p37_p1, %s35_s24), 0  ;;  %p292_p3 = pnand %p1891_p0, %p291_p2 }
   0x6   : > { %p357_p4 = scmp.lt.s32.totalorder (!%p292_p3), %s2245_s21, 1  ;;  %vm444_vm0 = vcmask (!%p292_p3), 64512   ;;  %vm411_vm1 = vcmask (!%p292_p3), 7168   ;;  %v2255_v24 = vmov (!%p292_p3), -1e+30   ;;  %v720_v25 = vlaneseq (!%p292_p3) }
   0x7   : > { %295 = sbr.rel (%p292_p3) target bundleno = 1147 (0x47b), region = 44  ;;  %414 = vst.msk [vmem:[#allocation2 + $0x10] sm:$0xff] (!%p292_p3), %vm411_vm1, %v2255_v24  ;;  %412 = vst.msk [vmem:[#allocation2] sm:$0xff] (!%p292_p3), %vm411_vm1, %v2255_v24  ;;  %v2256_v45 = vmov (!%p292_p3), 0   ;;  %v2257_v54 = vmov (!%p292_p3), 0.0   ;;  %vm1594_vm3 = vcmask (!%p292_p3), 1043456  }
   0x8   : > { %413 = vst.msk [vmem:[#allocation2 + $0x8] sm:$0xff] (!%p292_p3), %vm411_vm1, %v2255_v24  ;;  %415 = vst.msk [vmem:[#allocation2 + $0x18] sm:$0xff] (!%p292_p3), %vm411_vm1, %v2255_v24  ;;  %v2384_v26 = vand.u32 (!%p292_p3), 127, %v720_v25  ;;  %2110 = vset.pattern.permute.xlu1 (!%p292_p3), %v2256_v45  ;;  %2109 = vset.pattern.permute.xlu0 (!%p292_p3), %v2256_v45 }
   0x9   : > { %416 = vst.msk [vmem:[#allocation2 + $0x20] sm:$0xff] (!%p292_p3), %vm411_vm1, %v2255_v24  ;;  %417 = vst.msk [vmem:[#allocation2 + $0x28] sm:$0xff] (!%p292_p3), %vm411_vm1, %v2255_v24 }
   0xa   : > { %418 = vst.msk [vmem:[#allocation2 + $0x30] sm:$0xff] (!%p292_p3), %vm411_vm1, %v2255_v24  ;;  %419 = vst.msk [vmem:[#allocation2 + $0x38] sm:$0xff] (!%p292_p3), %vm411_vm1, %v2255_v24  ;;  %vm724_vm2 = vcmp.lt.s32.totalorder (!%p292_p3), %v2384_v26, 65 }
   0xb   : > { %420 = vst.msk [vmem:[#allocation2 + $0x40] sm:$0xff] (!%p292_p3), %vm411_vm1, %v2255_v24  ;;  %421 = vst.msk [vmem:[#allocation2 + $0x48] sm:$0xff] (!%p292_p3), %vm411_vm1, %v2255_v24 }
   0xc   : > { %422 = vst.msk [vmem:[#allocation2 + $0x50] sm:$0xff] (!%p292_p3), %vm411_vm1, %v2255_v24  ;;  %423 = vst.msk [vmem:[#allocation2 + $0x58] sm:$0xff] (!%p292_p3), %vm411_vm1, %v2255_v24 }
   0xd   : > { %424 = vst.msk [vmem:[#allocation2 + $0x60] sm:$0xff] (!%p292_p3), %vm411_vm1, %v2255_v24  ;;  %425 = vst.msk [vmem:[#allocation2 + $0x68] sm:$0xff] (!%p292_p3), %vm411_vm1, %v2255_v24 }
   0xe   : > { %s2905_s21 = smov (!%p357_p4, %s2245_s21), 1  ;;  %426 = vst.msk [vmem:[#allocation2 + $0x70] sm:$0xff] %vm411_vm1, %v2255_v24  ;;  %427 = vst.msk [vmem:[#allocation2 + $0x78] sm:$0xff] %vm411_vm1, %v2255_v24  ;;  %v2507_v63 = vld [vmem:[#allocation2 + $0x10] sm:$0xff] }
   0xf   : > { %s2314_s25 = sshll.u32 %s2905_s21, 6  ;;  %428 = vst.msk [vmem:[#allocation3] sm:$0xff] %vm411_vm1, %v2257_v54  ;;  %429 = vst.msk [vmem:[#allocation3 + $0x8] sm:$0xff] %vm411_vm1, %v2257_v54  ;;  %s1945_s13 = sshll.u32 %s2905_s21, 7 }
  0x10   : > { %s2320_s28 = scalar_lea.vmem %s2881_s2, %s2314_s25  ;;  %s2331_s7 = scalar_lea.vmem %s2880_s1, %s2314_s25  ;;  %430 = vst.msk [vmem:[#allocation3 + $0x10] sm:$0xff] %vm411_vm1, %v2257_v54  ;;  %431 = vst.msk [vmem:[#allocation3 + $0x18] sm:$0xff] %vm411_vm1, %v2257_v54  ;;  %v2566_v26 = vld [vmem:[#allocation2 + $0x28] sm:$0xff] }
  0x11   : > { %v2111_v0 = vld [vmem:[%s2320_s28] sm:$0xff]   ;;  %v2112_v1 = vld [vmem:[%s2320_s28 + $0x8] sm:$0xff]   ;;  %v2113_v3 = vld [vmem:[%s2320_s28 + $0x10] sm:$0xff]   ;;  %432 = vst.msk [vmem:[#allocation3 + $0x20] sm:$0xff] %vm411_vm1, %v2257_v54  ;;  %s2503_s10 = scalar_lea.vmem %s2882_s3, %s2314_s25  ;;  %s364_s16 = scalar_lea.vmem %s2879_s0, %s1945_s13 }
  0x12   : > { %2073 = vmatprep.subr.msk.bf16.mxu0 %vm444_vm0, %v2111_v0  ;;  %v599_v2 = vsel %vm444_vm0, %v2111_v0, 0  ;;  %v602_v4 = vsel %vm444_vm0, %v2112_v1, 0  ;;  %v2119_v5 = vld [vmem:[%s2331_s7] sm:$0xff]   ;;  %v605_v6 = vsel %vm444_vm0, %v2113_v3, 0  ;;  %v2114_v7 = vld [vmem:[%s2320_s28 + $0x18] sm:$0xff]   ;;  %v2116_v11 = vld [vmem:[%s2320_s28 + $0x28] sm:$0xff]   ;;  %s2821_s21 = scalar_lea.vmem %s2885_s6, %s1945_s13 }
  0x13   : > { %1992 = vmatpush3.bf16.xpose.msra.mxu0 %v599_v2  ;;  %2007 = vmatprep.mubr.msk.bf16.mxu0 %vm444_vm0, %v2119_v5  ;;  %v608_v8 = vsel %vm444_vm0, %v2114_v7, 0  ;;  %v2115_v9 = vld [vmem:[%s2320_s28 + $0x20] sm:$0xff]   ;;  %v614_v12 = vsel %vm444_vm0, %v2116_v11, 0  ;;  %v2117_v13 = vld [vmem:[%s2320_s28 + $0x30] sm:$0xff]   ;;  %v2118_v15 = vld [vmem:[%s2320_s28 + $0x38] sm:$0xff]   ;;  %433 = vst.msk [vmem:[#allocation3 + $0x28] sm:$0xff] %vm411_vm1, %v2257_v54 }
  0x14   : > { %2074 = vmatprep.subr.msk.bf16.mxu0 %vm444_vm0, %v2112_v1  ;;  %v611_v10 = vsel %vm444_vm0, %v2115_v9, 0  ;;  %v617_v14 = vsel %vm444_vm0, %v2117_v13, 0  ;;  %v620_v16 = vsel %vm444_vm0, %v2118_v15, 0  ;;  %v2120_v17 = vld [vmem:[%s2331_s7 + $0x8] sm:$0xff]   ;;  %v2121_v18 = vld [vmem:[%s2331_s7 + $0x10] sm:$0xff]   ;;  %v2122_v19 = vld [vmem:[%s2331_s7 + $0x18] sm:$0xff]  }
  0x15   : > { %v2123_v20 = vld [vmem:[%s2331_s7 + $0x20] sm:$0xff]   ;;  %v2124_v21 = vld [vmem:[%s2331_s7 + $0x28] sm:$0xff]   ;;  %v2125_v22 = vld [vmem:[%s2331_s7 + $0x30] sm:$0xff]   ;;  %434 = vst.msk [vmem:[#allocation3 + $0x30] sm:$0xff] %vm411_vm1, %v2257_v54 }
  0x16   : > { %v2126_v23 = vld [vmem:[%s2331_s7 + $0x38] sm:$0xff]   ;;  %435 = vst.msk [vmem:[#allocation3 + $0x38] sm:$0xff] %vm411_vm1, %v2257_v54  ;;  %436 = vst.msk [vmem:[#allocation3 + $0x40] sm:$0xff] %vm411_vm1, %v2257_v54  ;;  %v2127_v61 = vld [vmem:[%s2503_s10] sm:$0xff]  }
  0x17   : > { %437 = vst.msk [vmem:[#allocation3 + $0x48] sm:$0xff] %vm411_vm1, %v2257_v54  ;;  %438 = vst.msk [vmem:[#allocation3 + $0x50] sm:$0xff] %vm411_vm1, %v2257_v54  ;;  %v2128_v62 = vld [vmem:[%s2503_s10 + $0x8] sm:$0xff]   ;;  %2023 = vmatprep.subr.bf16.mxu1 %v2127_v61  ;;  %v2509_v0 = vld [vmem:[#allocation2] sm:$0xff] }
  0x18   : > { %439 = vst.msk [vmem:[#allocation3 + $0x58] sm:$0xff] %vm411_vm1, %v2257_v54  ;;  %440 = vst.msk [vmem:[#allocation3 + $0x60] sm:$0xff] %vm411_vm1, %v2257_v54  ;;  %2024 = vmatpush3.bf16.msra.mxu1 %v2127_v61  ;;  %v2517_v5 = vld [vmem:[#allocation2 + $0x18] sm:$0xff]  ;;  %v2131_v24 = vld [vmem:[%s2503_s10 + $0x20] sm:$0xff]  }
  0x19   : > { %441 = vst.msk [vmem:[#allocation3 + $0x68] sm:$0xff] %vm411_vm1, %v2257_v54  ;;  %442 = vst.msk [vmem:[#allocation3 + $0x70] sm:$0xff] %vm411_vm1, %v2257_v54  ;;  %2025 = vmatprep.subr.bf16.mxu1 %v2128_v62 }
  0x1a   : > { %443 = vst.msk [vmem:[#allocation3 + $0x78] sm:$0xff] %vm411_vm1, %v2257_v54 }
  0x1b   : > { %1994 = vmatpush3.bf16.xpose.msra.mxu0 %v602_v4  ;;  %445 = vst.msk [vmem:[#allocation4] sm:$0xff] %vm444_vm0, %v2257_v54  ;;  %446 = vst.msk [vmem:[#allocation4 + $0x8] sm:$0xff] %vm444_vm0, %v2257_v54 }
  0x1c   : > { %2075 = vmatprep.subr.msk.bf16.mxu0 %vm444_vm0, %v2113_v3  ;;  %447 = vst.msk [vmem:[#allocation4 + $0x10] sm:$0xff] %vm444_vm0, %v2257_v54  ;;  %448 = vst.msk [vmem:[#allocation4 + $0x18] sm:$0xff] %vm444_vm0, %v2257_v54  ;;  %2026 = vmatpush3.bf16.msra.mxu1 %v2128_v62 }
  0x1d   : > { %449 = vst.msk [vmem:[#allocation4 + $0x20] sm:$0xff] %vm444_vm0, %v2257_v54  ;;  %450 = vst.msk [vmem:[#allocation4 + $0x28] sm:$0xff] %vm444_vm0, %v2257_v54 }
  0x1e   : > { %451 = vst.msk [vmem:[#allocation4 + $0x30] sm:$0xff] %vm444_vm0, %v2257_v54  ;;  %452 = vst.msk [vmem:[#allocation4 + $0x38] sm:$0xff] %vm444_vm0, %v2257_v54 }
  0x1f   : > { %453 = vst.msk [vmem:[#allocation4 + $0x40] sm:$0xff] %vm444_vm0, %v2257_v54  ;;  %454 = vst.msk [vmem:[#allocation4 + $0x48] sm:$0xff] %vm444_vm0, %v2257_v54 }
  0x20   : > { %455 = vst.msk [vmem:[#allocation4 + $0x50] sm:$0xff] %vm444_vm0, %v2257_v54  ;;  %456 = vst.msk [vmem:[#allocation4 + $0x58] sm:$0xff] %vm444_vm0, %v2257_v54 }
  0x21   : > { %457 = vst.msk [vmem:[#allocation4 + $0x60] sm:$0xff] %vm444_vm0, %v2257_v54  ;;  %458 = vst.msk [vmem:[#allocation4 + $0x68] sm:$0xff] %vm444_vm0, %v2257_v54 }
  0x22   : > { %459 = vst.msk [vmem:[#allocation4 + $0x70] sm:$0xff] %vm444_vm0, %v2257_v54  ;;  %460 = vst.msk [vmem:[#allocation4 + $0x78] sm:$0xff] %vm444_vm0, %v2257_v54  ;;  %v2133_v54 = vld [vmem:[%s2503_s10 + $0x30] sm:$0xff]  }
  0x23   : > { %1996 = vmatpush3.bf16.xpose.msra.mxu0 %v605_v6 }
  0x24   : > { %2076 = vmatprep.subr.msk.bf16.mxu0 %vm444_vm0, %v2114_v7  ;;  %v2524_v7 = vld [vmem:[#allocation2 + $0x8] sm:$0xff] }
  0x2b   : > { %1998 = vmatpush3.bf16.xpose.msra.mxu0 %v608_v8  ;;  %v2129_v8 = vld [vmem:[%s2503_s10 + $0x10] sm:$0xff]  }
  0x2c   : > { %2077 = vmatprep.subr.msk.bf16.mxu0 %vm444_vm0, %v2115_v9  ;;  %2027 = vmatprep.subr.bf16.mxu1 %v2129_v8 }
  0x2d   : > { %2028 = vmatpush3.bf16.msra.mxu1 %v2129_v8 }
  0x33   : > { %2000 = vmatpush3.bf16.xpose.msra.mxu0 %v611_v10 }
  0x34   : > { %2078 = vmatprep.subr.msk.bf16.mxu0 %vm444_vm0, %v2116_v11 }
  0x3b   : > { %2002 = vmatpush3.bf16.xpose.msra.mxu0 %v614_v12 }
  0x3c   : > { %2079 = vmatprep.subr.msk.bf16.mxu0 %vm444_vm0, %v2117_v13 }
  0x43   : > { %2004 = vmatpush3.bf16.xpose.msra.mxu0 %v617_v14 }
  0x44   : > { %2080 = vmatprep.subr.msk.bf16.mxu0 %vm444_vm0, %v2118_v15  ;;  %v2543_v15 = vld [vmem:[#allocation2 + $0x20] sm:$0xff] }
  0x4b   : > { %2006 = vmatpush3.bf16.xpose.msra.mxu0 %v620_v16  ;;  %v2130_v16 = vld [vmem:[%s2503_s10 + $0x18] sm:$0xff]  }
  0x4c   : > { %2029 = vmatprep.subr.bf16.mxu1 %v2130_v16 }
  0x4d   : > { %2030 = vmatpush3.bf16.msra.mxu1 %v2130_v16 }
  0x4e   : > { %2031 = vmatprep.subr.bf16.mxu1 %v2131_v24 }
  0x51   : > { %2032 = vmatpush3.bf16.msra.mxu1 %v2131_v24 }
  0x52   : > { %2008 = vmatmul.mubr.msk.bf16.vlgmr.msra.gmra.mrb[0].mxu0 %vm444_vm0, %v2120_v17 }
  0x53   : > { %2011 = vmatprep.mubr.msk.bf16.mxu0 %vm444_vm0, %v2121_v18  ;;  %v2550_v18 = vld [vmem:[#allocation2 + $0x38] sm:$0xff] }
  0x5a   : > { %2012 = vmatmul.mubr.msk.bf16.gmra.mrb[4].mxu0 %vm444_vm0, %v2122_v19 }
  0x5b   : > { %2015 = vmatprep.mubr.msk.bf16.mxu0 %vm444_vm0, %v2123_v20 }
  0x62   : > { %2016 = vmatmul.mubr.msk.bf16.gmra.mrb[8].mxu0 %vm444_vm0, %v2124_v21 }
  0x63   : > { %2019 = vmatprep.mubr.msk.bf16.mxu0 %vm444_vm0, %v2125_v22 }
  0x6a   : > { %2020 = vmatmul.mubr.msk.bf16.gmra.mrb[12].mxu0 %vm444_vm0, %v2126_v23  ;;  %v2559_v23 = vld [vmem:[#allocation2 + $0x30] sm:$0xff] }
 0x125   : > { %v2009_v27 = vpop.f32.mrb[0].mxu0 }
 0x126   : > { %v656_v28 = vpop.f32.mrb[1].mxu0  ;;  %v2389_v29 = vsel %vm724_vm2, %v2009_v27, -1e+30 }
 0x127   : > { %761 = vmax.xlane.f32.xlu1 %v2389_v29  ;;  %v2010_v30 = vpop.f32.mrb[2].mxu0  ;;  %v2394_v31 = vsel %vm724_vm2, %v656_v28, -1e+30 }
 0x128   : > { %757 = vmax.xlane.f32.xlu0 %v2394_v31  ;;  %v659_v32 = vpop.f32.mrb[3].mxu0  ;;  %v2399_v33 = vsel %vm724_vm2, %v2010_v30, -1e+30 }
 0x129   : > { %v2404_v34 = vsel %vm724_vm2, %v659_v32, -1e+30 }
 0x12b   : > { %763 = vmax.xlane.f32.xlu1 %v2399_v33 }
 0x12c   : > { %759 = vmax.xlane.f32.xlu0 %v2404_v34 }
 0x12d   : > { %v2013_v35 = vpop.f32.mrb[4].mxu0 }
 0x12e   : > { %v672_v36 = vpop.f32.mrb[5].mxu0  ;;  %v2419_v41 = vsel %vm724_vm2, %v2013_v35, -1e+30 }
 0x12f   : > { %v2014_v37 = vpop.f32.mrb[6].mxu0  ;;  %v2409_v38 = vsel %vm724_vm2, %v672_v36, -1e+30  ;;  %v2578_v36 = vld [vmem:[#allocation2 + $0x40] sm:$0xff] }
 0x130   : > { %765 = vmax.xlane.f32.xlu0 %v2409_v38  ;;  %v675_v39 = vpop.f32.mrb[7].mxu0  ;;  %v2414_v40 = vsel %vm724_vm2, %v2014_v37, -1e+30  ;;  %v2132_v37 = vld [vmem:[%s2503_s10 + $0x28] sm:$0xff]  }
 0x131   : > { %771 = vmax.xlane.f32.xlu1 %v2414_v40  ;;  %v2424_v42 = vsel %vm724_vm2, %v675_v39, -1e+30  ;;  %2033 = vmatprep.subr.bf16.mxu1 %v2132_v37 }
 0x132   : > { %2034 = vmatpush3.bf16.msra.mxu1 %v2132_v37 }
 0x133   : > { %2035 = vmatprep.subr.bf16.mxu1 %v2133_v54 }
 0x134   : > { %769 = vmax.xlane.f32.xlu0 %v2419_v41 }
 0x135   : > { %767 = vmax.xlane.f32.xlu1 %v2424_v42  ;;  %v2017_v43 = vpop.f32.mrb[8].mxu0 }
 0x136   : > { %v688_v44 = vpop.f32.mrb[9].mxu0  ;;  %v2439_v50 = vsel %vm724_vm2, %v2017_v43, -1e+30  ;;  %v2586_v43 = vld [vmem:[#allocation2 + $0x58] sm:$0xff]  ;;  %2036 = vmatpush3.bf16.msra.mxu1 %v2133_v54  ;;  %v2646_v54 = vld [vmem:[#allocation2 + $0x68] sm:$0xff] }
 0x137   : > { %v2018_v46 = vpop.f32.mrb[10].mxu0  ;;  %v2429_v47 = vsel %vm724_vm2, %v688_v44, -1e+30 }
 0x138   : > { %v2433_v48 = vsel %vm724_vm2, %v2018_v46, -1e+30  ;;  %773 = vmax.xlane.f32.xlu0 %v2429_v47  ;;  %v691_v49 = vpop.f32.mrb[11].mxu0 }
 0x139   : > { %779 = vmax.xlane.f32.xlu1 %v2433_v48  ;;  %v2443_v51 = vsel %vm724_vm2, %v691_v49, -1e+30 }
 0x13c   : > { %777 = vmax.xlane.f32.xlu0 %v2439_v50 }
 0x13d   : > { %775 = vmax.xlane.f32.xlu1 %v2443_v51  ;;  %v2021_v52 = vpop.f32.mrb[12].mxu0 }
 0x13e   : > { %v704_v53 = vpop.f32.mrb[13].mxu0  ;;  %v2491_v59 = vsel %vm724_vm2, %v2021_v52, -1e+30 }
 0x13f   : > { %v2022_v55 = vpop.f32.mrb[14].mxu0  ;;  %v2481_v56 = vsel %vm724_vm2, %v704_v53, -1e+30  ;;  %v2598_v53 = vld [vmem:[#allocation2 + $0x50] sm:$0xff] }
 0x140   : > { %v2485_v57 = vsel %vm724_vm2, %v2022_v55, -1e+30  ;;  %781 = vmax.xlane.f32.xlu0 %v2481_v56  ;;  %v707_v58 = vpop.f32.mrb[15].mxu0 }
 0x141   : > { %787 = vmax.xlane.f32.xlu1 %v2485_v57  ;;  %v2495_v60 = vsel %vm724_vm2, %v707_v58, -1e+30  ;;  %v2606_v58 = vld [vmem:[#allocation2 + $0x48] sm:$0xff] }
 0x144   : > { %785 = vmax.xlane.f32.xlu0 %v2491_v59 }
 0x145   : > { %783 = vmax.xlane.f32.xlu1 %v2495_v60 }
 0x1b4   : > { %v762_v1 = vpop.xlane.xlu1 %761 }
 0x1b5   : > { %v2512_v2 = vmax.f32 %v2507_v63, %v762_v1  ;;  %v758_v3 = vpop.xlane.xlu0 %757 }
 0x1b6   : > { %v2515_v4 = vmax.f32 %v2509_v0, %v758_v3 }
 0x1b7   : > { %1393 = vst.msk [vmem:[#allocation2 + $0x10] sm:$0xff] %vm411_vm1, %v2512_v2  ;;  %865 = vperm.xlu1 %2110, %v2512_v2  }
 0x1b8   : > { %v805_v9 = vsub.f32 %v2509_v0, %v2515_v4  ;;  %1391 = vst.msk [vmem:[#allocation2] sm:$0xff] %vm411_vm1, %v2515_v4  ;;  %v764_v10 = vpop.xlane.xlu1 %763  ;;  %855 = vperm.xlu0 %2109, %v2515_v4  }
 0x1b9   : > { %v2533_v11 = vmax.f32 %v2517_v5, %v764_v10  ;;  %v760_v12 = vpop.xlane.xlu0 %759  ;;  %v2618_v10 = vld [vmem:[#allocation2 + $0x60] sm:$0xff] }
 0x1ba   : > { %v2536_v13 = vmax.f32 %v2524_v7, %v760_v12  ;;  %v2134_v12 = vld [vmem:[%s2503_s10 + $0x38] sm:$0xff]  }
 0x1bb   : > { %1394 = vst.msk [vmem:[#allocation2 + $0x18] sm:$0xff] %vm411_vm1, %v2533_v11  ;;  %870 = vperm.xlu1 %2110, %v2533_v11   ;;  %2037 = vmatprep.subr.bf16.mxu1 %v2134_v12 }
 0x1bc   : > { %v806_v17 = vsub.f32 %v2524_v7, %v2536_v13  ;;  %1392 = vst.msk [vmem:[#allocation2 + $0x8] sm:$0xff] %vm411_vm1, %v2536_v13  ;;  %2038 = vmatpush3.bf16.msra.mxu1 %v2134_v12 }
 0x1bd   : > { %v766_v19 = vpop.xlane.xlu0 %765 }
 0x1be   : > { %v2553_v20 = vmax.f32 %v2543_v15, %v766_v19  ;;  %v772_v21 = vpop.xlane.xlu1 %771  ;;  %v2626_v19 = vld [vmem:[#allocation2 + $0x78] sm:$0xff] }
 0x1bf   : > { %v2556_v22 = vmax.f32 %v2550_v18, %v772_v21  ;;  %860 = vperm.xlu1 %2110, %v2536_v13  }
 0x1c0   : > { %1395 = vst.msk [vmem:[#allocation2 + $0x20] sm:$0xff] %vm411_vm1, %v2553_v20 }
 0x1c1   : > { %1398 = vst.msk [vmem:[#allocation2 + $0x38] sm:$0xff] %vm411_vm1, %v2556_v22  ;;  %v770_v28 = vpop.xlane.xlu0 %769 }
 0x1c2   : > { %v2573_v30 = vmax.f32 %v2559_v23, %v770_v28  ;;  %v768_v32 = vpop.xlane.xlu1 %767 }
 0x1c3   : > { %v2576_v35 = vmax.f32 %v2566_v26, %v768_v32 }
 0x1c4   : > { %1397 = vst.msk [vmem:[#allocation2 + $0x30] sm:$0xff] %vm411_vm1, %v2573_v30  ;;  %885 = vperm.xlu1 %2110, %v2573_v30  }
 0x1c5   : > { %1396 = vst.msk [vmem:[#allocation2 + $0x28] sm:$0xff] %vm411_vm1, %v2576_v35  ;;  %v774_v45 = vpop.xlane.xlu0 %773  ;;  %v2889_v0 = vsub.f32 %v2566_v26, %v2576_v35 }
 0x1c6   : > { %v780_v46 = vpop.xlane.xlu1 %779  ;;  %v2593_v49 = vmax.f32 %v2578_v36, %v774_v45  ;;  %v2639_v45 = vld [vmem:[#allocation2 + $0x70] sm:$0xff] }
 0x1c7   : > { %v2596_v52 = vmax.f32 %v2586_v43, %v780_v46  ;;  %v831_v4 = vmul.f32 1.442695, %v2889_v0 }
 0x1c8   : > { %1399 = vst.msk [vmem:[#allocation2 + $0x40] sm:$0xff] %vm411_vm1, %v2593_v49  ;;  %875 = vperm.xlu1 %2110, %v2553_v20  }
 0x1c9   : > { %1402 = vst.msk [vmem:[#allocation2 + $0x58] sm:$0xff] %vm411_vm1, %v2596_v52  ;;  %v778_v62 = vpop.xlane.xlu0 %777 }
 0x1ca   : > { %v776_v1 = vpop.xlane.xlu1 %775  ;;  %v2613_v3 = vmax.f32 %v2598_v53, %v778_v62 }
 0x1cb   : > { %v2616_v8 = vmax.f32 %v2606_v58, %v776_v1 }
 0x1cc   : > { %1401 = vst.msk [vmem:[#allocation2 + $0x50] sm:$0xff] %vm411_vm1, %v2613_v3  ;;  %880 = vperm.xlu1 %2110, %v2576_v35   ;;  %v2895_v35 = vsub.f32 %v2586_v43, %v2596_v52 }
 0x1cd   : > { %1400 = vst.msk [vmem:[#allocation2 + $0x48] sm:$0xff] %vm411_vm1, %v2616_v8  ;;  %900 = vperm.xlu0 %2109, %v2616_v8   ;;  %v782_v24 = vpop.xlane.xlu0 %781 }
 0x1ce   : > { %v788_v28 = vpop.xlane.xlu1 %787  ;;  %v2634_v32 = vmax.f32 %v2618_v10, %v782_v24 }
 0x1cf   : > { %v2637_v37 = vmax.f32 %v2626_v19, %v788_v28 }
 0x1d0   : > { %1403 = vst.msk [vmem:[#allocation2 + $0x60] sm:$0xff] %vm411_vm1, %v2634_v32  ;;  %890 = vperm.xlu1 %2110, %v2556_v22  }
 0x1d1   : > { %1406 = vst.msk [vmem:[#allocation2 + $0x78] sm:$0xff] %vm411_vm1, %v2637_v37  ;;  %910 = vperm.xlu0 %2109, %v2596_v52   ;;  %v786_v1 = vpop.xlane.xlu0 %785 }
 0x1d2   : > { %v784_v12 = vpop.xlane.xlu1 %783  ;;  %v2654_v24 = vmax.f32 %v2639_v45, %v786_v1 }
 0x1d3   : > { %v2657_v28 = vmax.f32 %v2646_v54, %v784_v12 }
 0x1d4   : > { %1405 = vst.msk [vmem:[#allocation2 + $0x70] sm:$0xff] %vm411_vm1, %v2654_v24  ;;  %895 = vperm.xlu1 %2110, %v2593_v49  }
 0x1d5   : > { %1404 = vst.msk [vmem:[#allocation2 + $0x68] sm:$0xff] %vm411_vm1, %v2657_v28  ;;  %920 = vperm.xlu0 %2109, %v2657_v28  }
 0x1d8   : > { %905 = vperm.xlu1 %2110, %v2613_v3  }
 0x1d9   : > { %930 = vperm.xlu0 %2109, %v2637_v37  }
 0x1dc   : > { %915 = vperm.xlu1 %2110, %v2634_v32  }
 0x1e0   : > { %925 = vperm.xlu1 %2110, %v2654_v24  }
 0x236   : > { %v866_v1 = vpop.permute.xlu1 %865 }
 0x237   : > { %v856_v12 = vpop.permute.xlu0 %855  ;;  %v935_v21 = vsub.f32 %v2389_v29, %v866_v1 }
 0x238   : > { %v933_v46 = vsub.f32 %v2394_v31, %v856_v12 }
 0x239   : > { %v953_v44 = vmul.f32 1.442695, %v935_v21 }
 0x23a   : > { %v949_v61 = vmul.f32 1.442695, %v933_v46  ;;  %v871_v16 = vpop.permute.xlu1 %870 }
 0x23b   : > { %v936_v62 = vsub.f32 %v2399_v33, %v871_v16 }
 0x23c   : > { %2135 = vpow2.f32 %v949_v61 }
 0x23d   : > { %v955_v55 = vmul.f32 1.442695, %v936_v62 }
 0x23e   : > { %v861_v27 = vpop.permute.xlu1 %860 }
 0x23f   : > { %2137 = vpow2.f32 %v955_v55  ;;  %v934_v39 = vsub.f32 %v2404_v34, %v861_v27 }
 0x241   : > { %v951_v25 = vmul.f32 1.442695, %v934_v39 }
 0x243   : > { %2139 = vpow2.f32 %v951_v25  ;;  %v886_v14 = vpop.permute.xlu1 %885 }
 0x244   : > { %2141 = vpow2.f32 %v953_v44  ;;  %v939_v31 = vsub.f32 %v2419_v41, %v886_v14 }
 0x246   : > { %v2136_v6 = vpop.eup %2135  ;;  %v961_v61 = vmul.f32 1.442695, %v939_v31 }
 0x247   : > { %1013 = vadd.xlane.f32.xlu1 %v2136_v6  ;;  %v876_v46 = vpop.permute.xlu1 %875 }
 0x248   : > { %v937_v33 = vsub.f32 %v2409_v38, %v876_v46 }
 0x249   : > { %v2138_v16 = vpop.eup %2137 }
 0x24a   : > { %v957_v29 = vmul.f32 1.442695, %v937_v33 }
 0x24b   : > { %1019 = vadd.xlane.f32.xlu1 %v2138_v16  ;;  %v881_v62 = vpop.permute.xlu1 %880 }
 0x24c   : > { %2143 = vpow2.f32 %v957_v29  ;;  %v938_v34 = vsub.f32 %v2424_v42, %v881_v62  ;;  %v901_v27 = vpop.permute.xlu0 %900 }
 0x24d   : > { %v2140_v39 = vpop.eup %2139  ;;  %2145 = vpow2.f32 %v961_v61  ;;  %v942_v41 = vsub.f32 %v2443_v51, %v901_v27 }
 0x24e   : > { %v2142_v25 = vpop.eup %2141  ;;  %v959_v55 = vmul.f32 1.442695, %v938_v34  ;;  %1015 = vadd.xlane.f32.xlu0 %v2140_v39  ;;  %v1190_v44 = vpack.c.bf16 %v2140_v39, %v2136_v6 }
 0x24f   : > { %v891_v14 = vpop.permute.xlu1 %890  ;;  %v1191_v21 = vpack.c.bf16 %v2138_v16, %v2142_v25  ;;  %v967_v42 = vmul.f32 1.442695, %v942_v41 }
 0x250   : > { %2147 = vpow2.f32 %v959_v55  ;;  %v940_v38 = vsub.f32 %v2414_v40, %v891_v14  ;;  %v911_v1 = vpop.permute.xlu0 %910  ;;  %2039 = vmatprep.mubr.bf16.mxu1 %v1190_v44 }
 0x251   : > { %2040 = vmatmul.mubr.bf16.vlgmr.msra.gmra.mrb[0].mxu1 %v1191_v21  ;;  %v944_v31 = vsub.f32 %v2433_v48, %v911_v1 }
 0x252   : > { %v963_v12 = vmul.f32 1.442695, %v940_v38  ;;  %1017 = vadd.xlane.f32.xlu0 %v2142_v25 }
 0x253   : > { %v896_v46 = vpop.permute.xlu1 %895  ;;  %v971_v16 = vmul.f32 1.442695, %v944_v31 }
 0x254   : > { %2149 = vpow2.f32 %v963_v12  ;;  %v941_v6 = vsub.f32 %v2429_v47, %v896_v46  ;;  %v921_v33 = vpop.permute.xlu0 %920 }
 0x255   : > { %2151 = vpow2.f32 %v967_v42  ;;  %v946_v61 = vsub.f32 %v2495_v60, %v921_v33 }
 0x256   : > { %v2144_v29 = vpop.eup %2143  ;;  %v965_v51 = vmul.f32 1.442695, %v941_v6 }
 0x257   : > { %1021 = vadd.xlane.f32.xlu0 %v2144_v29  ;;  %v906_v40 = vpop.permute.xlu1 %905  ;;  %v2146_v27 = vpop.eup %2145  ;;  %v975_v25 = vmul.f32 1.442695, %v946_v61 }
 0x258   : > { %2153 = vpow2.f32 %v965_v51  ;;  %v943_v62 = vsub.f32 %v2439_v50, %v906_v40  ;;  %v931_v34 = vpop.permute.xlu0 %930  ;;  %v823_v40 = vmul.f32 1.442695, %v806_v17 }
 0x259   : > { %2155 = vpow2.f32 %v971_v16  ;;  %v948_v47 = vsub.f32 %v2485_v57, %v931_v34  ;;  %v2886_v34 = vsub.f32 %v2507_v63, %v2512_v2  ;;  %v2890_v63 = vsub.f32 %v2559_v23, %v2573_v30 }
 0x25a   : > { %v2148_v39 = vpop.eup %2147  ;;  %v969_v48 = vmul.f32 1.442695, %v943_v62  ;;  %v821_v62 = vmul.f32 1.442695, %v805_v9  ;;  %v2891_v9 = vsub.f32 %v2550_v18, %v2556_v22  ;;  %v2894_v18 = vsub.f32 %v2598_v53, %v2613_v3 }
 0x25b   : > { %1025 = vadd.xlane.f32.xlu0 %v2146_v27  ;;  %v916_v55 = vpop.permute.xlu1 %915  ;;  %v1192_v44 = vpack.c.bf16 %v2148_v39, %v2144_v29  ;;  %v979_v21 = vmul.f32 1.442695, %v948_v47  ;;  %v833_v2 = vmul.f32 1.442695, %v2890_v63  ;;  %v2897_v53 = vsub.f32 %v2646_v54, %v2657_v28 }
 0x25c   : > { %2157 = vpow2.f32 %v969_v48  ;;  %v945_v41 = vsub.f32 %v2481_v56, %v916_v55  ;;  %v841_v22 = vmul.f32 1.442695, %v2894_v18  ;;  %v2899_v63 = vsub.f32 %v2639_v45, %v2654_v24  ;;  %v991_v18 = vld [vmem:[#allocation3 + $0x50] sm:$0xff] }
 0x25d   : > { %2043 = vmatprep.mubr.bf16.mxu1 %v1192_v44  ;;  %2159 = vpow2.f32 %v975_v25  ;;  %v2888_v25 = vsub.f32 %v2543_v15, %v2553_v20  ;;  %v2892_v15 = vsub.f32 %v2578_v36, %v2593_v49  ;;  %v2893_v20 = vsub.f32 %v2606_v58, %v2616_v8 }
 0x25e   : > { %v2150_v60 = vpop.eup %2149  ;;  %v973_v14 = vmul.f32 1.442695, %v945_v41  ;;  %v843_v36 = vmul.f32 1.442695, %v2895_v35  ;;  %v2896_v58 = vsub.f32 %v2618_v10, %v2634_v32  ;;  %v847_v3 = vmul.f32 1.442695, %v2897_v53 }
 0x25f   : > { %1027 = vadd.xlane.f32.xlu1 %v2150_v60  ;;  %v926_v50 = vpop.permute.xlu1 %925  ;;  %v1193_v38 = vpack.c.bf16 %v2150_v60, %v2146_v27  ;;  %v2152_v12 = vpop.eup %2151  ;;  %v825_v27 = vmul.f32 1.442695, %v2886_v34  ;;  %v829_v7 = vmul.f32 1.442695, %v2888_v25  ;;  %v837_v17 = vmul.f32 1.442695, %v2892_v15 }
 0x260   : > { %2161 = vpow2.f32 %v973_v14  ;;  %v947_v1 = vsub.f32 %v2491_v59, %v926_v50  ;;  %v839_v23 = vmul.f32 1.442695, %v2893_v20  ;;  %v845_v8 = vmul.f32 1.442695, %v2896_v58  ;;  %v1562_v41 = vld [vmem:[%s2883_s4] sm:$0xf] }
 0x261   : > { %2044 = vmatmul.mubr.bf16.gmra.mrb[4].mxu1 %v1193_v38  ;;  %2163 = vpow2.f32 %v979_v21  ;;  %2081 = vmatprep.subr.msk.bf16.mxu1 %vm1594_vm3, %v1562_v41  ;;  %v1596_v60 = vsel %vm1594_vm3, %v1562_v41, 0  ;;  %v981_v14 = vld [vmem:[#allocation3] sm:$0xff]  ;;  %v984_v38 = vld [vmem:[#allocation3 + $0x18] sm:$0xff]  ;;  %v987_v34 = vld [vmem:[#allocation3 + $0x30] sm:$0xff]  ;;  %v2898_v25 = vsub.f32 %v2626_v19, %v2637_v37 }
 0x262   : > { %v2154_v57 = vpop.eup %2153  ;;  %v977_v42 = vmul.f32 1.442695, %v947_v1  ;;  %2056 = vmatpush3.bf16.msra.mxu1 %v1596_v60  ;;  %v986_v20 = vld [vmem:[#allocation3 + $0x28] sm:$0xff] }
 0x263   : > { %1023 = vadd.xlane.f32.xlu1 %v2148_v39  ;;  %1029 = vadd.xlane.f32.xlu0 %v2154_v57  ;;  %v1194_v31 = vpack.c.bf16 %v2152_v12, %v2154_v57  ;;  %v2156_v56 = vpop.eup %2155  ;;  %v2887_v39 = vsub.f32 %v2517_v5, %v2533_v11  ;;  %v835_v5 = vmul.f32 1.442695, %v2891_v9  ;;  %v982_v57 = vld [vmem:[#allocation3 + $0x8] sm:$0xff] }
 0x264   : > { %2165 = vpow2.f32 %v977_v42 }
 0x265   : > { %2047 = vmatprep.mubr.bf16.mxu1 %v1194_v31  ;;  %2167 = vpow2.f32 %v823_v40  ;;  %v827_v48 = vmul.f32 1.442695, %v2887_v39 }
 0x266   : > { %v2158_v46 = vpop.eup %2157  ;;  %2169 = vpow2.f32 %v821_v62 }
 0x267   : > { %1035 = vadd.xlane.f32.xlu1 %v2156_v56  ;;  %1033 = vadd.xlane.f32.xlu0 %v2158_v46  ;;  %v1195_v6 = vpack.c.bf16 %v2156_v56, %v2158_v46  ;;  %v2160_v33 = vpop.eup %2159  ;;  %2171 = vpow2.f32 %v825_v27 }
 0x268   : > { %2173 = vpow2.f32 %v827_v48 }
 0x269   : > { %2048 = vmatmul.mubr.bf16.gmra.mrb[8].mxu1 %v1195_v6  ;;  %2175 = vpow2.f32 %v829_v7  ;;  %v983_v6 = vld [vmem:[#allocation3 + $0x10] sm:$0xff]  ;;  %v851_v7 = vmul.f32 1.442695, %v2898_v25 }
 0x26a   : > { %v2162_v29 = vpop.eup %2161  ;;  %2177 = vpow2.f32 %v831_v4  ;;  %v988_v4 = vld [vmem:[#allocation3 + $0x38] sm:$0xff] }
 0x26b   : > { %1031 = vadd.xlane.f32.xlu1 %v2152_v12  ;;  %1037 = vadd.xlane.f32.xlu0 %v2162_v29  ;;  %v1196_v59 = vpack.c.bf16 %v2160_v33, %v2162_v29  ;;  %v2164_v51 = vpop.eup %2163  ;;  %2179 = vpow2.f32 %v833_v2  ;;  %v849_v2 = vmul.f32 1.442695, %v2899_v63 }
 0x26c   : > { %2181 = vpow2.f32 %v835_v5 }
 0x26d   : > { %2051 = vmatprep.mubr.bf16.mxu1 %v1196_v59  ;;  %2183 = vpow2.f32 %v837_v17  ;;  %v989_v17 = vld [vmem:[#allocation3 + $0x40] sm:$0xff] }
 0x26e   : > { %v2166_v16 = vpop.eup %2165  ;;  %2185 = vpow2.f32 %v839_v23 }
 0x26f   : > { %1043 = vadd.xlane.f32.xlu1 %v2164_v51  ;;  %1041 = vadd.xlane.f32.xlu0 %v2166_v16  ;;  %v1197_v61 = vpack.c.bf16 %v2164_v51, %v2166_v16  ;;  %v2168_v11 = vpop.eup %2167  ;;  %2187 = vpow2.f32 %v841_v22  ;;  %v985_v16 = vld [vmem:[#allocation3 + $0x20] sm:$0xff]  ;;  %v992_v22 = vld [vmem:[#allocation3 + $0x58] sm:$0xff] }
 0x270   : > { %v2170_v13 = vpop.eup %2169  ;;  %2189 = vpow2.f32 %v843_v36  ;;  %v998_v56 = vmul.f32 %v2168_v11, %v982_v57  ;;  %v995_v57 = vld [vmem:[#allocation3 + $0x70] sm:$0xff] }
 0x271   : > { %2052 = vmatmul.mubr.bf16.gmra.mrb[12].mxu1 %v1197_v61  ;;  %v2172_v26 = vpop.eup %2171  ;;  %2191 = vpow2.f32 %v845_v8  ;;  %v997_v21 = vmul.f32 %v2170_v13, %v981_v14 }
 0x272   : > { %v2174_v30 = vpop.eup %2173  ;;  %2193 = vpow2.f32 %v847_v3  ;;  %v999_v29 = vmul.f32 %v2172_v26, %v983_v6 }
 0x273   : > { %1039 = vadd.xlane.f32.xlu1 %v2160_v33  ;;  %v2176_v49 = vpop.eup %2175  ;;  %v1000_v12 = vmul.f32 %v2174_v30, %v984_v38 }
 0x274   : > { %v2725_v47 = vpop.eup %2177  ;;  %v1001_v40 = vmul.f32 %v2176_v49, %v985_v16 }
 0x275   : > { %v2180_v55 = vpop.eup %2179  ;;  %v1002_v45 = vmul.f32 %v2725_v47, %v986_v20 }
 0x276   : > { %v2182_v43 = vpop.eup %2181  ;;  %v1003_v48 = vmul.f32 %v2180_v55, %v987_v34 }
 0x277   : > { %v2734_v52 = vpop.eup %2183 }
 0x278   : > { %v2736_v44 = vpop.eup %2185  ;;  %v1005_v37 = vmul.f32 %v2734_v52, %v989_v17 }
 0x279   : > { %v2740_v10 = vpop.eup %2187 }
 0x27a   : > { %v2742_v32 = vpop.eup %2189  ;;  %v1007_v58 = vmul.f32 %v2740_v10, %v991_v18 }
 0x27b   : > { %v2746_v54 = vpop.eup %2191  ;;  %v1008_v8 = vmul.f32 %v2742_v32, %v992_v22  ;;  %v1079_v22 = vld [vmem:[#allocation4 + $0x8] sm:$0xff] }
 0x27c   : > { %v2748_v28 = vpop.eup %2193 }
 0x284   : > { %1101 = vperm.xlu1 %2110, %v2168_v11   ;;  %v1004_v11 = vmul.f32 %v2182_v43, %v988_v4 }
 0x285   : > { %1096 = vperm.xlu0 %2109, %v2170_v13  }
 0x288   : > { %1106 = vperm.xlu1 %2110, %v2172_v26  }
 0x289   : > { %1111 = vperm.xlu0 %2109, %v2174_v30  }
 0x28c   : > { %1116 = vperm.xlu1 %2110, %v2176_v49  }
 0x28d   : > { %1121 = vperm.xlu0 %2109, %v2725_v47  }
 0x290   : > { %1126 = vperm.xlu1 %2110, %v2180_v55  }
 0x291   : > { %1131 = vperm.xlu0 %2109, %v2182_v43   ;;  %v993_v43 = vld [vmem:[#allocation3 + $0x60] sm:$0xff] }
 0x294   : > { %1136 = vperm.xlu1 %2110, %v2734_v52   ;;  %v990_v52 = vld [vmem:[#allocation3 + $0x48] sm:$0xff] }
 0x295   : > { %1141 = vperm.xlu0 %2109, %v2736_v44  }
 0x298   : > { %1146 = vperm.xlu1 %2110, %v2740_v10   ;;  %v1009_v10 = vmul.f32 %v2746_v54, %v993_v43 }
 0x299   : > { %1151 = vperm.xlu0 %2109, %v2742_v32   ;;  %v1006_v32 = vmul.f32 %v2736_v44, %v990_v52  ;;  %v994_v44 = vld [vmem:[#allocation3 + $0x68] sm:$0xff] }
 0x29c   : > { %1156 = vperm.xlu1 %2110, %v2746_v54  }
 0x29d   : > { %1161 = vperm.xlu0 %2109, %v2748_v28  }
 0x2d4   : > { %v1014_v50 = vpop.xlane.xlu1 %1013 }
 0x2d5   : > { %v1045_v1 = vadd.f32 %v1014_v50, %v997_v21 }
 0x2d7   : > { %1062 = vst.msk [vmem:[#allocation3] sm:$0xff] %vm411_vm1, %v1045_v1 }
 0x2d8   : > { %v1020_v42 = vpop.xlane.xlu1 %1019 }
 0x2d9   : > { %v1048_v31 = vadd.f32 %v1020_v42, %v1000_v12  ;;  %v996_v42 = vld [vmem:[#allocation3 + $0x78] sm:$0xff] }
 0x2db   : > { %1065 = vst.msk [vmem:[#allocation3 + $0x18] sm:$0xff] %vm411_vm1, %v1048_v31  ;;  %v1016_v46 = vpop.xlane.xlu0 %1015 }
 0x2dc   : > { %v1046_v33 = vadd.f32 %v1016_v46, %v998_v56 }
 0x2de   : > { %1063 = vst.msk [vmem:[#allocation3 + $0x8] sm:$0xff] %vm411_vm1, %v1046_v33  ;;  %v1426_v13 = vld [vmem:[#allocation3] sm:$0xff] }
 0x2df   : > { %v1018_v59 = vpop.xlane.xlu0 %1017 }
 0x2e0   : > { %v1047_v51 = vadd.f32 %v1018_v59, %v999_v29 }
 0x2e2   : > { %1064 = vst.msk [vmem:[#allocation3 + $0x10] sm:$0xff] %vm411_vm1, %v1047_v51  ;;  %v1429_v61 = vld [vmem:[#allocation3 + $0x18] sm:$0xff] }
 0x2e3   : > { %2195 = vrcp.f32 %v1429_v61 }
 0x2e4   : > { %v1022_v62 = vpop.xlane.xlu0 %1021 }
 0x2e5   : > { %v1049_v27 = vadd.f32 %v1022_v62, %v1001_v40  ;;  %v1427_v39 = vld [vmem:[#allocation3 + $0x8] sm:$0xff]  ;;  %v1010_v40 = vmul.f32 %v2748_v28, %v994_v44 }
 0x2e6   : > { %2197 = vrcp.f32 %v1427_v39 }
 0x2e7   : > { %1066 = vst.msk [vmem:[#allocation3 + $0x20] sm:$0xff] %vm411_vm1, %v1049_v27 }
 0x2e8   : > { %v1026_v0 = vpop.xlane.xlu0 %1025 }
 0x2e9   : > { %v1051_v9 = vadd.f32 %v1026_v0, %v1003_v48  ;;  %v1428_v5 = vld [vmem:[#allocation3 + $0x10] sm:$0xff] }
 0x2ea   : > { %2199 = vrcp.f32 %v1428_v5 }
 0x2eb   : > { %1068 = vst.msk [vmem:[#allocation3 + $0x30] sm:$0xff] %vm411_vm1, %v1051_v9  ;;  %2201 = vpow2.f32 %v851_v7 }
 0x2ec   : > { %v1028_v15 = vpop.xlane.xlu1 %1027  ;;  %2203 = vpow2.f32 %v849_v2 }
 0x2ed   : > { %v2196_v23 = vpop.eup %2195  ;;  %v1052_v19 = vadd.f32 %v1028_v15, %v1004_v11  ;;  %2205 = vrcp.f32 %v1426_v13 }
 0x2ee   : > { %1475 = vperm.xlu0 %2109, %v2196_v23   ;;  %v1430_v53 = vld [vmem:[#allocation3 + $0x20] sm:$0xff] }
 0x2ef   : > { %1069 = vst.msk [vmem:[#allocation3 + $0x38] sm:$0xff] %vm411_vm1, %v1052_v19 }
 0x2f0   : > { %v2198_v24 = vpop.eup %2197  ;;  %v1030_v26 = vpop.xlane.xlu0 %1029 }
 0x2f1   : > { %v1024_v30 = vpop.xlane.xlu1 %1023  ;;  %v1053_v35 = vadd.f32 %v1030_v26, %v1005_v37  ;;  %v1078_v26 = vld [vmem:[#allocation4] sm:$0xff] }
 0x2f2   : > { %v1050_v36 = vadd.f32 %v1024_v30, %v1002_v45  ;;  %1465 = vperm.xlu0 %2109, %v2198_v24   ;;  %v1432_v49 = vld [vmem:[#allocation3 + $0x30] sm:$0xff]  ;;  %v1081_v30 = vld [vmem:[#allocation4 + $0x18] sm:$0xff] }
 0x2f3   : > { %1070 = vst.msk [vmem:[#allocation3 + $0x40] sm:$0xff] %vm411_vm1, %v1053_v35  ;;  %2207 = vrcp.f32 %v1432_v49  ;;  %v1080_v45 = vld [vmem:[#allocation4 + $0x10] sm:$0xff] }
 0x2f4   : > { %1067 = vst.msk [vmem:[#allocation3 + $0x28] sm:$0xff] %vm411_vm1, %v1050_v36  ;;  %v2200_v47 = vpop.eup %2199  ;;  %v1034_v3 = vpop.xlane.xlu0 %1033  ;;  %2209 = vrcp.f32 %v1430_v53 }
 0x2f5   : > { %v1036_v55 = vpop.xlane.xlu1 %1035  ;;  %v1055_v41 = vadd.f32 %v1034_v3, %v1007_v58  ;;  %1470 = vperm.xlu1 %2110, %v2200_v47   ;;  %v2202_v14 = vpop.eup %2201 }
 0x2f6   : > { %v1056_v60 = vadd.f32 %v1036_v55, %v1008_v8  ;;  %v1433_v21 = vld [vmem:[#allocation3 + $0x38] sm:$0xff]  ;;  %v2204_v50 = vpop.eup %2203  ;;  %v1012_v33 = vmul.f32 %v2202_v14, %v996_v42 }
 0x2f7   : > { %1072 = vst.msk [vmem:[#allocation3 + $0x50] sm:$0xff] %vm411_vm1, %v1055_v41  ;;  %2211 = vrcp.f32 %v1433_v21  ;;  %v2206_v38 = vpop.eup %2205  ;;  %v1011_v6 = vmul.f32 %v2204_v50, %v995_v57 }
 0x2f8   : > { %1073 = vst.msk [vmem:[#allocation3 + $0x58] sm:$0xff] %vm411_vm1, %v1056_v60  ;;  %v1038_v1 = vpop.xlane.xlu0 %1037 }
 0x2f9   : > { %v1032_v12 = vpop.xlane.xlu1 %1031  ;;  %v1057_v31 = vadd.f32 %v1038_v1, %v1009_v10  ;;  %1460 = vperm.xlu1 %2110, %v2206_v38   ;;  %v1084_v10 = vld [vmem:[#allocation4 + $0x30] sm:$0xff]  ;;  %v1085_v38 = vld [vmem:[#allocation4 + $0x38] sm:$0xff] }
 0x2fa   : > { %v1054_v56 = vadd.f32 %v1032_v12, %v1006_v32  ;;  %v1434_v59 = vld [vmem:[#allocation3 + $0x40] sm:$0xff]  ;;  %v1083_v12 = vld [vmem:[#allocation4 + $0x28] sm:$0xff] }
 0x2fb   : > { %v1431_v46 = vld [vmem:[#allocation3 + $0x28] sm:$0xff]  ;;  %1074 = vst.msk [vmem:[#allocation3 + $0x60] sm:$0xff] %vm411_vm1, %v1057_v31  ;;  %v1082_v32 = vld [vmem:[#allocation4 + $0x20] sm:$0xff] }
 0x2fc   : > { %1071 = vst.msk [vmem:[#allocation3 + $0x48] sm:$0xff] %vm411_vm1, %v1054_v56  ;;  %2213 = vrcp.f32 %v1431_v46  ;;  %v1042_v54 = vpop.xlane.xlu0 %1041 }
 0x2fd   : > { %v1044_v29 = vpop.xlane.xlu1 %1043  ;;  %v2208_v51 = vpop.eup %2207  ;;  %v1059_v16 = vadd.f32 %v1042_v54, %v1011_v6  ;;  %2215 = vrcp.f32 %v1434_v59 }
 0x2fe   : > { %v1060_v61 = vadd.f32 %v1044_v29, %v1012_v33  ;;  %1490 = vperm.xlu1 %2110, %v2208_v51   ;;  %v1436_v62 = vld [vmem:[#allocation3 + $0x50] sm:$0xff]  ;;  %v2210_v34 = vpop.eup %2209 }
 0x2ff   : > { %1076 = vst.msk [vmem:[#allocation3 + $0x70] sm:$0xff] %vm411_vm1, %v1059_v16  ;;  %2217 = vrcp.f32 %v1436_v62  ;;  %v1437_v7 = vld [vmem:[#allocation3 + $0x58] sm:$0xff]  ;;  %v1088_v16 = vld [vmem:[#allocation4 + $0x50] sm:$0xff]  ;;  %v1086_v62 = vld [vmem:[#allocation4 + $0x40] sm:$0xff] }
 0x300   : > { %1077 = vst.msk [vmem:[#allocation3 + $0x78] sm:$0xff] %vm411_vm1, %v1060_v61 }
 0x301   : > { %v1040_v27 = vpop.xlane.xlu1 %1039  ;;  %v2212_v39 = vpop.eup %2211 }
 0x302   : > { %v1058_v48 = vadd.f32 %v1040_v27, %v1010_v40  ;;  %1480 = vperm.xlu1 %2110, %v2210_v34   ;;  %1495 = vperm.xlu0 %2109, %v2212_v39   ;;  %v1438_v0 = vld [vmem:[#allocation3 + $0x60] sm:$0xff]  ;;  %v1089_v34 = vld [vmem:[#allocation4 + $0x58] sm:$0xff]  ;;  %v1087_v39 = vld [vmem:[#allocation4 + $0x48] sm:$0xff] }
 0x303   : > { %v1435_v25 = vld [vmem:[#allocation3 + $0x48] sm:$0xff] }
 0x304   : > { %1075 = vst.msk [vmem:[#allocation3 + $0x68] sm:$0xff] %vm411_vm1, %v1058_v48  ;;  %2219 = vrcp.f32 %v1435_v25  ;;  %v1097_v37 = vpop.permute.xlu0 %1096 }
 0x305   : > { %2221 = vrcp.f32 %v1437_v7  ;;  %v1102_v19 = vpop.permute.xlu1 %1101  ;;  %v1174_v36 = vmul.f32 %v1097_v37, %v1078_v26 }
 0x306   : > { %v2214_v4 = vpop.eup %2213  ;;  %1166 = vperm.xlu1 %2110, %v2204_v50   ;;  %2223 = vrcp.f32 %v1438_v0  ;;  %v1440_v28 = vld [vmem:[#allocation3 + $0x70] sm:$0xff]  ;;  %v1175_v47 = vmul.f32 %v1102_v19, %v1079_v22 }
 0x307   : > { %1485 = vperm.xlu0 %2109, %v2214_v4   ;;  %v2216_v63 = vpop.eup %2215  ;;  %2225 = vrcp.f32 %v1440_v28  ;;  %v1441_v5 = vld [vmem:[#allocation3 + $0x78] sm:$0xff] }
 0x308   : > { %v1112_v18 = vpop.permute.xlu0 %1111 }
 0x309   : > { %v2218_v9 = vpop.eup %2217  ;;  %v1107_v24 = vpop.permute.xlu1 %1106  ;;  %v1177_v58 = vmul.f32 %v1112_v18, %v1081_v30 }
 0x30a   : > { %1500 = vperm.xlu1 %2110, %v2216_v63   ;;  %v1176_v35 = vmul.f32 %v1107_v24, %v1080_v45 }
 0x30b   : > { %1171 = vperm.xlu0 %2109, %v2202_v14   ;;  %v1439_v2 = vld [vmem:[#allocation3 + $0x68] sm:$0xff] }
 0x30c   : > { %2227 = vrcp.f32 %v1439_v2  ;;  %v1122_v60 = vpop.permute.xlu0 %1121 }
 0x30d   : > { %2229 = vrcp.f32 %v1441_v5  ;;  %v1117_v3 = vpop.permute.xlu1 %1116  ;;  %v1179_v54 = vmul.f32 %v1122_v60, %v1083_v12 }
 0x30e   : > { %v2220_v11 = vpop.eup %2219  ;;  %1510 = vperm.xlu1 %2110, %v2218_v9   ;;  %v1178_v42 = vmul.f32 %v1117_v3, %v1082_v32  ;;  %v1092_v32 = vld [vmem:[#allocation4 + $0x70] sm:$0xff] }
 0x30f   : > { %1505 = vperm.xlu0 %2109, %v2220_v11   ;;  %v2222_v13 = vpop.eup %2221 }
 0x310   : > { %v2224_v15 = vpop.eup %2223  ;;  %v1132_v50 = vpop.permute.xlu0 %1131 }
 0x311   : > { %v2226_v17 = vpop.eup %2225  ;;  %v1127_v21 = vpop.permute.xlu1 %1126  ;;  %v1181_v46 = vmul.f32 %v1132_v50, %v1085_v38 }
 0x312   : > { %1520 = vperm.xlu1 %2110, %v2224_v15   ;;  %v1180_v57 = vmul.f32 %v1127_v21, %v1084_v10  ;;  %v1090_v15 = vld [vmem:[#allocation4 + $0x60] sm:$0xff] }
 0x313   : > { %1515 = vperm.xlu0 %2109, %v2222_v13  }
 0x314   : > { %v1142_v31 = vpop.permute.xlu0 %1141 }
 0x315   : > { %v1137_v1 = vpop.permute.xlu1 %1136  ;;  %v1183_v63 = vmul.f32 %v1142_v31, %v1087_v39 }
 0x316   : > { %v2228_v20 = vpop.eup %2227  ;;  %1530 = vperm.xlu1 %2110, %v2226_v17   ;;  %v1182_v25 = vmul.f32 %v1137_v1, %v1086_v62 }
 0x317   : > { %1525 = vperm.xlu0 %2109, %v2228_v20   ;;  %v2230_v23 = vpop.eup %2229  ;;  %v1091_v20 = vld [vmem:[#allocation4 + $0x68] sm:$0xff] }
 0x318   : > { %v1152_v27 = vpop.permute.xlu0 %1151 }
 0x319   : > { %v1147_v61 = vpop.permute.xlu1 %1146  ;;  %v1185_v0 = vmul.f32 %v1152_v27, %v1089_v34 }
 0x31a   : > { %v1184_v48 = vmul.f32 %v1147_v61, %v1088_v16 }
 0x31b   : > { %1535 = vperm.xlu0 %2109, %v2230_v23  }
 0x31c   : > { %v1162_v23 = vpop.permute.xlu0 %1161 }
 0x31d   : > { %v1157_v17 = vpop.permute.xlu1 %1156  ;;  %v1187_v24 = vmul.f32 %v1162_v23, %v1091_v20 }
 0x31e   : > { %v1186_v19 = vmul.f32 %v1157_v17, %v1090_v15 }
 0x324   : > { %v2041_v49 = vpop.f32.mrb[0].mxu1 }
 0x325   : > { %v1361_v8 = vadd.f32 %v2041_v49, %v1176_v35  ;;  %v1296_v53 = vpop.f32.mrb[1].mxu1 }
 0x326   : > { %v1359_v55 = vadd.f32 %v1296_v53, %v1174_v36  ;;  %v2042_v43 = vpop.f32.mrb[2].mxu1 }
 0x327   : > { %1377 = vst.msk [vmem:[#allocation4 + $0x10] sm:$0xff] %vm444_vm0, %v1361_v8  ;;  %v1362_v52 = vadd.f32 %v2042_v43, %v1177_v58  ;;  %v1299_v41 = vpop.f32.mrb[3].mxu1 }
 0x328   : > { %1375 = vst.msk [vmem:[#allocation4] sm:$0xff] %vm444_vm0, %v1359_v55  ;;  %v1360_v14 = vadd.f32 %v1299_v41, %v1175_v47 }
 0x329   : > { %1378 = vst.msk [vmem:[#allocation4 + $0x18] sm:$0xff] %vm444_vm0, %v1362_v52 }
 0x32a   : > { %1376 = vst.msk [vmem:[#allocation4 + $0x8] sm:$0xff] %vm444_vm0, %v1360_v14 }
 0x32e   : > { %v1412_v58 = vld [vmem:[#allocation4 + $0x10] sm:$0xff] }
 0x32f   : > { %v1410_v47 = vld [vmem:[#allocation4] sm:$0xff] }
 0x330   : > { %v1413_v55 = vld [vmem:[#allocation4 + $0x18] sm:$0xff] }
 0x331   : > { %v1411_v8 = vld [vmem:[#allocation4 + $0x8] sm:$0xff] }
 0x334   : > { %v2045_v56 = vpop.f32.mrb[4].mxu1 }
 0x335   : > { %v1365_v6 = vadd.f32 %v2045_v56, %v1180_v57  ;;  %v1312_v33 = vpop.f32.mrb[5].mxu1 }
 0x336   : > { %v1363_v29 = vadd.f32 %v1312_v33, %v1178_v42  ;;  %v2046_v44 = vpop.f32.mrb[6].mxu1 }
 0x337   : > { %1381 = vst.msk [vmem:[#allocation4 + $0x30] sm:$0xff] %vm444_vm0, %v1365_v6  ;;  %v1366_v59 = vadd.f32 %v2046_v44, %v1181_v46  ;;  %v1315_v51 = vpop.f32.mrb[7].mxu1 }
 0x338   : > { %1379 = vst.msk [vmem:[#allocation4 + $0x20] sm:$0xff] %vm444_vm0, %v1363_v29  ;;  %v1364_v40 = vadd.f32 %v1315_v51, %v1179_v54  ;;  %v1093_v29 = vld [vmem:[#allocation4 + $0x78] sm:$0xff] }
 0x339   : > { %1382 = vst.msk [vmem:[#allocation4 + $0x38] sm:$0xff] %vm444_vm0, %v1366_v59 }
 0x33a   : > { %1380 = vst.msk [vmem:[#allocation4 + $0x28] sm:$0xff] %vm444_vm0, %v1364_v40 }
 0x33c   : > { %v2049_v7 = vpop.f32.mrb[8].mxu1 }
 0x33d   : > { %v1369_v4 = vadd.f32 %v2049_v7, %v1184_v48  ;;  %v1328_v28 = vpop.f32.mrb[9].mxu1 }
 0x33e   : > { %v1367_v2 = vadd.f32 %v1328_v28, %v1182_v25  ;;  %v2050_v9 = vpop.f32.mrb[10].mxu1  ;;  %v1416_v56 = vld [vmem:[#allocation4 + $0x30] sm:$0xff] }
 0x33f   : > { %1385 = vst.msk [vmem:[#allocation4 + $0x50] sm:$0xff] %vm444_vm0, %v1369_v4  ;;  %v1370_v5 = vadd.f32 %v2050_v9, %v1185_v0  ;;  %v1331_v11 = vpop.f32.mrb[11].mxu1  ;;  %v1414_v12 = vld [vmem:[#allocation4 + $0x20] sm:$0xff] }
 0x340   : > { %1383 = vst.msk [vmem:[#allocation4 + $0x40] sm:$0xff] %vm444_vm0, %v1367_v2  ;;  %v1368_v13 = vadd.f32 %v1331_v11, %v1183_v63  ;;  %v1417_v38 = vld [vmem:[#allocation4 + $0x38] sm:$0xff] }
 0x341   : > { %1386 = vst.msk [vmem:[#allocation4 + $0x58] sm:$0xff] %vm444_vm0, %v1370_v5  ;;  %v1415_v57 = vld [vmem:[#allocation4 + $0x28] sm:$0xff] }
 0x342   : > { %1384 = vst.msk [vmem:[#allocation4 + $0x48] sm:$0xff] %vm444_vm0, %v1368_v13 }
 0x344   : > { %v2053_v37 = vpop.f32.mrb[12].mxu1 }
 0x345   : > { %v1344_v45 = vpop.f32.mrb[13].mxu1 }
 0x346   : > { %v1371_v26 = vadd.f32 %v1344_v45, %v1186_v19  ;;  %v2054_v30 = vpop.f32.mrb[14].mxu1  ;;  %v1420_v4 = vld [vmem:[#allocation4 + $0x50] sm:$0xff] }
 0x347   : > { %v1347_v18 = vpop.f32.mrb[15].mxu1  ;;  %v1418_v34 = vld [vmem:[#allocation4 + $0x40] sm:$0xff] }
 0x348   : > { %1387 = vst.msk [vmem:[#allocation4 + $0x60] sm:$0xff] %vm444_vm0, %v1371_v26  ;;  %v1372_v22 = vadd.f32 %v1347_v18, %v1187_v24  ;;  %v1421_v28 = vld [vmem:[#allocation4 + $0x58] sm:$0xff] }
 0x349   : > { %v1419_v27 = vld [vmem:[#allocation4 + $0x48] sm:$0xff] }
 0x34a   : > { %1388 = vst.msk [vmem:[#allocation4 + $0x68] sm:$0xff] %vm444_vm0, %v1372_v22 }
 0x34f   : > { %v1422_v13 = vld [vmem:[#allocation4 + $0x60] sm:$0xff] }
 0x351   : > { %v1423_v15 = vld [vmem:[#allocation4 + $0x68] sm:$0xff] }
 0x36d   : > { %v1476_v35 = vpop.permute.xlu0 %1475 }
 0x36e   : > { %v1541_v41 = vmul.f32 %v1476_v35, %v1413_v55  ;;  %v2815_v35 = vld [vmem:[%s2884_s5] ss:$0 sm:$0xff]  ;;  %v1702_v55 = vld [vmem:[%s364_s16 + $0x38] sm:$0xff] }
 0x371   : > { %v1466_v49 = vpop.permute.xlu0 %1465 }
 0x372   : > { %v1539_v43 = vmul.f32 %v1466_v49, %v1411_v8  ;;  %v1695_v49 = vld [vmem:[%s364_s16] sm:$0xff]  ;;  %v1698_v8 = vld [vmem:[%s364_s16 + $0x18] sm:$0xff] }
 0x374   : > { %v1471_v36 = vpop.permute.xlu1 %1470 }
 0x375   : > { %v1540_v53 = vmul.f32 %v1471_v36, %v1412_v58  ;;  %v1697_v36 = vld [vmem:[%s364_s16 + $0x10] sm:$0xff] }
 0x377   : > { %v1555_v14 = vpack.c.bf16 %v1541_v41, %v1540_v53  ;;  %v1696_v53 = vld [vmem:[%s364_s16 + $0x8] sm:$0xff]  ;;  %v1703_v41 = vld [vmem:[%s364_s16 + $0x40] sm:$0xff] }
 0x378   : > { %v1461_v3 = vpop.permute.xlu1 %1460 }
 0x379   : > { %v1538_v52 = vmul.f32 %v1461_v3, %v1410_v47  ;;  %v1701_v47 = vld [vmem:[%s364_s16 + $0x30] sm:$0xff]  ;;  %v1699_v3 = vld [vmem:[%s364_s16 + $0x20] sm:$0xff] }
 0x37b   : > { %v1554_v60 = vpack.c.bf16 %v1539_v43, %v1538_v52  ;;  %v1700_v43 = vld [vmem:[%s364_s16 + $0x28] sm:$0xff]  ;;  %v1705_v52 = vld [vmem:[%s364_s16 + $0x50] sm:$0xff] }
 0x37d   : > { %2057 = vmatprep.mubr.msk.bf16.mxu1 %vm444_vm0, %v1554_v60  ;;  %v1491_v21 = vpop.permute.xlu1 %1490 }
 0x37e   : > { %2058 = vmatmul.mubr.msk.bf16.vlgmr.msra.gmra.mrb[16].mxu1 %vm444_vm0, %v1555_v14  ;;  %v1544_v54 = vmul.f32 %v1491_v21, %v1416_v56  ;;  %v1706_v21 = vld [vmem:[%s364_s16 + $0x58] sm:$0xff] }
 0x381   : > { %v1496_v50 = vpop.permute.xlu0 %1495  ;;  %v1481_v10 = vpop.permute.xlu1 %1480 }
 0x382   : > { %v1545_v1 = vmul.f32 %v1496_v50, %v1417_v38  ;;  %v1542_v46 = vmul.f32 %v1481_v10, %v1414_v12  ;;  %v1704_v50 = vld [vmem:[%s364_s16 + $0x48] sm:$0xff]  ;;  %v1709_v10 = vld [vmem:[%s364_s16 + $0x70] sm:$0xff]  ;;  %v1710_v12 = vld [vmem:[%s364_s16 + $0x78] sm:$0xff] }
 0x384   : > { %v1557_v51 = vpack.c.bf16 %v1545_v1, %v1544_v54  ;;  %v1707_v1 = vld [vmem:[%s364_s16 + $0x60] sm:$0xff] }
 0x385   : > { %v1167_v31 = vpop.permute.xlu1 %1166 }
 0x386   : > { %v1486_v42 = vpop.permute.xlu0 %1485  ;;  %v1188_v33 = vmul.f32 %v1167_v31, %v1092_v32 }
 0x387   : > { %v1543_v6 = vmul.f32 %v1486_v42, %v1415_v57  ;;  %v1708_v57 = vld [vmem:[%s364_s16 + $0x68] sm:$0xff] }
 0x388   : > { %v1373_v59 = vadd.f32 %v2053_v37, %v1188_v33 }
 0x389   : > { %v1556_v44 = vpack.c.bf16 %v1543_v6, %v1542_v46  ;;  %v1501_v61 = vpop.permute.xlu1 %1500 }
 0x38a   : > { %v1172_v16 = vpop.permute.xlu0 %1171  ;;  %1389 = vst.msk [vmem:[#allocation4 + $0x70] sm:$0xff] %vm444_vm0, %v1373_v59  ;;  %v1546_v25 = vmul.f32 %v1501_v61, %v1418_v34 }
 0x38b   : > { %v1189_v40 = vmul.f32 %v1172_v16, %v1093_v29  ;;  %2061 = vmatprep.mubr.msk.bf16.mxu1 %vm444_vm0, %v1556_v44 }
 0x38c   : > { %2062 = vmatmul.mubr.msk.bf16.gmra.mrb[20].mxu1 %vm444_vm0, %v1557_v51 }
 0x38d   : > { %v1374_v62 = vadd.f32 %v2054_v30, %v1189_v40  ;;  %v1511_v48 = vpop.permute.xlu1 %1510 }
 0x38e   : > { %v1506_v39 = vpop.permute.xlu0 %1505  ;;  %v1548_v9 = vmul.f32 %v1511_v48, %v1420_v4 }
 0x38f   : > { %1390 = vst.msk [vmem:[#allocation4 + $0x78] sm:$0xff] %vm444_vm0, %v1374_v62  ;;  %v1547_v7 = vmul.f32 %v1506_v39, %v1419_v27 }
 0x391   : > { %v1558_v0 = vpack.c.bf16 %v1547_v7, %v1546_v25  ;;  %v1521_v2 = vpop.permute.xlu1 %1520  ;;  %v1424_v45 = vld [vmem:[#allocation4 + $0x70] sm:$0xff] }
 0x392   : > { %v1516_v63 = vpop.permute.xlu0 %1515  ;;  %v1550_v20 = vmul.f32 %v1521_v2, %v1422_v13 }
 0x393   : > { %v1549_v5 = vmul.f32 %v1516_v63, %v1421_v28  ;;  %2065 = vmatprep.mubr.msk.bf16.mxu1 %vm444_vm0, %v1558_v0 }
 0x395   : > { %v1559_v11 = vpack.c.bf16 %v1549_v5, %v1548_v9  ;;  %v1531_v19 = vpop.permute.xlu1 %1530 }
 0x396   : > { %v1526_v17 = vpop.permute.xlu0 %1525  ;;  %v1425_v24 = vld [vmem:[#allocation4 + $0x78] sm:$0xff]  ;;  %v1552_v30 = vmul.f32 %v1531_v19, %v1424_v45 }
 0x397   : > { %v1551_v23 = vmul.f32 %v1526_v17, %v1423_v15  ;;  %2066 = vmatmul.mubr.msk.bf16.gmra.mrb[24].mxu1 %vm444_vm0, %v1559_v11 }
 0x399   : > { %v1560_v37 = vpack.c.bf16 %v1551_v23, %v1550_v20 }
 0x39a   : > { %v1536_v26 = vpop.permute.xlu0 %1535 }
 0x39b   : > { %v1553_v18 = vmul.f32 %v1536_v26, %v1425_v24  ;;  %2069 = vmatprep.mubr.msk.bf16.mxu1 %vm444_vm0, %v1560_v37 }
 0x39d   : > { %v1561_v22 = vpack.c.bf16 %v1553_v18, %v1552_v30 }
 0x39f   : > { %2070 = vmatmul.mubr.msk.bf16.gmra.mrb[28].mxu1 %vm444_vm0, %v1561_v22 }
 0x451   : > { %v2059_v58 = vpop.f32.mrb[16].mxu1 }
 0x452   : > { %v1641_v60 = vadd.f32 %v2059_v58, %v2815_v35  ;;  %v1632_v14 = vpop.f32.mrb[17].mxu1 }
 0x453   : > { %v1633_v32 = vadd.f32 %v2815_v35, %v1632_v14  ;;  %v2060_v38 = vpop.f32.mrb[18].mxu1 }
 0x454   : > { %v1713_v42 = vadd.f32 %v1697_v36, %v1641_v60  ;;  %v1644_v31 = vadd.f32 %v2060_v38, %v2815_v35  ;;  %v1635_v56 = vpop.f32.mrb[19].mxu1 }
 0x455   : > { %v1711_v46 = vadd.f32 %v1695_v49, %v1633_v32  ;;  %v1636_v6 = vadd.f32 %v2815_v35, %v1635_v56 }
 0x456   : > { %v1714_v33 = vadd.f32 %v1698_v8, %v1644_v31  ;;  %1729 = vst.msk [vmem:[%s2821_s21 + $0x10] sm:$0xff] %vm444_vm0, %v1713_v42 }
 0x457   : > { %v1712_v54 = vadd.f32 %v1696_v53, %v1636_v6  ;;  %1727 = vst.msk [vmem:[%s2821_s21] sm:$0xff] %vm444_vm0, %v1711_v46 }
 0x458   : > { %1730 = vst.msk [vmem:[%s2821_s21 + $0x18] sm:$0xff] %vm444_vm0, %v1714_v33 }
 0x459   : > { %1728 = vst.msk [vmem:[%s2821_s21 + $0x8] sm:$0xff] %vm444_vm0, %v1712_v54 }
 0x45f   : > { %v2063_v29 = vpop.f32.mrb[20].mxu1 }
 0x460   : > { %v1657_v44 = vadd.f32 %v2063_v29, %v2815_v35  ;;  %v1648_v59 = vpop.f32.mrb[21].mxu1 }
 0x461   : > { %v1649_v51 = vadd.f32 %v2815_v35, %v1648_v59  ;;  %v2064_v16 = vpop.f32.mrb[22].mxu1 }
 0x462   : > { %v1717_v61 = vadd.f32 %v1701_v47, %v1657_v44  ;;  %v1660_v40 = vadd.f32 %v2064_v16, %v2815_v35  ;;  %v1651_v62 = vpop.f32.mrb[23].mxu1 }
 0x463   : > { %v1715_v34 = vadd.f32 %v1699_v3, %v1649_v51  ;;  %v1652_v27 = vadd.f32 %v2815_v35, %v1651_v62 }
 0x464   : > { %v1718_v39 = vadd.f32 %v1702_v55, %v1660_v40  ;;  %1733 = vst.msk [vmem:[%s2821_s21 + $0x30] sm:$0xff] %vm444_vm0, %v1717_v61 }
 0x465   : > { %v1716_v48 = vadd.f32 %v1700_v43, %v1652_v27  ;;  %1731 = vst.msk [vmem:[%s2821_s21 + $0x20] sm:$0xff] %vm444_vm0, %v1715_v34 }
 0x466   : > { %1734 = vst.msk [vmem:[%s2821_s21 + $0x38] sm:$0xff] %vm444_vm0, %v1718_v39 }
 0x467   : > { %1732 = vst.msk [vmem:[%s2821_s21 + $0x28] sm:$0xff] %vm444_vm0, %v1716_v48 }
 0x46a   : > { %v2067_v25 = vpop.f32.mrb[24].mxu1 }
 0x46b   : > { %v1673_v7 = vadd.f32 %v2067_v25, %v2815_v35  ;;  %v1664_v0 = vpop.f32.mrb[25].mxu1 }
 0x46c   : > { %v1665_v4 = vadd.f32 %v2815_v35, %v1664_v0  ;;  %v2068_v28 = vpop.f32.mrb[26].mxu1 }
 0x46d   : > { %v1721_v63 = vadd.f32 %v1705_v52, %v1673_v7  ;;  %v1676_v2 = vadd.f32 %v2068_v28, %v2815_v35  ;;  %v1667_v9 = vpop.f32.mrb[27].mxu1 }
 0x46e   : > { %v1719_v5 = vadd.f32 %v1703_v41, %v1665_v4  ;;  %v1668_v11 = vadd.f32 %v2815_v35, %v1667_v9 }
 0x46f   : > { %v1722_v13 = vadd.f32 %v1706_v21, %v1676_v2  ;;  %1737 = vst.msk [vmem:[%s2821_s21 + $0x50] sm:$0xff] %vm444_vm0, %v1721_v63 }
 0x470   : > { %v1720_v15 = vadd.f32 %v1704_v50, %v1668_v11  ;;  %1735 = vst.msk [vmem:[%s2821_s21 + $0x40] sm:$0xff] %vm444_vm0, %v1719_v5 }
 0x471   : > { %1738 = vst.msk [vmem:[%s2821_s21 + $0x58] sm:$0xff] %vm444_vm0, %v1722_v13 }
 0x472   : > { %v2071_v17 = vpop.f32.mrb[28].mxu1  ;;  %1736 = vst.msk [vmem:[%s2821_s21 + $0x48] sm:$0xff] %vm444_vm0, %v1720_v15 }
 0x473   : > { %v1689_v20 = vadd.f32 %v2071_v17, %v2815_v35  ;;  %v1680_v23 = vpop.f32.mrb[29].mxu1 }
 0x474   : > { %v1681_v19 = vadd.f32 %v2815_v35, %v1680_v23  ;;  %v2072_v37 = vpop.f32.mrb[30].mxu1 }
 0x475   : > { %v1725_v45 = vadd.f32 %v1709_v10, %v1689_v20  ;;  %v1692_v24 = vadd.f32 %v2072_v37, %v2815_v35  ;;  %v1683_v26 = vpop.f32.mrb[31].mxu1 }
 0x476   : > { %v1723_v30 = vadd.f32 %v1707_v1, %v1681_v19  ;;  %v1684_v18 = vadd.f32 %v2815_v35, %v1683_v26 }
 0x477   : > { %v1726_v22 = vadd.f32 %v1710_v12, %v1692_v24  ;;  %1741 = vst.msk [vmem:[%s2821_s21 + $0x70] sm:$0xff] %vm444_vm0, %v1725_v45 }
 0x478   : > { %v1724_v36 = vadd.f32 %v1708_v57, %v1684_v18  ;;  %1739 = vst.msk [vmem:[%s2821_s21 + $0x60] sm:$0xff] %vm444_vm0, %v1723_v30 }
 0x479   : > { %1742 = vst.msk [vmem:[%s2821_s21 + $0x78] sm:$0xff] %vm444_vm0, %v1726_v22 }
 0x47a   : > { %1740 = vst.msk [vmem:[%s2821_s21 + $0x68] sm:$0xff] %vm444_vm0, %v1724_v36 }
 0x47b PF: > { %s16_s23 = sadd.s32 1, %s2253_s23   ;;  %s2900_s21 = smov %s2249_s22 }
 0x47c   : > { %p13_p5 = scmp.ge.s32.totalorder %s16_s23, 4   ;;  %s2901_s22 = smov %s2903_s24 }
 0x47e   :  { %15 = sbr.rel (!%p13_p5) target bundleno = 2 (0x2), region = 91 }

// kernel: forward.13
= control target key start
LH: loop header
LB: loop body
LE: loop exit
PB: predicated region body
PF: predicated region fallthrough
CT: control target
= control target key end

     0   :  { %vm61_vm0 = vcmask 64512   ;;  %vm627_vm1 = vcmask 1043456   ;;  %vm991_vm2 = vcmask 261120   ;;  %s2532_s0 = inlined_call_operand.vmem [shape: f32[256,8], index: 0, kind: input, shape index: {}, may-alias: {0,7}]   ;;  %s2533_s3 = inlined_call_operand.vmem [shape: bf16[8,32], index: 3, kind: input, shape index: {}]   ;;  %s2534_s1 = inlined_call_operand.vmem [shape: f32[1,8], index: 1, kind: input, shape index: {}]   ;;  %s2535_s2 = inlined_call_operand.vmem [shape: f32[1,8], index: 2, kind: input, shape index: {}]   ;;  %s2536_s5 = inlined_call_operand.vmem [shape: bf16[32,8], index: 5, kind: input, shape index: {}]   ;;  %s2537_s4 = inlined_call_operand.vmem [shape: f32[1,32], index: 4, kind: input, shape index: {}]   ;;  %s2538_s6 = inlined_call_operand.vmem [shape: f32[1,8], index: 6, kind: input, shape index: {}]   ;;  %s2539_s7 = inlined_call_operand.vmem [shape: f32[256,8], index: 7, kind: output, shape index: {}, may-alias: {0,7}]  }
   0x1   :  { %v1618_v0 = vld [vmem:[%s2532_s0] sm:$0xff]  ;;  %v1623_v1 = vld [vmem:[%s2532_s0 + $0x10] sm:$0xff]  ;;  %v1628_v2 = vld [vmem:[%s2532_s0 + $0x8] sm:$0xff] }
   0x2   :  { %v62_v3 = vsel %vm61_vm0, %v1618_v0, 0.0  ;;  %v68_v4 = vsel %vm61_vm0, %v1623_v1, 0.0  ;;  %v1637_v5 = vld [vmem:[%s2532_s0 + $0x18] sm:$0xff]  ;;  %v65_v6 = vsel %vm61_vm0, %v1628_v2, 0.0  ;;  %v1646_v8 = vld [vmem:[%s2532_s0 + $0x20] sm:$0xff]  ;;  %v1651_v9 = vld [vmem:[%s2532_s0 + $0x28] sm:$0xff] }
   0x3   :  { %63 = vadd.xlane.f32.xlu0 %v62_v3  ;;  %69 = vadd.xlane.f32.xlu1 %v68_v4  ;;  %v71_v7 = vsel %vm61_vm0, %v1637_v5, 0.0  ;;  %v74_v10 = vsel %vm61_vm0, %v1646_v8, 0.0  ;;  %v77_v11 = vsel %vm61_vm0, %v1651_v9, 0.0  ;;  %v1660_v12 = vld [vmem:[%s2532_s0 + $0x30] sm:$0xff]  ;;  %v1665_v13 = vld [vmem:[%s2532_s0 + $0x38] sm:$0xff]  ;;  %v1674_v16 = vld [vmem:[%s2532_s0 + $0x40] sm:$0xff] }
   0x4   :  { %v80_v14 = vsel %vm61_vm0, %v1660_v12, 0.0  ;;  %v83_v15 = vsel %vm61_vm0, %v1665_v13, 0.0  ;;  %v1679_v17 = vld [vmem:[%s2532_s0 + $0x48] sm:$0xff]  ;;  %v86_v18 = vsel %vm61_vm0, %v1674_v16, 0.0  ;;  %v1688_v20 = vld [vmem:[%s2532_s0 + $0x50] sm:$0xff]  ;;  %v1693_v21 = vld [vmem:[%s2532_s0 + $0x58] sm:$0xff] }
   0x5   :  { %v89_v19 = vsel %vm61_vm0, %v1679_v17, 0.0  ;;  %v92_v22 = vsel %vm61_vm0, %v1688_v20, 0.0  ;;  %v95_v23 = vsel %vm61_vm0, %v1693_v21, 0.0  ;;  %v1702_v24 = vld [vmem:[%s2532_s0 + $0x60] sm:$0xff]  ;;  %v1707_v25 = vld [vmem:[%s2532_s0 + $0x68] sm:$0xff]  ;;  %v1716_v28 = vld [vmem:[%s2532_s0 + $0x70] sm:$0xff] }
   0x6   :  { %v98_v26 = vsel %vm61_vm0, %v1702_v24, 0.0  ;;  %v101_v27 = vsel %vm61_vm0, %v1707_v25, 0.0  ;;  %v1721_v29 = vld [vmem:[%s2532_s0 + $0x78] sm:$0xff]  ;;  %v104_v30 = vsel %vm61_vm0, %v1716_v28, 0.0  ;;  %v1730_v32 = vld [vmem:[%s2532_s0 + $0x80] sm:$0xff]  ;;  %v1735_v33 = vld [vmem:[%s2532_s0 + $0x88] sm:$0xff] }
   0x7   :  { %66 = vadd.xlane.f32.xlu0 %v65_v6  ;;  %72 = vadd.xlane.f32.xlu1 %v71_v7  ;;  %v107_v31 = vsel %vm61_vm0, %v1721_v29, 0.0  ;;  %v110_v34 = vsel %vm61_vm0, %v1730_v32, 0.0  ;;  %v113_v35 = vsel %vm61_vm0, %v1735_v33, 0.0  ;;  %v1744_v36 = vld [vmem:[%s2532_s0 + $0x90] sm:$0xff]  ;;  %v1749_v37 = vld [vmem:[%s2532_s0 + $0x98] sm:$0xff]  ;;  %v1758_v40 = vld [vmem:[%s2532_s0 + $0xa0] sm:$0xff] }
   0x8   :  { %v116_v38 = vsel %vm61_vm0, %v1744_v36, 0.0  ;;  %v119_v39 = vsel %vm61_vm0, %v1749_v37, 0.0  ;;  %v1763_v41 = vld [vmem:[%s2532_s0 + $0xa8] sm:$0xff]  ;;  %v122_v42 = vsel %vm61_vm0, %v1758_v40, 0.0  ;;  %v1772_v44 = vld [vmem:[%s2532_s0 + $0xb0] sm:$0xff]  ;;  %v1777_v45 = vld [vmem:[%s2532_s0 + $0xb8] sm:$0xff] }
   0x9   :  { %v125_v43 = vsel %vm61_vm0, %v1763_v41, 0.0  ;;  %v128_v46 = vsel %vm61_vm0, %v1772_v44, 0.0  ;;  %v131_v47 = vsel %vm61_vm0, %v1777_v45, 0.0  ;;  %v1786_v48 = vld [vmem:[%s2532_s0 + $0xc0] sm:$0xff]  ;;  %v1791_v49 = vld [vmem:[%s2532_s0 + $0xc8] sm:$0xff]  ;;  %v1800_v52 = vld [vmem:[%s2532_s0 + $0xd0] sm:$0xff] }
   0xa   :  { %v134_v50 = vsel %vm61_vm0, %v1786_v48, 0.0  ;;  %v137_v51 = vsel %vm61_vm0, %v1791_v49, 0.0  ;;  %v1805_v53 = vld [vmem:[%s2532_s0 + $0xd8] sm:$0xff]  ;;  %v140_v54 = vsel %vm61_vm0, %v1800_v52, 0.0  ;;  %v1814_v56 = vld [vmem:[%s2532_s0 + $0xe0] sm:$0xff]  ;;  %v1819_v57 = vld [vmem:[%s2532_s0 + $0xe8] sm:$0xff] }
   0xb   :  { %75 = vadd.xlane.f32.xlu0 %v74_v10  ;;  %78 = vadd.xlane.f32.xlu1 %v77_v11  ;;  %v143_v55 = vsel %vm61_vm0, %v1805_v53, 0.0  ;;  %v146_v58 = vsel %vm61_vm0, %v1814_v56, 0.0  ;;  %v149_v59 = vsel %vm61_vm0, %v1819_v57, 0.0  ;;  %v1828_v60 = vld [vmem:[%s2532_s0 + $0xf0] sm:$0xff]  ;;  %v1833_v61 = vld [vmem:[%s2532_s0 + $0xf8] sm:$0xff] }
   0xc   :  { %v152_v62 = vsel %vm61_vm0, %v1828_v60, 0.0  ;;  %v155_v63 = vsel %vm61_vm0, %v1833_v61, 0.0 }
   0xf   :  { %81 = vadd.xlane.f32.xlu0 %v80_v14  ;;  %84 = vadd.xlane.f32.xlu1 %v83_v15 }
  0x13   :  { %87 = vadd.xlane.f32.xlu0 %v86_v18  ;;  %90 = vadd.xlane.f32.xlu1 %v89_v19 }
  0x17   :  { %93 = vadd.xlane.f32.xlu0 %v92_v22  ;;  %96 = vadd.xlane.f32.xlu1 %v95_v23 }
  0x1b   :  { %99 = vadd.xlane.f32.xlu0 %v98_v26  ;;  %102 = vadd.xlane.f32.xlu1 %v101_v27 }
  0x1f   :  { %105 = vadd.xlane.f32.xlu0 %v104_v30  ;;  %108 = vadd.xlane.f32.xlu1 %v107_v31 }
  0x23   :  { %111 = vadd.xlane.f32.xlu0 %v110_v34  ;;  %114 = vadd.xlane.f32.xlu1 %v113_v35 }
  0x27   :  { %117 = vadd.xlane.f32.xlu0 %v116_v38  ;;  %120 = vadd.xlane.f32.xlu1 %v119_v39 }
  0x2b   :  { %123 = vadd.xlane.f32.xlu0 %v122_v42  ;;  %126 = vadd.xlane.f32.xlu1 %v125_v43 }
  0x2f   :  { %129 = vadd.xlane.f32.xlu0 %v128_v46  ;;  %132 = vadd.xlane.f32.xlu1 %v131_v47 }
  0x33   :  { %135 = vadd.xlane.f32.xlu0 %v134_v50  ;;  %138 = vadd.xlane.f32.xlu1 %v137_v51 }
  0x37   :  { %141 = vadd.xlane.f32.xlu0 %v140_v54  ;;  %144 = vadd.xlane.f32.xlu1 %v143_v55 }
  0x3b   :  { %147 = vadd.xlane.f32.xlu0 %v146_v58  ;;  %150 = vadd.xlane.f32.xlu1 %v149_v59 }
  0x3f   :  { %153 = vadd.xlane.f32.xlu0 %v152_v62  ;;  %156 = vadd.xlane.f32.xlu1 %v155_v63 }
  0x90   :  { %v64_v3 = vpop.xlane.xlu0 %63  ;;  %v70_v4 = vpop.xlane.xlu1 %69 }
  0x91   :  { %v159_v6 = vmul.f32 0.125, %v64_v3  ;;  %v161_v7 = vmul.f32 0.125, %v70_v4 }
  0x93   :  { %v1840_v10 = vsub.f32 %v1618_v0, %v159_v6  ;;  %v1843_v11 = vsub.f32 %v1623_v1, %v161_v7 }
  0x94   :  { %v67_v14 = vpop.xlane.xlu0 %66  ;;  %v73_v15 = vpop.xlane.xlu1 %72 }
  0x95   :  { %v160_v18 = vmul.f32 0.125, %v67_v14  ;;  %v162_v19 = vmul.f32 0.125, %v73_v15  ;;  %v223_v22 = vmul.f32 %v1840_v10, %v1840_v10  ;;  %v225_v23 = vmul.f32 %v1843_v11, %v1843_v11 }
  0x97   :  { %v1850_v26 = vsub.f32 %v1628_v2, %v160_v18  ;;  %v1853_v27 = vsub.f32 %v1637_v5, %v162_v19  ;;  %v255_v0 = vsel %vm61_vm0, %v223_v22, 0.0  ;;  %v261_v31 = vsel %vm61_vm0, %v225_v23, 0.0 }
  0x98   :  { %256 = vadd.xlane.f32.xlu0 %v255_v0  ;;  %v76_v1 = vpop.xlane.xlu0 %75  ;;  %v79_v30 = vpop.xlane.xlu1 %78 }
  0x99   :  { %v163_v34 = vmul.f32 0.125, %v76_v1  ;;  %v164_v35 = vmul.f32 0.125, %v79_v30  ;;  %v224_v38 = vmul.f32 %v1850_v26, %v1850_v26  ;;  %v226_v39 = vmul.f32 %v1853_v27, %v1853_v27 }
  0x9b   :  { %v1862_v2 = vsub.f32 %v1646_v8, %v163_v34  ;;  %v1865_v5 = vsub.f32 %v1651_v9, %v164_v35  ;;  %v258_v42 = vsel %vm61_vm0, %v224_v38, 0.0  ;;  %v264_v47 = vsel %vm61_vm0, %v226_v39, 0.0 }
  0x9c   :  { %262 = vadd.xlane.f32.xlu0 %v261_v31  ;;  %259 = vadd.xlane.f32.xlu1 %v258_v42  ;;  %v82_v43 = vpop.xlane.xlu0 %81  ;;  %v85_v46 = vpop.xlane.xlu1 %84 }
  0x9d   :  { %v165_v50 = vmul.f32 0.125, %v82_v43  ;;  %v166_v51 = vmul.f32 0.125, %v85_v46  ;;  %v227_v54 = vmul.f32 %v1862_v2, %v1862_v2  ;;  %v228_v8 = vmul.f32 %v1865_v5, %v1865_v5 }
  0x9f   :  { %v1874_v55 = vsub.f32 %v1660_v12, %v165_v50  ;;  %v1877_v9 = vsub.f32 %v1665_v13, %v166_v51  ;;  %v267_v58 = vsel %vm61_vm0, %v227_v54, 0.0  ;;  %v270_v63 = vsel %vm61_vm0, %v228_v8, 0.0 }
  0xa0   :  { %265 = vadd.xlane.f32.xlu1 %v264_v47  ;;  %268 = vadd.xlane.f32.xlu0 %v267_v58  ;;  %v88_v59 = vpop.xlane.xlu0 %87  ;;  %v91_v62 = vpop.xlane.xlu1 %90 }
  0xa1   :  { %v167_v3 = vmul.f32 0.125, %v88_v59  ;;  %v168_v4 = vmul.f32 0.125, %v91_v62  ;;  %v229_v6 = vmul.f32 %v1874_v55, %v1874_v55  ;;  %v230_v12 = vmul.f32 %v1877_v9, %v1877_v9 }
  0xa3   :  { %v1886_v7 = vsub.f32 %v1674_v16, %v167_v3  ;;  %v1889_v13 = vsub.f32 %v1679_v17, %v168_v4  ;;  %v273_v14 = vsel %vm61_vm0, %v229_v6, 0.0  ;;  %v276_v19 = vsel %vm61_vm0, %v230_v12, 0.0 }
  0xa4   :  { %271 = vadd.xlane.f32.xlu1 %v270_v63  ;;  %274 = vadd.xlane.f32.xlu0 %v273_v14  ;;  %v94_v15 = vpop.xlane.xlu0 %93  ;;  %v97_v18 = vpop.xlane.xlu1 %96 }
  0xa5   :  { %v169_v22 = vmul.f32 0.125, %v94_v15  ;;  %v170_v23 = vmul.f32 0.125, %v97_v18  ;;  %v231_v0 = vmul.f32 %v1886_v7, %v1886_v7  ;;  %v232_v16 = vmul.f32 %v1889_v13, %v1889_v13 }
  0xa7   :  { %v1898_v1 = vsub.f32 %v1688_v20, %v169_v22  ;;  %v1901_v17 = vsub.f32 %v1693_v21, %v170_v23  ;;  %v279_v30 = vsel %vm61_vm0, %v231_v0, 0.0  ;;  %v282_v35 = vsel %vm61_vm0, %v232_v16, 0.0 }
  0xa8   :  { %277 = vadd.xlane.f32.xlu1 %v276_v19  ;;  %280 = vadd.xlane.f32.xlu0 %v279_v30  ;;  %v100_v31 = vpop.xlane.xlu0 %99  ;;  %v103_v34 = vpop.xlane.xlu1 %102 }
  0xa9   :  { %v171_v38 = vmul.f32 0.125, %v100_v31  ;;  %v172_v39 = vmul.f32 0.125, %v103_v34  ;;  %v233_v42 = vmul.f32 %v1898_v1, %v1898_v1  ;;  %v234_v20 = vmul.f32 %v1901_v17, %v1901_v17 }
  0xab   :  { %v1910_v43 = vsub.f32 %v1702_v24, %v171_v38  ;;  %v1913_v21 = vsub.f32 %v1707_v25, %v172_v39  ;;  %v285_v46 = vsel %vm61_vm0, %v233_v42, 0.0  ;;  %v288_v51 = vsel %vm61_vm0, %v234_v20, 0.0 }
  0xac   :  { %283 = vadd.xlane.f32.xlu1 %v282_v35  ;;  %286 = vadd.xlane.f32.xlu0 %v285_v46  ;;  %v106_v47 = vpop.xlane.xlu0 %105  ;;  %v109_v50 = vpop.xlane.xlu1 %108 }
  0xad   :  { %v173_v54 = vmul.f32 0.125, %v106_v47  ;;  %v174_v8 = vmul.f32 0.125, %v109_v50  ;;  %v235_v58 = vmul.f32 %v1910_v43, %v1910_v43  ;;  %v236_v24 = vmul.f32 %v1913_v21, %v1913_v21 }
  0xaf   :  { %v1922_v59 = vsub.f32 %v1716_v28, %v173_v54  ;;  %v1925_v25 = vsub.f32 %v1721_v29, %v174_v8  ;;  %v291_v62 = vsel %vm61_vm0, %v235_v58, 0.0  ;;  %v294_v4 = vsel %vm61_vm0, %v236_v24, 0.0 }
  0xb0   :  { %289 = vadd.xlane.f32.xlu1 %v288_v51  ;;  %292 = vadd.xlane.f32.xlu0 %v291_v62  ;;  %v112_v63 = vpop.xlane.xlu0 %111  ;;  %v115_v3 = vpop.xlane.xlu1 %114 }
  0xb1   :  { %v175_v6 = vmul.f32 0.125, %v112_v63  ;;  %v176_v12 = vmul.f32 0.125, %v115_v3  ;;  %v237_v14 = vmul.f32 %v1922_v59, %v1922_v59  ;;  %v238_v28 = vmul.f32 %v1925_v25, %v1925_v25 }
  0xb3   :  { %v1934_v15 = vsub.f32 %v1730_v32, %v175_v6  ;;  %v1937_v29 = vsub.f32 %v1735_v33, %v176_v12  ;;  %v297_v18 = vsel %vm61_vm0, %v237_v14, 0.0  ;;  %v300_v23 = vsel %vm61_vm0, %v238_v28, 0.0 }
  0xb4   :  { %295 = vadd.xlane.f32.xlu1 %v294_v4  ;;  %298 = vadd.xlane.f32.xlu0 %v297_v18  ;;  %v118_v19 = vpop.xlane.xlu0 %117  ;;  %v121_v22 = vpop.xlane.xlu1 %120 }
  0xb5   :  { %v177_v0 = vmul.f32 0.125, %v118_v19  ;;  %v178_v16 = vmul.f32 0.125, %v121_v22  ;;  %v239_v30 = vmul.f32 %v1934_v15, %v1934_v15  ;;  %v240_v32 = vmul.f32 %v1937_v29, %v1937_v29 }
  0xb7   :  { %v1946_v31 = vsub.f32 %v1744_v36, %v177_v0  ;;  %v1949_v33 = vsub.f32 %v1749_v37, %v178_v16  ;;  %v303_v34 = vsel %vm61_vm0, %v239_v30, 0.0  ;;  %v306_v39 = vsel %vm61_vm0, %v240_v32, 0.0 }
  0xb8   :  { %301 = vadd.xlane.f32.xlu1 %v300_v23  ;;  %304 = vadd.xlane.f32.xlu0 %v303_v34  ;;  %v124_v35 = vpop.xlane.xlu0 %123  ;;  %v127_v38 = vpop.xlane.xlu1 %126 }
  0xb9   :  { %v179_v42 = vmul.f32 0.125, %v124_v35  ;;  %v180_v20 = vmul.f32 0.125, %v127_v38  ;;  %v241_v46 = vmul.f32 %v1946_v31, %v1946_v31  ;;  %v242_v36 = vmul.f32 %v1949_v33, %v1949_v33 }
  0xbb   :  { %v1958_v47 = vsub.f32 %v1758_v40, %v179_v42  ;;  %v1961_v37 = vsub.f32 %v1763_v41, %v180_v20  ;;  %v309_v50 = vsel %vm61_vm0, %v241_v46, 0.0  ;;  %v312_v8 = vsel %vm61_vm0, %v242_v36, 0.0 }
  0xbc   :  { %307 = vadd.xlane.f32.xlu1 %v306_v39  ;;  %310 = vadd.xlane.f32.xlu0 %v309_v50  ;;  %v130_v51 = vpop.xlane.xlu0 %129  ;;  %v133_v54 = vpop.xlane.xlu1 %132 }
  0xbd   :  { %v181_v58 = vmul.f32 0.125, %v130_v51  ;;  %v182_v24 = vmul.f32 0.125, %v133_v54  ;;  %v243_v62 = vmul.f32 %v1958_v47, %v1958_v47  ;;  %v244_v40 = vmul.f32 %v1961_v37, %v1961_v37 }
  0xbf   :  { %v1970_v63 = vsub.f32 %v1772_v44, %v181_v58  ;;  %v1973_v41 = vsub.f32 %v1777_v45, %v182_v24  ;;  %v315_v3 = vsel %vm61_vm0, %v243_v62, 0.0  ;;  %v318_v12 = vsel %vm61_vm0, %v244_v40, 0.0  ;;  %v571_v45 = vld [vmem:[%s2533_s3] sm:$0xf] }
  0xc0   :  { %313 = vadd.xlane.f32.xlu1 %v312_v8  ;;  %316 = vadd.xlane.f32.xlu0 %v315_v3  ;;  %v136_v4 = vpop.xlane.xlu0 %135  ;;  %v139_v6 = vpop.xlane.xlu1 %138  ;;  %v629_v32 = vsel %vm627_vm1, %v571_v45, 0 }
  0xc1   :  { %v183_v14 = vmul.f32 0.125, %v136_v4  ;;  %v184_v28 = vmul.f32 0.125, %v139_v6  ;;  %v245_v18 = vmul.f32 %v1970_v63, %v1970_v63  ;;  %v246_v44 = vmul.f32 %v1973_v41, %v1973_v41  ;;  %1412 = vmatprep.subr.msk.bf16.mxu0 %vm627_vm1, %v571_v45 }
  0xc2   :  { %1343 = vmatpush3.bf16.msra.mxu0 %v629_v32 }
  0xc3   :  { %v1985_v19 = vsub.f32 %v1786_v48, %v183_v14  ;;  %v1988_v22 = vsub.f32 %v1791_v49, %v184_v28  ;;  %v321_v23 = vsel %vm61_vm0, %v245_v18, 0.0  ;;  %v324_v30 = vsel %vm61_vm0, %v246_v44, 0.0 }
  0xc4   :  { %319 = vadd.xlane.f32.xlu1 %v318_v12  ;;  %322 = vadd.xlane.f32.xlu0 %v321_v23  ;;  %v142_v0 = vpop.xlane.xlu0 %141  ;;  %v145_v16 = vpop.xlane.xlu1 %144 }
  0xc5   :  { %v185_v34 = vmul.f32 0.125, %v142_v0  ;;  %v186_v35 = vmul.f32 0.125, %v145_v16  ;;  %v247_v38 = vmul.f32 %v1985_v19, %v1985_v19  ;;  %v248_v48 = vmul.f32 %v1988_v22, %v1988_v22 }
  0xc7   :  { %v1997_v49 = vsub.f32 %v1800_v52, %v185_v34  ;;  %v2000_v39 = vsub.f32 %v1805_v53, %v186_v35  ;;  %v327_v42 = vsel %vm61_vm0, %v247_v38, 0.0  ;;  %v330_v36 = vsel %vm61_vm0, %v248_v48, 0.0 }
  0xc8   :  { %325 = vadd.xlane.f32.xlu1 %v324_v30  ;;  %328 = vadd.xlane.f32.xlu0 %v327_v42  ;;  %v148_v20 = vpop.xlane.xlu0 %147  ;;  %v151_v46 = vpop.xlane.xlu1 %150 }
  0xc9   :  { %v187_v50 = vmul.f32 0.125, %v148_v20  ;;  %v188_v51 = vmul.f32 0.125, %v151_v46  ;;  %v249_v54 = vmul.f32 %v1997_v49, %v1997_v49  ;;  %v250_v52 = vmul.f32 %v2000_v39, %v2000_v39 }
  0xcb   :  { %v2009_v8 = vsub.f32 %v1814_v56, %v187_v50  ;;  %v2012_v53 = vsub.f32 %v1819_v57, %v188_v51  ;;  %v333_v58 = vsel %vm61_vm0, %v249_v54, 0.0  ;;  %v336_v40 = vsel %vm61_vm0, %v250_v52, 0.0 }
  0xcc   :  { %331 = vadd.xlane.f32.xlu1 %v330_v36  ;;  %334 = vadd.xlane.f32.xlu0 %v333_v58  ;;  %v154_v24 = vpop.xlane.xlu0 %153  ;;  %v157_v62 = vpop.xlane.xlu1 %156 }
  0xcd   :  { %v189_v3 = vmul.f32 0.125, %v154_v24  ;;  %v190_v4 = vmul.f32 0.125, %v157_v62  ;;  %v251_v6 = vmul.f32 %v2009_v8, %v2009_v8  ;;  %v252_v56 = vmul.f32 %v2012_v53, %v2012_v53 }
  0xcf   :  { %v2021_v12 = vsub.f32 %v1828_v60, %v189_v3  ;;  %v2024_v57 = vsub.f32 %v1833_v61, %v190_v4  ;;  %v339_v14 = vsel %vm61_vm0, %v251_v6, 0.0  ;;  %v342_v28 = vsel %vm61_vm0, %v252_v56, 0.0 }
  0xd0   :  { %337 = vadd.xlane.f32.xlu1 %v336_v40  ;;  %340 = vadd.xlane.f32.xlu0 %v339_v14 }
  0xd1   :  { %v253_v18 = vmul.f32 %v2021_v12, %v2021_v12  ;;  %v254_v44 = vmul.f32 %v2024_v57, %v2024_v57 }
  0xd3   :  { %v345_v45 = vsel %vm61_vm0, %v253_v18, 0.0  ;;  %v348_v60 = vsel %vm61_vm0, %v254_v44, 0.0 }
  0xd4   :  { %343 = vadd.xlane.f32.xlu1 %v342_v28  ;;  %346 = vadd.xlane.f32.xlu0 %v345_v45  ;;  %v2038_v28 = vld [vmem:[%s2534_s1] ss:$0 sm:$0xff] }
  0xd8   :  { %349 = vadd.xlane.f32.xlu1 %v348_v60 }
 0x125   :  { %v257_v61 = vpop.xlane.xlu0 %256 }
 0x126   :  { %v351_v23 = vmul.f32 0.125, %v257_v61 }
 0x128   :  { %v383_v0 = vadd.f32 1e-05, %v351_v23 }
 0x129   :  { %v260_v16 = vpop.xlane.xlu1 %259  ;;  %v263_v30 = vpop.xlane.xlu0 %262 }
 0x12a   :  { %1415 = vrsqrt.f32 %v383_v0  ;;  %v352_v32 = vmul.f32 0.125, %v260_v16  ;;  %v353_v34 = vmul.f32 0.125, %v263_v30 }
 0x12c   :  { %v384_v35 = vadd.f32 1e-05, %v352_v32  ;;  %v385_v38 = vadd.f32 1e-05, %v353_v34  ;;  %v2046_v34 = vld [vmem:[%s2535_s2] ss:$0 sm:$0xff] }
 0x12d   :  { %v266_v48 = vpop.xlane.xlu1 %265  ;;  %v269_v42 = vpop.xlane.xlu0 %268 }
 0x12e   :  { %1417 = vrsqrt.f32 %v384_v35  ;;  %v354_v20 = vmul.f32 0.125, %v266_v48  ;;  %v355_v46 = vmul.f32 0.125, %v269_v42 }
 0x12f   :  { %1419 = vrsqrt.f32 %v385_v38 }
 0x130   :  { %v386_v36 = vadd.f32 1e-05, %v354_v20  ;;  %v387_v50 = vadd.f32 1e-05, %v355_v46 }
 0x131   :  { %v272_v51 = vpop.xlane.xlu1 %271  ;;  %v275_v54 = vpop.xlane.xlu0 %274 }
 0x132   :  { %1421 = vrsqrt.f32 %v386_v36  ;;  %v356_v52 = vmul.f32 0.125, %v272_v51  ;;  %v357_v58 = vmul.f32 0.125, %v275_v54 }
 0x133   :  { %1423 = vrsqrt.f32 %v387_v50 }
 0x134   :  { %v1416_v24 = vpop.eup %1415  ;;  %v388_v62 = vadd.f32 1e-05, %v356_v52  ;;  %v389_v40 = vadd.f32 1e-05, %v357_v58 }
 0x135   :  { %v278_v3 = vpop.xlane.xlu1 %277  ;;  %v281_v4 = vpop.xlane.xlu0 %280  ;;  %v447_v6 = vmul.f32 %v1416_v24, %v1840_v10 }
 0x136   :  { %1425 = vrsqrt.f32 %v388_v62  ;;  %v358_v56 = vmul.f32 0.125, %v278_v3  ;;  %v359_v14 = vmul.f32 0.125, %v281_v4 }
 0x137   :  { %1427 = vrsqrt.f32 %v389_v40  ;;  %v485_v16 = vmul.f32 %v2038_v28, %v447_v6 }
 0x138   :  { %v1418_v18 = vpop.eup %1417  ;;  %v390_v44 = vadd.f32 1e-05, %v358_v56  ;;  %v391_v45 = vadd.f32 1e-05, %v359_v14 }
 0x139   :  { %v1420_v60 = vpop.eup %1419  ;;  %v284_v61 = vpop.xlane.xlu1 %283  ;;  %v448_v0 = vmul.f32 %v1418_v18, %v1850_v26 }
 0x13a   :  { %v287_v23 = vpop.xlane.xlu0 %286  ;;  %v449_v10 = vmul.f32 %v1420_v60, %v1843_v11  ;;  %1429 = vrsqrt.f32 %v390_v44  ;;  %v360_v30 = vmul.f32 0.125, %v284_v61  ;;  %v523_v11 = vadd.f32 %v2046_v34, %v485_v16 }
 0x13b   :  { %v361_v32 = vmul.f32 0.125, %v287_v23  ;;  %1431 = vrsqrt.f32 %v391_v45  ;;  %v486_v35 = vmul.f32 %v2038_v28, %v448_v0 }
 0x13c   :  { %v1422_v38 = vpop.eup %1421  ;;  %v392_v48 = vadd.f32 1e-05, %v360_v30  ;;  %v487_v51 = vmul.f32 %v2038_v28, %v449_v10 }
 0x13d   :  { %v393_v42 = vadd.f32 1e-05, %v361_v32  ;;  %v1424_v20 = vpop.eup %1423  ;;  %v450_v26 = vmul.f32 %v1422_v38, %v1853_v27  ;;  %v290_v46 = vpop.xlane.xlu1 %289  ;;  %v524_v50 = vadd.f32 %v2046_v34, %v486_v35 }
 0x13e   :  { %v293_v36 = vpop.xlane.xlu0 %292  ;;  %v451_v54 = vmul.f32 %v1424_v20, %v1862_v2  ;;  %1433 = vrsqrt.f32 %v392_v48  ;;  %v362_v52 = vmul.f32 0.125, %v290_v46  ;;  %v525_v18 = vadd.f32 %v2046_v34, %v487_v51 }
 0x13f   :  { %v363_v58 = vmul.f32 0.125, %v293_v36  ;;  %1435 = vrsqrt.f32 %v393_v42  ;;  %v555_v24 = vpack.c.bf16 %v524_v50, %v523_v11  ;;  %v488_v62 = vmul.f32 %v2038_v28, %v450_v26 }
 0x140   :  { %v1426_v40 = vpop.eup %1425  ;;  %v394_v3 = vadd.f32 1e-05, %v362_v52  ;;  %v489_v44 = vmul.f32 %v2038_v28, %v451_v54 }
 0x141   :  { %v395_v27 = vadd.f32 1e-05, %v363_v58  ;;  %v1428_v4 = vpop.eup %1427  ;;  %v452_v6 = vmul.f32 %v1426_v40, %v1865_v5  ;;  %v296_v56 = vpop.xlane.xlu1 %295  ;;  %1344 = vmatprep.mubr.msk.bf16.mxu0 %vm61_vm0, %v555_v24  ;;  %v526_v2 = vadd.f32 %v2046_v34, %v488_v62 }
 0x142   :  { %v299_v14 = vpop.xlane.xlu0 %298  ;;  %v453_v45 = vmul.f32 %v1428_v4, %v1874_v55  ;;  %1437 = vrsqrt.f32 %v394_v3  ;;  %v364_v60 = vmul.f32 0.125, %v296_v56  ;;  %v527_v48 = vadd.f32 %v2046_v34, %v489_v44 }
 0x143   :  { %v365_v61 = vmul.f32 0.125, %v299_v14  ;;  %1439 = vrsqrt.f32 %v395_v27  ;;  %v556_v23 = vpack.c.bf16 %v526_v2, %v525_v18  ;;  %v490_v0 = vmul.f32 %v2038_v28, %v452_v6 }
 0x144   :  { %v1430_v5 = vpop.eup %1429  ;;  %v396_v16 = vadd.f32 1e-05, %v364_v60  ;;  %v491_v42 = vmul.f32 %v2038_v28, %v453_v45 }
 0x145   :  { %v397_v10 = vadd.f32 1e-05, %v365_v61  ;;  %v1432_v30 = vpop.eup %1431  ;;  %v454_v32 = vmul.f32 %v1430_v5, %v1877_v9  ;;  %v302_v35 = vpop.xlane.xlu1 %301  ;;  %1345 = vmatmul.mubr.msk.bf16.vlgmr.msra.gmra.mrb[0].mxu0 %vm61_vm0, %v556_v23  ;;  %v528_v55 = vadd.f32 %v2046_v34, %v490_v0 }
 0x146   :  { %v305_v38 = vpop.xlane.xlu0 %304  ;;  %v455_v20 = vmul.f32 %v1432_v30, %v1886_v7  ;;  %1441 = vrsqrt.f32 %v396_v16  ;;  %v366_v26 = vmul.f32 0.125, %v302_v35  ;;  %v529_v62 = vadd.f32 %v2046_v34, %v491_v42 }
 0x147   :  { %v367_v46 = vmul.f32 0.125, %v305_v38  ;;  %1443 = vrsqrt.f32 %v397_v10  ;;  %v557_v36 = vpack.c.bf16 %v528_v55, %v527_v48  ;;  %v492_v11 = vmul.f32 %v2038_v28, %v454_v32 }
 0x148   :  { %v1434_v9 = vpop.eup %1433  ;;  %v398_v50 = vadd.f32 1e-05, %v366_v26  ;;  %v493_v40 = vmul.f32 %v2038_v28, %v455_v20 }
 0x149   :  { %v399_v51 = vadd.f32 1e-05, %v367_v46  ;;  %v1436_v54 = vpop.eup %1435  ;;  %v456_v52 = vmul.f32 %v1434_v9, %v1889_v13  ;;  %v308_v58 = vpop.xlane.xlu1 %307  ;;  %1348 = vmatprep.mubr.msk.bf16.mxu0 %vm61_vm0, %v557_v36  ;;  %v530_v7 = vadd.f32 %v2046_v34, %v492_v11 }
 0x14a   :  { %v311_v24 = vpop.xlane.xlu0 %310  ;;  %v457_v3 = vmul.f32 %v1436_v54, %v1898_v1  ;;  %1445 = vrsqrt.f32 %v398_v50  ;;  %v368_v27 = vmul.f32 0.125, %v308_v58  ;;  %v531_v61 = vadd.f32 %v2046_v34, %v493_v40 }
 0x14b   :  { %v369_v4 = vmul.f32 0.125, %v311_v24  ;;  %1447 = vrsqrt.f32 %v399_v51  ;;  %v558_v6 = vpack.c.bf16 %v530_v7, %v529_v62  ;;  %v494_v56 = vmul.f32 %v2038_v28, %v456_v52 }
 0x14c   :  { %v1438_v13 = vpop.eup %1437  ;;  %v400_v14 = vadd.f32 1e-05, %v368_v27  ;;  %v495_v23 = vmul.f32 %v2038_v28, %v457_v3 }
 0x14d   :  { %v401_v18 = vadd.f32 1e-05, %v369_v4  ;;  %v1440_v2 = vpop.eup %1439  ;;  %v458_v44 = vmul.f32 %v1438_v13, %v1901_v17  ;;  %v314_v45 = vpop.xlane.xlu1 %313  ;;  %1349 = vmatmul.mubr.msk.bf16.gmra.mrb[4].mxu0 %vm61_vm0, %v558_v6  ;;  %v532_v1 = vadd.f32 %v2046_v34, %v494_v56 }
 0x14e   :  { %v317_v60 = vpop.xlane.xlu0 %316  ;;  %v459_v0 = vmul.f32 %v1440_v2, %v1910_v43  ;;  %1449 = vrsqrt.f32 %v400_v14  ;;  %v370_v5 = vmul.f32 0.125, %v314_v45  ;;  %v533_v20 = vadd.f32 %v2046_v34, %v495_v23 }
 0x14f   :  { %v371_v16 = vmul.f32 0.125, %v317_v60  ;;  %1451 = vrsqrt.f32 %v401_v18  ;;  %v559_v10 = vpack.c.bf16 %v532_v1, %v531_v61  ;;  %v496_v30 = vmul.f32 %v2038_v28, %v458_v44 }
 0x150   :  { %v1442_v17 = vpop.eup %1441  ;;  %v402_v32 = vadd.f32 1e-05, %v370_v5  ;;  %v497_v26 = vmul.f32 %v2038_v28, %v459_v0 }
 0x151   :  { %v403_v35 = vadd.f32 1e-05, %v371_v16  ;;  %v1444_v38 = vpop.eup %1443  ;;  %v460_v48 = vmul.f32 %v1442_v17, %v1913_v21  ;;  %v320_v55 = vpop.xlane.xlu1 %319  ;;  %1352 = vmatprep.mubr.msk.bf16.mxu0 %vm61_vm0, %v559_v10  ;;  %v534_v43 = vadd.f32 %v2046_v34, %v496_v30 }
 0x152   :  { %v323_v42 = vpop.xlane.xlu0 %322  ;;  %v461_v46 = vmul.f32 %v1444_v38, %v1922_v59  ;;  %1453 = vrsqrt.f32 %v402_v32  ;;  %v372_v36 = vmul.f32 0.125, %v320_v55  ;;  %v535_v7 = vadd.f32 %v2046_v34, %v497_v26 }
 0x153   :  { %v373_v11 = vmul.f32 0.125, %v323_v42  ;;  %1455 = vrsqrt.f32 %v403_v35  ;;  %v560_v9 = vpack.c.bf16 %v534_v43, %v533_v20  ;;  %v498_v50 = vmul.f32 %v2038_v28, %v460_v48 }
 0x154   :  { %v1446_v21 = vpop.eup %1445  ;;  %v404_v51 = vadd.f32 1e-05, %v372_v36  ;;  %v499_v40 = vmul.f32 %v2038_v28, %v461_v46 }
 0x155   :  { %v405_v54 = vadd.f32 1e-05, %v373_v11  ;;  %v1448_v52 = vpop.eup %1447  ;;  %v462_v58 = vmul.f32 %v1446_v21, %v1925_v25  ;;  %v326_v24 = vpop.xlane.xlu1 %325  ;;  %1353 = vmatmul.mubr.msk.bf16.gmra.mrb[8].mxu0 %vm61_vm0, %v560_v9  ;;  %v536_v59 = vadd.f32 %v2046_v34, %v498_v50 }
 0x156   :  { %v329_v62 = vpop.xlane.xlu0 %328  ;;  %v463_v3 = vmul.f32 %v1448_v52, %v1934_v15  ;;  %1457 = vrsqrt.f32 %v404_v51  ;;  %v374_v27 = vmul.f32 0.125, %v326_v24  ;;  %v537_v60 = vadd.f32 %v2046_v34, %v499_v40 }
 0x157   :  { %v375_v4 = vmul.f32 0.125, %v329_v62  ;;  %1459 = vrsqrt.f32 %v405_v54  ;;  %v561_v6 = vpack.c.bf16 %v536_v59, %v535_v7  ;;  %v500_v56 = vmul.f32 %v2038_v28, %v462_v58 }
 0x158   :  { %v1450_v25 = vpop.eup %1449  ;;  %v406_v13 = vadd.f32 1e-05, %v374_v27  ;;  %v501_v61 = vmul.f32 %v2038_v28, %v463_v3 }
 0x159   :  { %v407_v14 = vadd.f32 1e-05, %v375_v4  ;;  %v1452_v18 = vpop.eup %1451  ;;  %v464_v2 = vmul.f32 %v1450_v25, %v1937_v29  ;;  %v332_v44 = vpop.xlane.xlu1 %331  ;;  %1356 = vmatprep.mubr.msk.bf16.mxu0 %vm61_vm0, %v561_v6  ;;  %v538_v15 = vadd.f32 %v2046_v34, %v500_v56 }
 0x15a   :  { %v335_v45 = vpop.xlane.xlu0 %334  ;;  %v465_v1 = vmul.f32 %v1452_v18, %v1946_v31  ;;  %1461 = vrsqrt.f32 %v406_v13  ;;  %v376_v23 = vmul.f32 0.125, %v332_v44  ;;  %v539_v48 = vadd.f32 %v2046_v34, %v501_v61 }
 0x15b   :  { %v377_v0 = vmul.f32 0.125, %v335_v45  ;;  %1463 = vrsqrt.f32 %v407_v14  ;;  %v562_v5 = vpack.c.bf16 %v538_v15, %v537_v60  ;;  %v502_v16 = vmul.f32 %v2038_v28, %v464_v2 }
 0x15c   :  { %v1454_v29 = vpop.eup %1453  ;;  %v408_v10 = vadd.f32 1e-05, %v376_v23  ;;  %v503_v55 = vmul.f32 %v2038_v28, %v465_v1 }
 0x15d   :  { %v409_v30 = vadd.f32 1e-05, %v377_v0  ;;  %v1456_v17 = vpop.eup %1455  ;;  %v466_v32 = vmul.f32 %v1454_v29, %v1949_v33  ;;  %v338_v35 = vpop.xlane.xlu1 %337  ;;  %1357 = vmatmul.mubr.msk.bf16.gmra.mrb[12].mxu0 %vm61_vm0, %v562_v5  ;;  %v540_v31 = vadd.f32 %v2046_v34, %v502_v16 }
 0x15e   :  { %v341_v38 = vpop.xlane.xlu0 %340  ;;  %v467_v42 = vmul.f32 %v1456_v17, %v1958_v47  ;;  %1465 = vrsqrt.f32 %v408_v10  ;;  %v378_v20 = vmul.f32 0.125, %v338_v35  ;;  %v541_v54 = vadd.f32 %v2046_v34, %v503_v55 }
 0x15f   :  { %v379_v43 = vmul.f32 0.125, %v341_v38  ;;  %1467 = vrsqrt.f32 %v409_v30  ;;  %v563_v26 = vpack.c.bf16 %v540_v31, %v539_v48  ;;  %v504_v46 = vmul.f32 %v2038_v28, %v466_v32 }
 0x160   :  { %v1458_v33 = vpop.eup %1457  ;;  %v410_v36 = vadd.f32 1e-05, %v378_v20  ;;  %v505_v52 = vmul.f32 %v2038_v28, %v467_v42 }
 0x161   :  { %v411_v11 = vadd.f32 1e-05, %v379_v43  ;;  %v1460_v9 = vpop.eup %1459  ;;  %v468_v50 = vmul.f32 %v1458_v33, %v1961_v37  ;;  %v344_v21 = vpop.xlane.xlu1 %343  ;;  %1360 = vmatprep.mubr.msk.bf16.mxu0 %vm61_vm0, %v563_v26  ;;  %v542_v47 = vadd.f32 %v2046_v34, %v504_v46 }
 0x162   :  { %v347_v51 = vpop.xlane.xlu0 %346  ;;  %v469_v58 = vmul.f32 %v1460_v9, %v1970_v63  ;;  %1469 = vrsqrt.f32 %v410_v36  ;;  %v380_v24 = vmul.f32 0.125, %v344_v21  ;;  %v543_v56 = vadd.f32 %v2046_v34, %v505_v52  ;;  %v1414_v21 = vld [vmem:[%s2536_s5 + $0x8] sm:$0xff]  }
 0x163   :  { %v381_v62 = vmul.f32 0.125, %v347_v51  ;;  %1471 = vrsqrt.f32 %v411_v11  ;;  %v564_v7 = vpack.c.bf16 %v542_v47, %v541_v54  ;;  %v506_v59 = vmul.f32 %v2038_v28, %v468_v50 }
 0x164   :  { %v1462_v37 = vpop.eup %1461  ;;  %v412_v40 = vadd.f32 1e-05, %v380_v24  ;;  %v507_v25 = vmul.f32 %v2038_v28, %v469_v58 }
 0x165   :  { %v413_v3 = vadd.f32 1e-05, %v381_v62  ;;  %v1464_v27 = vpop.eup %1463  ;;  %v470_v4 = vmul.f32 %v1462_v37, %v1973_v41  ;;  %v350_v6 = vpop.xlane.xlu1 %349  ;;  %1361 = vmatmul.mubr.msk.bf16.gmra.mrb[16].mxu0 %vm61_vm0, %v564_v7  ;;  %v544_v63 = vadd.f32 %v2046_v34, %v506_v59 }
 0x166   :  { %v471_v13 = vmul.f32 %v1464_v27, %v1985_v19  ;;  %1473 = vrsqrt.f32 %v412_v40  ;;  %v382_v14 = vmul.f32 0.125, %v350_v6  ;;  %v545_v15 = vadd.f32 %v2046_v34, %v507_v25 }
 0x167   :  { %1475 = vrsqrt.f32 %v413_v3  ;;  %v565_v18 = vpack.c.bf16 %v544_v63, %v543_v56  ;;  %v508_v2 = vmul.f32 %v2038_v28, %v470_v4 }
 0x168   :  { %v1466_v44 = vpop.eup %1465  ;;  %v414_v45 = vadd.f32 1e-05, %v382_v14  ;;  %v509_v1 = vmul.f32 %v2038_v28, %v471_v13 }
 0x169   :  { %v1468_v41 = vpop.eup %1467  ;;  %v472_v60 = vmul.f32 %v1466_v44, %v1988_v22  ;;  %1364 = vmatprep.mubr.msk.bf16.mxu0 %vm61_vm0, %v565_v18  ;;  %v546_v61 = vadd.f32 %v2046_v34, %v508_v2 }
 0x16a   :  { %v473_v19 = vmul.f32 %v1468_v41, %v1997_v49  ;;  %1477 = vrsqrt.f32 %v414_v45  ;;  %v547_v22 = vadd.f32 %v2046_v34, %v509_v1 }
 0x16b   :  { %v566_v23 = vpack.c.bf16 %v546_v61, %v545_v15  ;;  %v510_v0 = vmul.f32 %v2038_v28, %v472_v60 }
 0x16c   :  { %v1470_v5 = vpop.eup %1469  ;;  %v511_v30 = vmul.f32 %v2038_v28, %v473_v19 }
 0x16d   :  { %v1472_v16 = vpop.eup %1471  ;;  %v474_v29 = vmul.f32 %v1470_v5, %v2000_v39  ;;  %1365 = vmatmul.mubr.msk.bf16.gmra.mrb[20].mxu0 %vm61_vm0, %v566_v23  ;;  %v548_v10 = vadd.f32 %v2046_v34, %v510_v0 }
 0x16e   :  { %v475_v17 = vmul.f32 %v1472_v16, %v2009_v8  ;;  %v549_v39 = vadd.f32 %v2046_v34, %v511_v30 }
 0x16f   :  { %v567_v32 = vpack.c.bf16 %v548_v10, %v547_v22  ;;  %v512_v49 = vmul.f32 %v2038_v28, %v474_v29 }
 0x170   :  { %v1474_v35 = vpop.eup %1473  ;;  %v513_v55 = vmul.f32 %v2038_v28, %v475_v17 }
 0x171   :  { %v1476_v38 = vpop.eup %1475  ;;  %v476_v48 = vmul.f32 %v1474_v35, %v2012_v53  ;;  %1368 = vmatprep.mubr.msk.bf16.mxu0 %vm61_vm0, %v567_v32  ;;  %v550_v31 = vadd.f32 %v2046_v34, %v512_v49 }
 0x172   :  { %v477_v42 = vmul.f32 %v1476_v38, %v2021_v12  ;;  %v551_v53 = vadd.f32 %v2046_v34, %v513_v55 }
 0x173   :  { %v568_v20 = vpack.c.bf16 %v550_v31, %v549_v39  ;;  %v514_v8 = vmul.f32 %v2038_v28, %v476_v48 }
 0x174   :  { %v1478_v43 = vpop.eup %1477  ;;  %v515_v33 = vmul.f32 %v2038_v28, %v477_v42 }
 0x175   :  { %v478_v26 = vmul.f32 %v1478_v43, %v2024_v57  ;;  %1369 = vmatmul.mubr.msk.bf16.gmra.mrb[24].mxu0 %vm61_vm0, %v568_v20  ;;  %v552_v46 = vadd.f32 %v2046_v34, %v514_v8  ;;  %v1413_v57 = vld [vmem:[%s2536_s5] sm:$0xff]  }
 0x176   :  { %v553_v12 = vadd.f32 %v2046_v34, %v515_v33  ;;  %1376 = vmatprep.subr.bf16.mxu1 %v1413_v57 }
 0x177   :  { %v569_v36 = vpack.c.bf16 %v552_v46, %v551_v53  ;;  %v516_v11 = vmul.f32 %v2038_v28, %v478_v26  ;;  %1377 = vmatpush3.bf16.msra.mxu1 %v1413_v57  ;;  %v2165_v28 = vld [vmem:[%s2537_s4] ss:$0 sm:$0xff] }
 0x178   :  { %1378 = vmatprep.subr.bf16.mxu1 %v1414_v21 }
 0x179   :  { %1372 = vmatprep.mubr.msk.bf16.mxu0 %vm61_vm0, %v569_v36  ;;  %v554_v9 = vadd.f32 %v2046_v34, %v516_v11 }
 0x17b   :  { %v570_v50 = vpack.c.bf16 %v554_v9, %v553_v12  ;;  %1379 = vmatpush3.bf16.msra.mxu1 %v1414_v21 }
 0x17d   :  { %1373 = vmatmul.mubr.msk.bf16.gmra.mrb[28].mxu0 %vm61_vm0, %v570_v50 }
 0x218   :  { %v1346_v34 = vpop.f32.mrb[0].mxu0 }
 0x219   :  { %v674_v51 = vadd.f32 %v1346_v34, %v2165_v28  ;;  %v665_v54 = vpop.f32.mrb[1].mxu0 }
 0x21a   :  { %v666_v47 = vadd.f32 %v2165_v28, %v665_v54  ;;  %v1347_v52 = vpop.f32.mrb[2].mxu0 }
 0x21b   :  { %v826_v58 = vmul.f32 0.70710677, %v674_v51  ;;  %v677_v24 = vadd.f32 %v1347_v52, %v2165_v28  ;;  %v668_v62 = vpop.f32.mrb[3].mxu0  ;;  %v794_v0 = vmul.f32 0.5, %v674_v51 }
 0x21c   :  { %v824_v7 = vmul.f32 0.70710677, %v666_v47  ;;  %v669_v59 = vadd.f32 %v2165_v28, %v668_v62  ;;  %v792_v31 = vmul.f32 0.5, %v666_v47 }
 0x21d   :  { %1479 = verf.f32 %v826_v58  ;;  %v827_v37 = vmul.f32 0.70710677, %v677_v24  ;;  %v795_v5 = vmul.f32 0.5, %v677_v24 }
 0x21e   :  { %1481 = verf.f32 %v824_v7  ;;  %v825_v40 = vmul.f32 0.70710677, %v669_v59  ;;  %v793_v55 = vmul.f32 0.5, %v669_v59 }
 0x21f   :  { %1483 = verf.f32 %v827_v37 }
 0x220   :  { %1485 = verf.f32 %v825_v40  ;;  %v1350_v3 = vpop.f32.mrb[4].mxu0 }
 0x221   :  { %v690_v27 = vadd.f32 %v1350_v3, %v2165_v28  ;;  %v681_v4 = vpop.f32.mrb[5].mxu0 }
 0x222   :  { %v682_v6 = vadd.f32 %v2165_v28, %v681_v4  ;;  %v1351_v56 = vpop.f32.mrb[6].mxu0 }
 0x223   :  { %v830_v63 = vmul.f32 0.70710677, %v690_v27  ;;  %v693_v25 = vadd.f32 %v1351_v56, %v2165_v28  ;;  %v684_v13 = vpop.f32.mrb[7].mxu0  ;;  %v798_v34 = vmul.f32 0.5, %v690_v27 }
 0x224   :  { %v828_v14 = vmul.f32 0.70710677, %v682_v6  ;;  %v685_v18 = vadd.f32 %v2165_v28, %v684_v13  ;;  %v796_v58 = vmul.f32 0.5, %v682_v6 }
 0x225   :  { %1487 = verf.f32 %v830_v63  ;;  %v831_v2 = vmul.f32 0.70710677, %v693_v25  ;;  %v799_v51 = vmul.f32 0.5, %v693_v25 }
 0x226   :  { %1489 = verf.f32 %v828_v14  ;;  %v829_v44 = vmul.f32 0.70710677, %v685_v18  ;;  %v797_v24 = vmul.f32 0.5, %v685_v18 }
 0x227   :  { %v1480_v45 = vpop.eup %1479  ;;  %1491 = verf.f32 %v831_v2 }
 0x228   :  { %v1482_v41 = vpop.eup %1481  ;;  %v890_v60 = vadd.f32 1.0, %v1480_v45  ;;  %1493 = verf.f32 %v829_v44  ;;  %v1354_v15 = vpop.f32.mrb[8].mxu0 }
 0x229   :  { %v1484_v61 = vpop.eup %1483  ;;  %v2176_v1 = vadd.f32 %v1354_v15, %v2165_v28  ;;  %v697_v19 = vpop.f32.mrb[9].mxu0  ;;  %v888_v32 = vadd.f32 1.0, %v1482_v41 }
 0x22a   :  { %v1486_v23 = vpop.eup %1485  ;;  %v891_v16 = vadd.f32 1.0, %v1484_v61  ;;  %v2179_v29 = vadd.f32 %v2165_v28, %v697_v19  ;;  %v1355_v22 = vpop.f32.mrb[10].mxu0  ;;  %v922_v35 = vmul.f32 %v890_v60, %v794_v0 }
 0x22b   :  { %v834_v10 = vmul.f32 0.70710677, %v2176_v1  ;;  %v2183_v30 = vadd.f32 %v1355_v22, %v2165_v28  ;;  %v700_v17 = vpop.f32.mrb[11].mxu0  ;;  %v889_v49 = vadd.f32 1.0, %v1486_v23  ;;  %v920_v26 = vmul.f32 %v888_v32, %v792_v31 }
 0x22c   :  { %v923_v38 = vmul.f32 %v891_v16, %v795_v5  ;;  %v832_v48 = vmul.f32 0.70710677, %v2179_v29  ;;  %v2187_v39 = vadd.f32 %v2165_v28, %v700_v17  ;;  %v802_v23 = vmul.f32 0.5, %v2176_v1 }
 0x22d   :  { %1495 = verf.f32 %v834_v10  ;;  %v835_v42 = vmul.f32 0.70710677, %v2183_v30  ;;  %v921_v53 = vmul.f32 %v889_v49, %v793_v55  ;;  %v803_v0 = vmul.f32 0.5, %v2183_v30 }
 0x22e   :  { %v953_v20 = vpack.c.bf16 %v923_v38, %v922_v35  ;;  %1497 = verf.f32 %v832_v48  ;;  %v833_v8 = vmul.f32 0.70710677, %v2187_v39  ;;  %v800_v10 = vmul.f32 0.5, %v2179_v29 }
 0x22f   :  { %v1488_v43 = vpop.eup %1487  ;;  %1499 = verf.f32 %v835_v42  ;;  %v952_v57 = vpack.c.bf16 %v921_v53, %v920_v26  ;;  %v801_v17 = vmul.f32 0.5, %v2187_v39 }
 0x230   :  { %v1490_v46 = vpop.eup %1489  ;;  %v894_v33 = vadd.f32 1.0, %v1488_v43  ;;  %1501 = verf.f32 %v833_v8  ;;  %v1358_v36 = vpop.f32.mrb[12].mxu0 }
 0x231   :  { %v1492_v11 = vpop.eup %1491  ;;  %v892_v12 = vadd.f32 1.0, %v1490_v46  ;;  %v2192_v9 = vadd.f32 %v1358_v36, %v2165_v28  ;;  %v713_v50 = vpop.f32.mrb[13].mxu0  ;;  %1380 = vmatprep.mubr.msk.bf16.mxu1 %vm991_vm2, %v952_v57 }
 0x232   :  { %v1494_v21 = vpop.eup %1493  ;;  %v895_v54 = vadd.f32 1.0, %v1492_v11  ;;  %v2195_v47 = vadd.f32 %v2165_v28, %v713_v50  ;;  %v1359_v52 = vpop.f32.mrb[14].mxu0  ;;  %v926_v37 = vmul.f32 %v894_v33, %v798_v34  ;;  %1381 = vmatmul.mubr.msk.bf16.vlgmr.msra.gmra.mrb[0].mxu1 %vm991_vm2, %v953_v20 }
 0x233   :  { %v893_v62 = vadd.f32 1.0, %v1494_v21  ;;  %v838_v7 = vmul.f32 0.70710677, %v2192_v9  ;;  %v716_v59 = vpop.f32.mrb[15].mxu0  ;;  %v725_v27 = vadd.f32 %v1359_v52, %v2165_v28  ;;  %v924_v4 = vmul.f32 %v892_v12, %v796_v58 }
 0x234   :  { %v927_v40 = vmul.f32 %v895_v54, %v799_v51  ;;  %v836_v3 = vmul.f32 0.70710677, %v2195_v47  ;;  %v717_v6 = vadd.f32 %v2165_v28, %v716_v59  ;;  %v806_v12 = vmul.f32 0.5, %v2192_v9 }
 0x235   :  { %v925_v56 = vmul.f32 %v893_v62, %v797_v24  ;;  %1503 = verf.f32 %v838_v7  ;;  %v839_v25 = vmul.f32 0.70710677, %v725_v27  ;;  %v804_v51 = vmul.f32 0.5, %v2195_v47 }
 0x236   :  { %v955_v63 = vpack.c.bf16 %v927_v40, %v926_v37  ;;  %1505 = verf.f32 %v836_v3  ;;  %v837_v18 = vmul.f32 0.70710677, %v717_v6  ;;  %v807_v54 = vmul.f32 0.5, %v725_v27 }
 0x237   :  { %v1496_v13 = vpop.eup %1495  ;;  %v954_v14 = vpack.c.bf16 %v925_v56, %v924_v4  ;;  %1507 = verf.f32 %v839_v25  ;;  %v805_v62 = vmul.f32 0.5, %v717_v6 }
 0x238   :  { %v1498_v2 = vpop.eup %1497  ;;  %v898_v44 = vadd.f32 1.0, %v1496_v13  ;;  %v1362_v45 = vpop.f32.mrb[16].mxu0  ;;  %1509 = verf.f32 %v837_v18 }
 0x239   :  { %v1500_v41 = vpop.eup %1499  ;;  %v896_v60 = vadd.f32 1.0, %v1498_v2  ;;  %v2204_v15 = vadd.f32 %v1362_v45, %v2165_v28  ;;  %v729_v61 = vpop.f32.mrb[17].mxu0  ;;  %1384 = vmatprep.mubr.msk.bf16.mxu1 %vm991_vm2, %v954_v14 }
 0x23a   :  { %v1502_v19 = vpop.eup %1501  ;;  %v899_v5 = vadd.f32 1.0, %v1500_v41  ;;  %v2210_v16 = vadd.f32 %v2165_v28, %v729_v61  ;;  %v1363_v22 = vpop.f32.mrb[18].mxu0  ;;  %v930_v38 = vmul.f32 %v898_v44, %v802_v23  ;;  %1385 = vmatmul.mubr.msk.bf16.gmra.mrb[4].mxu1 %vm991_vm2, %v955_v63 }
 0x23b   :  { %v897_v32 = vadd.f32 1.0, %v1502_v19  ;;  %v842_v49 = vmul.f32 0.70710677, %v2204_v15  ;;  %v732_v35 = vpop.f32.mrb[19].mxu0  ;;  %v741_v1 = vadd.f32 %v1363_v22, %v2165_v28  ;;  %v928_v30 = vmul.f32 %v896_v60, %v800_v10 }
 0x23c   :  { %v931_v48 = vmul.f32 %v899_v5, %v803_v0  ;;  %v840_v31 = vmul.f32 0.70710677, %v2210_v16  ;;  %v733_v42 = vadd.f32 %v2165_v28, %v732_v35  ;;  %v810_v41 = vmul.f32 0.5, %v2204_v15 }
 0x23d   :  { %v929_v55 = vmul.f32 %v897_v32, %v801_v17  ;;  %1511 = verf.f32 %v842_v49  ;;  %v843_v39 = vmul.f32 0.70710677, %v741_v1  ;;  %v808_v0 = vmul.f32 0.5, %v2210_v16 }
 0x23e   :  { %v957_v29 = vpack.c.bf16 %v931_v48, %v930_v38  ;;  %1513 = verf.f32 %v840_v31  ;;  %v841_v43 = vmul.f32 0.70710677, %v733_v42  ;;  %v811_v5 = vmul.f32 0.5, %v741_v1 }
 0x23f   :  { %v1504_v20 = vpop.eup %1503  ;;  %v956_v8 = vpack.c.bf16 %v929_v55, %v928_v30  ;;  %1515 = verf.f32 %v843_v39  ;;  %v809_v32 = vmul.f32 0.5, %v733_v42 }
 0x240   :  { %v1506_v26 = vpop.eup %1505  ;;  %v1366_v53 = vpop.f32.mrb[20].mxu0  ;;  %v902_v46 = vadd.f32 1.0, %v1504_v20  ;;  %1517 = verf.f32 %v841_v43 }
 0x241   :  { %v2220_v33 = vadd.f32 %v1366_v53, %v2165_v28  ;;  %v745_v36 = vpop.f32.mrb[21].mxu0  ;;  %1388 = vmatprep.mubr.msk.bf16.mxu1 %vm991_vm2, %v956_v8  ;;  %v1508_v11 = vpop.eup %1507  ;;  %v900_v50 = vadd.f32 1.0, %v1506_v26 }
 0x242   :  { %v2225_v57 = vadd.f32 %v2165_v28, %v745_v36  ;;  %v1367_v21 = vpop.f32.mrb[22].mxu0  ;;  %v1510_v34 = vpop.eup %1509  ;;  %v903_v52 = vadd.f32 1.0, %v1508_v11  ;;  %1389 = vmatmul.mubr.msk.bf16.gmra.mrb[8].mxu1 %vm991_vm2, %v957_v29  ;;  %v934_v9 = vmul.f32 %v902_v46, %v806_v12 }
 0x243   :  { %v846_v58 = vmul.f32 0.70710677, %v2220_v33  ;;  %v748_v24 = vpop.f32.mrb[23].mxu0  ;;  %v901_v7 = vadd.f32 1.0, %v1510_v34  ;;  %v2231_v37 = vadd.f32 %v1367_v21, %v2165_v28  ;;  %v932_v47 = vmul.f32 %v900_v50, %v804_v51 }
 0x244   :  { %v844_v59 = vmul.f32 0.70710677, %v2225_v57  ;;  %v935_v40 = vmul.f32 %v903_v52, %v807_v54  ;;  %v2235_v3 = vadd.f32 %v2165_v28, %v748_v24  ;;  %v814_v36 = vmul.f32 0.5, %v2220_v33 }
 0x245   :  { %1519 = verf.f32 %v846_v58  ;;  %v933_v27 = vmul.f32 %v901_v7, %v805_v62  ;;  %v847_v4 = vmul.f32 0.70710677, %v2231_v37  ;;  %v812_v34 = vmul.f32 0.5, %v2225_v57 }
 0x246   :  { %1521 = verf.f32 %v844_v59  ;;  %v959_v6 = vpack.c.bf16 %v935_v40, %v934_v9  ;;  %v845_v63 = vmul.f32 0.70710677, %v2235_v3  ;;  %v815_v51 = vmul.f32 0.5, %v2231_v37 }
 0x247   :  { %v1512_v56 = vpop.eup %1511  ;;  %v958_v13 = vpack.c.bf16 %v933_v27, %v932_v47  ;;  %1523 = verf.f32 %v847_v4  ;;  %v813_v24 = vmul.f32 0.5, %v2235_v3 }
 0x248   :  { %v1514_v25 = vpop.eup %1513  ;;  %v1370_v14 = vpop.f32.mrb[24].mxu0  ;;  %v906_v18 = vadd.f32 1.0, %v1512_v56  ;;  %1525 = verf.f32 %v845_v63 }
 0x249   :  { %v2240_v2 = vadd.f32 %v1370_v14, %v2165_v28  ;;  %v761_v44 = vpop.f32.mrb[25].mxu0  ;;  %v1516_v45 = vpop.eup %1515  ;;  %v904_v60 = vadd.f32 1.0, %v1514_v25  ;;  %1392 = vmatprep.mubr.msk.bf16.mxu1 %vm991_vm2, %v958_v13 }
 0x24a   :  { %v2244_v61 = vadd.f32 %v2165_v28, %v761_v44  ;;  %v1371_v19 = vpop.f32.mrb[26].mxu0  ;;  %v1518_v23 = vpop.eup %1517  ;;  %v907_v22 = vadd.f32 1.0, %v1516_v45  ;;  %1393 = vmatmul.mubr.msk.bf16.gmra.mrb[12].mxu1 %vm991_vm2, %v959_v6  ;;  %v938_v38 = vmul.f32 %v906_v18, %v810_v41 }
 0x24b   :  { %v850_v10 = vmul.f32 0.70710677, %v2240_v2  ;;  %v764_v17 = vpop.f32.mrb[27].mxu0  ;;  %v905_v49 = vadd.f32 1.0, %v1518_v23  ;;  %v773_v15 = vadd.f32 %v1371_v19, %v2165_v28  ;;  %v936_v30 = vmul.f32 %v904_v60, %v808_v0 }
 0x24c   :  { %v848_v35 = vmul.f32 0.70710677, %v2244_v61  ;;  %v939_v48 = vmul.f32 %v907_v22, %v811_v5  ;;  %v765_v31 = vadd.f32 %v2165_v28, %v764_v17  ;;  %v818_v18 = vmul.f32 0.5, %v2240_v2 }
 0x24d   :  { %1527 = verf.f32 %v850_v10  ;;  %v937_v16 = vmul.f32 %v905_v49, %v809_v32  ;;  %v851_v1 = vmul.f32 0.70710677, %v773_v15  ;;  %v816_v45 = vmul.f32 0.5, %v2244_v61 }
 0x24e   :  { %1529 = verf.f32 %v848_v35  ;;  %v961_v29 = vpack.c.bf16 %v939_v48, %v938_v38  ;;  %v849_v39 = vmul.f32 0.70710677, %v765_v31  ;;  %v817_v41 = vmul.f32 0.5, %v765_v31 }
 0x24f   :  { %v1520_v55 = vpop.eup %1519  ;;  %v960_v20 = vpack.c.bf16 %v937_v16, %v936_v30  ;;  %1531 = verf.f32 %v851_v1 }
 0x250   :  { %v1522_v42 = vpop.eup %1521  ;;  %v1374_v8 = vpop.f32.mrb[28].mxu0  ;;  %v910_v43 = vadd.f32 1.0, %v1520_v55  ;;  %1533 = verf.f32 %v849_v39 }
 0x251   :  { %v786_v26 = vadd.f32 %v1374_v8, %v2165_v28  ;;  %v777_v53 = vpop.f32.mrb[29].mxu0  ;;  %v1524_v46 = vpop.eup %1523  ;;  %v908_v11 = vadd.f32 1.0, %v1522_v42  ;;  %1396 = vmatprep.mubr.msk.bf16.mxu1 %vm991_vm2, %v960_v20  ;;  %v2274_v8 = vld [vmem:[%s2538_s6] ss:$0 sm:$0xff] }
 0x252   :  { %v778_v12 = vadd.f32 %v2165_v28, %v777_v53  ;;  %v1375_v50 = vpop.f32.mrb[30].mxu0  ;;  %v1526_v21 = vpop.eup %1525  ;;  %v911_v54 = vadd.f32 1.0, %v1524_v46  ;;  %1397 = vmatmul.mubr.msk.bf16.gmra.mrb[16].mxu1 %vm991_vm2, %v961_v29  ;;  %v942_v59 = vmul.f32 %v910_v43, %v814_v36 }
 0x253   :  { %v854_v52 = vmul.f32 0.70710677, %v786_v26  ;;  %v780_v58 = vpop.f32.mrb[31].mxu0  ;;  %v909_v62 = vadd.f32 1.0, %v1526_v21  ;;  %v789_v33 = vadd.f32 %v1375_v50, %v2165_v28  ;;  %v940_v47 = vmul.f32 %v908_v11, %v812_v34  ;;  %v1543_v11 = vld [vmem:[%s2532_s0 + $0x10] sm:$0xff]  ;;  %v1544_v34 = vld [vmem:[%s2532_s0] sm:$0xff] }
 0x254   :  { %v852_v7 = vmul.f32 0.70710677, %v778_v12  ;;  %v943_v9 = vmul.f32 %v911_v54, %v815_v51  ;;  %v781_v40 = vadd.f32 %v2165_v28, %v780_v58  ;;  %v819_v28 = vmul.f32 0.5, %v773_v15 }
 0x255   :  { %1535 = verf.f32 %v854_v52  ;;  %v941_v57 = vmul.f32 %v909_v62, %v813_v24  ;;  %v855_v37 = vmul.f32 0.70710677, %v789_v33  ;;  %v822_v15 = vmul.f32 0.5, %v786_v26 }
 0x256   :  { %1537 = verf.f32 %v852_v7  ;;  %v963_v4 = vpack.c.bf16 %v943_v9, %v942_v59  ;;  %v853_v56 = vmul.f32 0.70710677, %v781_v40  ;;  %v823_v61 = vmul.f32 0.5, %v789_v33 }
 0x257   :  { %v1528_v27 = vpop.eup %1527  ;;  %v962_v3 = vpack.c.bf16 %v941_v57, %v940_v47  ;;  %1539 = verf.f32 %v855_v37  ;;  %v820_v31 = vmul.f32 0.5, %v778_v12  ;;  %v821_v30 = vmul.f32 0.5, %v781_v40 }
 0x258   :  { %v1530_v6 = vpop.eup %1529  ;;  %v914_v63 = vadd.f32 1.0, %v1528_v27  ;;  %1541 = verf.f32 %v853_v56 }
 0x259   :  { %v1532_v25 = vpop.eup %1531  ;;  %v912_v13 = vadd.f32 1.0, %v1530_v6  ;;  %1400 = vmatprep.mubr.msk.bf16.mxu1 %vm991_vm2, %v962_v3 }
 0x25a   :  { %v1534_v14 = vpop.eup %1533  ;;  %v915_v44 = vadd.f32 1.0, %v1532_v25  ;;  %1401 = vmatmul.mubr.msk.bf16.gmra.mrb[20].mxu1 %vm991_vm2, %v963_v4  ;;  %v946_v19 = vmul.f32 %v914_v63, %v818_v18 }
 0x25b   :  { %v913_v60 = vadd.f32 1.0, %v1534_v14  ;;  %v944_v0 = vmul.f32 %v912_v13, %v816_v45 }
 0x25c   :  { %v947_v23 = vmul.f32 %v915_v44, %v819_v28 }
 0x25d   :  { %v945_v5 = vmul.f32 %v913_v60, %v817_v41 }
 0x25e   :  { %v965_v10 = vpack.c.bf16 %v947_v23, %v946_v19 }
 0x25f   :  { %v1536_v22 = vpop.eup %1535  ;;  %v964_v32 = vpack.c.bf16 %v945_v5, %v944_v0 }
 0x260   :  { %v1538_v17 = vpop.eup %1537  ;;  %v918_v49 = vadd.f32 1.0, %v1536_v22 }
 0x261   :  { %v1540_v35 = vpop.eup %1539  ;;  %v916_v38 = vadd.f32 1.0, %v1538_v17  ;;  %1404 = vmatprep.mubr.msk.bf16.mxu1 %vm991_vm2, %v964_v32 }
 0x262   :  { %v1542_v2 = vpop.eup %1541  ;;  %v919_v48 = vadd.f32 1.0, %v1540_v35  ;;  %1405 = vmatmul.mubr.msk.bf16.gmra.mrb[24].mxu1 %vm991_vm2, %v965_v10  ;;  %v950_v1 = vmul.f32 %v918_v49, %v822_v15 }
 0x263   :  { %v917_v16 = vadd.f32 1.0, %v1542_v2  ;;  %v948_v29 = vmul.f32 %v916_v38, %v820_v31 }
 0x264   :  { %v951_v55 = vmul.f32 %v919_v48, %v823_v61 }
 0x265   :  { %v949_v39 = vmul.f32 %v917_v16, %v821_v30 }
 0x266   :  { %v967_v42 = vpack.c.bf16 %v951_v55, %v950_v1 }
 0x267   :  { %v966_v20 = vpack.c.bf16 %v949_v39, %v948_v29 }
 0x269   :  { %1408 = vmatprep.mubr.msk.bf16.mxu1 %vm991_vm2, %v966_v20 }
 0x26a   :  { %1409 = vmatmul.mubr.msk.bf16.gmra.mrb[28].mxu1 %vm991_vm2, %v967_v42 }
 0x305   :  { %v1382_v43 = vpop.f32.mrb[0].mxu1 }
 0x306   :  { %v1083_v26 = vadd.f32 %v1382_v43, %v2274_v8  ;;  %v1074_v53 = vpop.f32.mrb[1].mxu1 }
 0x307   :  { %v1075_v46 = vadd.f32 %v2274_v8, %v1074_v53  ;;  %v1383_v36 = vpop.f32.mrb[2].mxu1 }
 0x308   :  { %v1203_v12 = vadd.f32 %v1543_v11, %v1083_v26  ;;  %v1086_v50 = vadd.f32 %v1383_v36, %v2274_v8  ;;  %v1077_v21 = vpop.f32.mrb[3].mxu1 }
 0x309   :  { %v1201_v51 = vadd.f32 %v1544_v34, %v1075_v46  ;;  %v1078_v54 = vadd.f32 %v2274_v8, %v1077_v21 }
 0x30a   :  { %1235 = vst.msk [vmem:[%s2539_s7 + $0x10] sm:$0xff] %vm61_vm0, %v1203_v12 }
 0x30d   :  { %v1386_v7 = vpop.f32.mrb[4].mxu1 }
 0x30e   :  { %v1099_v33 = vadd.f32 %v1386_v7, %v2274_v8  ;;  %v1090_v59 = vpop.f32.mrb[5].mxu1 }
 0x30f   :  { %v1091_v9 = vadd.f32 %v2274_v8, %v1090_v59  ;;  %v1387_v40 = vpop.f32.mrb[6].mxu1 }
 0x310   :  { %v1102_v37 = vadd.f32 %v1387_v40, %v2274_v8  ;;  %v1093_v27 = vpop.f32.mrb[7].mxu1 }
 0x311   :  { %v1545_v52 = vld [vmem:[%s2532_s0 + $0x18] sm:$0xff]  ;;  %v1094_v6 = vadd.f32 %v2274_v8, %v1093_v27 }
 0x312   :  { %v1204_v58 = vadd.f32 %v1545_v52, %v1086_v50  ;;  %1233 = vst.msk [vmem:[%s2539_s7] sm:$0xff] %vm61_vm0, %v1201_v51 }
 0x315   :  { %v1390_v14 = vpop.f32.mrb[8].mxu1 }
 0x316   :  { %v1115_v18 = vadd.f32 %v1390_v14, %v2274_v8  ;;  %v1106_v28 = vpop.f32.mrb[9].mxu1 }
 0x317   :  { %v1107_v44 = vadd.f32 %v2274_v8, %v1106_v28  ;;  %v1391_v45 = vpop.f32.mrb[10].mxu1 }
 0x318   :  { %v1118_v19 = vadd.f32 %v1391_v45, %v2274_v8  ;;  %v1109_v23 = vpop.f32.mrb[11].mxu1 }
 0x319   :  { %v1546_v24 = vld [vmem:[%s2532_s0 + $0x8] sm:$0xff]  ;;  %v1110_v22 = vadd.f32 %v2274_v8, %v1109_v23 }
 0x31a   :  { %v1202_v62 = vadd.f32 %v1546_v24, %v1078_v54  ;;  %1236 = vst.msk [vmem:[%s2539_s7 + $0x18] sm:$0xff] %vm61_vm0, %v1204_v58 }
 0x31c   :  { %1234 = vst.msk [vmem:[%s2539_s7 + $0x8] sm:$0xff] %vm61_vm0, %v1202_v62 }
 0x31d   :  { %v1394_v35 = vpop.f32.mrb[12].mxu1 }
 0x31e   :  { %v1131_v38 = vadd.f32 %v1394_v35, %v2274_v8  ;;  %v1122_v2 = vpop.f32.mrb[13].mxu1 }
 0x31f   :  { %v1123_v15 = vadd.f32 %v2274_v8, %v1122_v2  ;;  %v1395_v61 = vpop.f32.mrb[14].mxu1 }
 0x320   :  { %v1134_v30 = vadd.f32 %v1395_v61, %v2274_v8  ;;  %v1125_v16 = vpop.f32.mrb[15].mxu1 }
 0x321   :  { %v1126_v29 = vadd.f32 %v2274_v8, %v1125_v16 }
 0x323   :  { %v1547_v47 = vld [vmem:[%s2532_s0 + $0x30] sm:$0xff]  ;;  %v1548_v4 = vld [vmem:[%s2532_s0 + $0x20] sm:$0xff] }
 0x324   :  { %v1207_v57 = vadd.f32 %v1547_v47, %v1099_v33  ;;  %v1205_v56 = vadd.f32 %v1548_v4, %v1091_v9 }
 0x325   :  { %v1398_v26 = vpop.f32.mrb[16].mxu1 }
 0x326   :  { %1239 = vst.msk [vmem:[%s2539_s7 + $0x30] sm:$0xff] %vm61_vm0, %v1207_v57  ;;  %v1147_v53 = vadd.f32 %v1398_v26, %v2274_v8  ;;  %v1138_v46 = vpop.f32.mrb[17].mxu1 }
 0x327   :  { %v1139_v36 = vadd.f32 %v2274_v8, %v1138_v46  ;;  %v1399_v11 = vpop.f32.mrb[18].mxu1 }
 0x328   :  { %v1150_v21 = vadd.f32 %v1399_v11, %v2274_v8  ;;  %v1141_v34 = vpop.f32.mrb[19].mxu1 }
 0x329   :  { %v1142_v52 = vadd.f32 %v2274_v8, %v1141_v34 }
 0x32d   :  { %v1549_v3 = vld [vmem:[%s2532_s0 + $0x38] sm:$0xff]  ;;  %v1402_v33 = vpop.f32.mrb[20].mxu1 }
 0x32e   :  { %v1208_v63 = vadd.f32 %v1549_v3, %v1102_v37  ;;  %1237 = vst.msk [vmem:[%s2539_s7 + $0x20] sm:$0xff] %vm61_vm0, %v1205_v56  ;;  %v1163_v59 = vadd.f32 %v1402_v33, %v2274_v8  ;;  %v1154_v9 = vpop.f32.mrb[21].mxu1 }
 0x32f   :  { %v1155_v40 = vadd.f32 %v2274_v8, %v1154_v9  ;;  %v1403_v47 = vpop.f32.mrb[22].mxu1 }
 0x330   :  { %v1166_v27 = vadd.f32 %v1403_v47, %v2274_v8  ;;  %v1157_v4 = vpop.f32.mrb[23].mxu1 }
 0x331   :  { %v1158_v3 = vadd.f32 %v2274_v8, %v1157_v4 }
 0x335   :  { %v1550_v25 = vld [vmem:[%s2532_s0 + $0x28] sm:$0xff] }
 0x336   :  { %v1206_v13 = vadd.f32 %v1550_v25, %v1094_v6  ;;  %1240 = vst.msk [vmem:[%s2539_s7 + $0x38] sm:$0xff] %vm61_vm0, %v1208_v63 }
 0x338   :  { %1238 = vst.msk [vmem:[%s2539_s7 + $0x28] sm:$0xff] %vm61_vm0, %v1206_v13 }
 0x33f   :  { %v1551_v41 = vld [vmem:[%s2532_s0 + $0x50] sm:$0xff]  ;;  %v1552_v0 = vld [vmem:[%s2532_s0 + $0x40] sm:$0xff] }
 0x340   :  { %v1211_v60 = vadd.f32 %v1551_v41, %v1115_v18  ;;  %v1209_v5 = vadd.f32 %v1552_v0, %v1107_v44  ;;  %v1406_v18 = vpop.f32.mrb[24].mxu1 }
 0x341   :  { %v1179_v28 = vadd.f32 %v1406_v18, %v2274_v8  ;;  %v1170_v44 = vpop.f32.mrb[25].mxu1 }
 0x342   :  { %1243 = vst.msk [vmem:[%s2539_s7 + $0x50] sm:$0xff] %vm61_vm0, %v1211_v60  ;;  %v1171_v45 = vadd.f32 %v2274_v8, %v1170_v44  ;;  %v1407_v41 = vpop.f32.mrb[26].mxu1 }
 0x343   :  { %v1182_v23 = vadd.f32 %v1407_v41, %v2274_v8  ;;  %v1173_v0 = vpop.f32.mrb[27].mxu1 }
 0x349   :  { %v1553_v10 = vld [vmem:[%s2532_s0 + $0x58] sm:$0xff] }
 0x34a   :  { %v1212_v17 = vadd.f32 %v1553_v10, %v1118_v19  ;;  %1241 = vst.msk [vmem:[%s2539_s7 + $0x40] sm:$0xff] %vm61_vm0, %v1209_v5  ;;  %v1174_v10 = vadd.f32 %v2274_v8, %v1173_v0 }
 0x351   :  { %v1554_v32 = vld [vmem:[%s2532_s0 + $0x48] sm:$0xff] }
 0x352   :  { %v1210_v49 = vadd.f32 %v1554_v32, %v1110_v22  ;;  %1244 = vst.msk [vmem:[%s2539_s7 + $0x58] sm:$0xff] %vm61_vm0, %v1212_v17 }
 0x354   :  { %1242 = vst.msk [vmem:[%s2539_s7 + $0x48] sm:$0xff] %vm61_vm0, %v1210_v49 }
 0x35b   :  { %v1555_v48 = vld [vmem:[%s2532_s0 + $0x70] sm:$0xff]  ;;  %v1556_v1 = vld [vmem:[%s2532_s0 + $0x60] sm:$0xff] }
 0x35c   :  { %v1215_v31 = vadd.f32 %v1555_v48, %v1131_v38  ;;  %v1213_v55 = vadd.f32 %v1556_v1, %v1123_v15  ;;  %v1410_v38 = vpop.f32.mrb[28].mxu1 }
 0x35d   :  { %v1195_v2 = vadd.f32 %v1410_v38, %v2274_v8  ;;  %v1186_v15 = vpop.f32.mrb[29].mxu1 }
 0x35e   :  { %1247 = vst.msk [vmem:[%s2539_s7 + $0x70] sm:$0xff] %vm61_vm0, %v1215_v31  ;;  %v1187_v61 = vadd.f32 %v2274_v8, %v1186_v15  ;;  %v1411_v48 = vpop.f32.mrb[30].mxu1 }
 0x35f   :  { %v1198_v16 = vadd.f32 %v1411_v48, %v2274_v8  ;;  %v1189_v1 = vpop.f32.mrb[31].mxu1 }
 0x365   :  { %v1557_v39 = vld [vmem:[%s2532_s0 + $0x78] sm:$0xff] }
 0x366   :  { %v1216_v42 = vadd.f32 %v1557_v39, %v1134_v30  ;;  %1245 = vst.msk [vmem:[%s2539_s7 + $0x60] sm:$0xff] %vm61_vm0, %v1213_v55  ;;  %v1190_v39 = vadd.f32 %v2274_v8, %v1189_v1 }
 0x36d   :  { %v1558_v20 = vld [vmem:[%s2532_s0 + $0x68] sm:$0xff] }
 0x36e   :  { %v1214_v43 = vadd.f32 %v1558_v20, %v1126_v29  ;;  %1248 = vst.msk [vmem:[%s2539_s7 + $0x78] sm:$0xff] %vm61_vm0, %v1216_v42 }
 0x370   :  { %1246 = vst.msk [vmem:[%s2539_s7 + $0x68] sm:$0xff] %vm61_vm0, %v1214_v43 }
 0x377   :  { %v1559_v12 = vld [vmem:[%s2532_s0 + $0x90] sm:$0xff]  ;;  %v1560_v51 = vld [vmem:[%s2532_s0 + $0x80] sm:$0xff] }
 0x378   :  { %v1219_v50 = vadd.f32 %v1559_v12, %v1147_v53  ;;  %v1217_v54 = vadd.f32 %v1560_v51, %v1139_v36 }
 0x37a   :  { %1251 = vst.msk [vmem:[%s2539_s7 + $0x90] sm:$0xff] %vm61_vm0, %v1219_v50 }
 0x381   :  { %v1561_v58 = vld [vmem:[%s2532_s0 + $0x98] sm:$0xff] }
 0x382   :  { %v1220_v24 = vadd.f32 %v1561_v58, %v1150_v21  ;;  %1249 = vst.msk [vmem:[%s2539_s7 + $0x80] sm:$0xff] %vm61_vm0, %v1217_v54 }
 0x389   :  { %v1562_v62 = vld [vmem:[%s2532_s0 + $0x88] sm:$0xff] }
 0x38a   :  { %v1218_v7 = vadd.f32 %v1562_v62, %v1142_v52  ;;  %1252 = vst.msk [vmem:[%s2539_s7 + $0x98] sm:$0xff] %vm61_vm0, %v1220_v24 }
 0x38c   :  { %1250 = vst.msk [vmem:[%s2539_s7 + $0x88] sm:$0xff] %vm61_vm0, %v1218_v7 }
 0x393   :  { %v1563_v57 = vld [vmem:[%s2532_s0 + $0xb0] sm:$0xff]  ;;  %v1564_v56 = vld [vmem:[%s2532_s0 + $0xa0] sm:$0xff] }
 0x394   :  { %v1223_v37 = vadd.f32 %v1563_v57, %v1163_v59  ;;  %v1221_v6 = vadd.f32 %v1564_v56, %v1155_v40 }
 0x396   :  { %1255 = vst.msk [vmem:[%s2539_s7 + $0xb0] sm:$0xff] %vm61_vm0, %v1223_v37 }
 0x39d   :  { %v1565_v63 = vld [vmem:[%s2532_s0 + $0xb8] sm:$0xff] }
 0x39e   :  { %v1224_v25 = vadd.f32 %v1565_v63, %v1166_v27  ;;  %1253 = vst.msk [vmem:[%s2539_s7 + $0xa0] sm:$0xff] %vm61_vm0, %v1221_v6 }
 0x3a5   :  { %v1566_v13 = vld [vmem:[%s2532_s0 + $0xa8] sm:$0xff] }
 0x3a6   :  { %v1222_v14 = vadd.f32 %v1566_v13, %v1158_v3  ;;  %1256 = vst.msk [vmem:[%s2539_s7 + $0xb8] sm:$0xff] %vm61_vm0, %v1224_v25 }
 0x3a8   :  { %1254 = vst.msk [vmem:[%s2539_s7 + $0xa8] sm:$0xff] %vm61_vm0, %v1222_v14 }
 0x3af   :  { %v1567_v60 = vld [vmem:[%s2532_s0 + $0xd0] sm:$0xff]  ;;  %v1568_v5 = vld [vmem:[%s2532_s0 + $0xc0] sm:$0xff] }
 0x3b0   :  { %v1227_v19 = vadd.f32 %v1567_v60, %v1179_v28  ;;  %v1225_v22 = vadd.f32 %v1568_v5, %v1171_v45 }
 0x3b2   :  { %1259 = vst.msk [vmem:[%s2539_s7 + $0xd0] sm:$0xff] %vm61_vm0, %v1227_v19 }
 0x3b9   :  { %v1569_v17 = vld [vmem:[%s2532_s0 + $0xd8] sm:$0xff] }
 0x3ba   :  { %v1228_v32 = vadd.f32 %v1569_v17, %v1182_v23  ;;  %1257 = vst.msk [vmem:[%s2539_s7 + $0xc0] sm:$0xff] %vm61_vm0, %v1225_v22 }
 0x3c1   :  { %v1570_v49 = vld [vmem:[%s2532_s0 + $0xc8] sm:$0xff] }
 0x3c2   :  { %v1226_v35 = vadd.f32 %v1570_v49, %v1174_v10  ;;  %1260 = vst.msk [vmem:[%s2539_s7 + $0xd8] sm:$0xff] %vm61_vm0, %v1228_v32 }
 0x3c4   :  { %1258 = vst.msk [vmem:[%s2539_s7 + $0xc8] sm:$0xff] %vm61_vm0, %v1226_v35 }
 0x3cb   :  { %v1571_v31 = vld [vmem:[%s2532_s0 + $0xf0] sm:$0xff]  ;;  %v1572_v55 = vld [vmem:[%s2532_s0 + $0xe0] sm:$0xff] }
 0x3cc   :  { %v1231_v30 = vadd.f32 %v1571_v31, %v1195_v2  ;;  %v1229_v29 = vadd.f32 %v1572_v55, %v1187_v61 }
 0x3ce   :  { %1263 = vst.msk [vmem:[%s2539_s7 + $0xf0] sm:$0xff] %vm61_vm0, %v1231_v30 }
 0x3d5   :  { %v1573_v42 = vld [vmem:[%s2532_s0 + $0xf8] sm:$0xff] }
 0x3d6   :  { %v1232_v20 = vadd.f32 %v1573_v42, %v1198_v16  ;;  %1261 = vst.msk [vmem:[%s2539_s7 + $0xe0] sm:$0xff] %vm61_vm0, %v1229_v29 }
 0x3dd   :  { %v1574_v43 = vld [vmem:[%s2532_s0 + $0xe8] sm:$0xff] }
 0x3de   :  { %v1230_v8 = vadd.f32 %v1574_v43, %v1190_v39  ;;  %1264 = vst.msk [vmem:[%s2539_s7 + $0xf8] sm:$0xff] %vm61_vm0, %v1232_v20 }
 0x3e0   :  { %1262 = vst.msk [vmem:[%s2539_s7 + $0xe8] sm:$0xff] %vm61_vm0, %v1230_v8 }

</bundles_post_ra>
